<compile_context>
chip_gen: v6e
topology: v6e:2x2x1
jax: 0.10.0
libtpu: 0.0.40
codegen_flags: <defaults>
</compile_context>

<pallas_src>
import functools

import jax
import jax.numpy as jnp
from jax.experimental import pallas as pl
from jax.experimental.pallas import tpu as pltpu


# (conv_K, conv_stride, pool_K, pool_stride, C_out) per layer, from the module.
_LAYERS = (
    (5, 1, 5, 2, 48),
    (7, 2, 7, 4, 96),
    (9, 2, 9, 4, 128),
)


def _seq_dims(L_in):
    """Static (conv-out length, pool-out length) per layer."""
    dims, L = [], L_in
    for K, cs, pk, ps, _ in _LAYERS:
        L_conv = (L - K) // cs + 1
        L_pool = (L_conv - pk) // ps + 1
        dims.append((L_conv, L_pool))
        L = L_pool
    return tuple(dims)


def _rows(ref, start, size, stride):
    """`size` rows of a 2-D ref starting at `start` with row stride `stride`."""
    if stride == 1 or size == 1:
        return ref[pl.ds(start, size), :]
    return ref[pl.ds(start, size, stride), :]


def _cnn_rnn_kernel(x_ref,
                    w1_ref, b1_ref, g1_ref, h1_ref,
                    w2_ref, b2_ref, g2_ref, h2_ref,
                    w3_ref, b3_ref, g3_ref, h3_ref,
                    wf_ref, bf_ref,
                    out_ref,
                    c1_ref, a1_ref, c2_ref, a2_ref, c3_ref,
                    *, dims):
    def block(src_ref, conv_ref, w_ref, b_ref, g_ref, h_ref, layer_idx):
        K, conv_stride, pool_k, pool_stride, _ = _LAYERS[layer_idx]
        L_conv, L_pool = dims[layer_idx]

        # Conv1d as ONE deep im2col matmul on the MXU: concatenate the K taps
        # along the channel axis -> contraction depth K*C_in.
        lhs = jnp.concatenate(
            [_rows(src_ref, k, L_conv, conv_stride) for k in range(K)], axis=-1)
        conv_ref[...] = jnp.dot(lhs.astype(jnp.bfloat16), w_ref[...],
                                preferred_element_type=jnp.float32) + b_ref[...]

        # MaxPool1d (no padding, floor mode).
        m = _rows(conv_ref, 0, L_pool, pool_stride)
        for j in range(1, pool_k):
            m = jnp.maximum(m, _rows(conv_ref, j, L_pool, pool_stride))

        # BatchNorm (inference: y = x*scale + shift) + ReLU, in f32 on the VPU.
        return jnp.maximum(m * g_ref[...] + h_ref[...], 0.0)

    a1_ref[...] = block(x_ref, c1_ref, w1_ref, b1_ref, g1_ref, h1_ref, 0)
    a2_ref[...] = block(a1_ref, c2_ref, w2_ref, b2_ref, g2_ref, h2_ref, 1)
    y3 = block(a2_ref, c3_ref, w3_ref, b3_ref, g3_ref, h3_ref, 2)

    # fc(content[:, :, -1]) -> softmax.  Dropout(0.5) is identity in eval mode.
    L_pool3 = dims[2][1]
    feat = y3[L_pool3 - 1:L_pool3, :]                         # (1, 128) last step
    logits = jnp.dot(feat, wf_ref[...],
                     preferred_element_type=jnp.float32) + bf_ref[...]
    mx = jnp.max(logits, axis=-1, keepdims=True)
    e = jnp.exp(logits - mx)
    out_ref[...] = (e / jnp.sum(e, axis=-1, keepdims=True)).astype(out_ref.dtype)


def cnn_rnn_pallas(x, params):
    """x: (B, L_in, E) f32 embedded sequence -> (B, 2) class probabilities."""
    B, L_in, E = x.shape
    dims = _seq_dims(L_in)
    (L_c1, L_p1), (L_c2, L_p2), (L_c3, L_p3) = dims
    assert L_p3 >= 1, "sequence too short for the conv/pool stack (need >= 429)"

    kernel = functools.partial(_cnn_rnn_kernel, dims=dims)
    const = lambda i: (0, 0)

    probs = pl.pallas_call(
        kernel,
        out_shape=jax.ShapeDtypeStruct((B, 1, 2), jnp.float32),
        grid=(B,),
        in_specs=[
            pl.BlockSpec((None, L_in, E), lambda i: (i, 0, 0)),      # embedded row
            pl.BlockSpec((5 * E, 48), const),    pl.BlockSpec((1, 48), const),
            pl.BlockSpec((1, 48), const),        pl.BlockSpec((1, 48), const),
            pl.BlockSpec((7 * 48, 96), const),   pl.BlockSpec((1, 96), const),
            pl.BlockSpec((1, 96), const),        pl.BlockSpec((1, 96), const),
            pl.BlockSpec((9 * 96, 128), const),  pl.BlockSpec((1, 128), const),
            pl.BlockSpec((1, 128), const),       pl.BlockSpec((1, 128), const),
            pl.BlockSpec((128, 2), const),       pl.BlockSpec((1, 2), const),
        ],
        out_specs=pl.BlockSpec((None, 1, 2), lambda i: (i, 0, 0)),
        scratch_shapes=[
            pltpu.VMEM((L_c1, 48), jnp.float32),    # layer1 conv (pre-pool)
            pltpu.VMEM((L_p1, 48), jnp.float32),    # layer1 activations
            pltpu.VMEM((L_c2, 96), jnp.float32),    # layer2 conv (pre-pool)
            pltpu.VMEM((L_p2, 96), jnp.float32),    # layer2 activations
            pltpu.VMEM((L_c3, 128), jnp.float32),   # layer3 conv (pre-pool)
        ],
        compiler_params=pltpu.CompilerParams(
            dimension_semantics=("parallel",)),     # batch rows across TCs (v7x)
    )(x,
      params["w1"], params["b1"], params["bn1_scale"], params["bn1_shift"],
      params["w2"], params["b2"], params["bn2_scale"], params["bn2_shift"],
      params["w3"], params["b3"], params["bn3_scale"], params["bn3_shift"],
      params["wf"], params["bf"])
    return probs.reshape(B, 2)


def init_params(key, vocab_size, embed_dim):
    keys = jax.random.split(key, 9)

    def u(k, shape, scale, dtype=jnp.float32):
        return jax.random.uniform(k, shape, jnp.float32, -scale, scale).astype(dtype)

    E = embed_dim
    p = {}
    p["embed"] = u(keys[0], (vocab_size, E), 0.1)            # init_weights()
    # Conv weights as (K*C_in, C_out): row k*C_in + c multiplies input position
    # t*stride + k, channel c (PyTorch layout (C_out, C_in, K) transposed).
    p["w1"] = u(keys[1], (5 * E, 48), (E * 5) ** -0.5, jnp.bfloat16)
    p["b1"] = u(keys[2], (1, 48), (E * 5) ** -0.5)
    p["w2"] = u(keys[3], (7 * 48, 96), (48 * 7) ** -0.5, jnp.bfloat16)
    p["b2"] = u(keys[4], (1, 96), (48 * 7) ** -0.5)
    p["w3"] = u(keys[5], (9 * 96, 128), (96 * 9) ** -0.5, jnp.bfloat16)
    p["b3"] = u(keys[6], (1, 128), (96 * 9) ** -0.5)
    p["wf"] = u(keys[7], (128, 2), 128 ** -0.5)
    p["bf"] = u(keys[8], (1, 2), 128 ** -0.5)

    # BatchNorm inference with default running stats (mean=0, var=1) and
    # default affine (gamma=1, beta=0): y = x / sqrt(1 + eps).  (The module's
    # nn.BatchNorm2d(48) on a 3-D tensor is treated as channel-wise BN.)
    eps = 1e-5
    for name, c in (("bn1", 48), ("bn2", 96), ("bn3", 128)):
        p[name + "_scale"] = jnp.full((1, c), 1.0 / jnp.sqrt(1.0 + eps), jnp.float32)
        p[name + "_shift"] = jnp.zeros((1, c), jnp.float32)
    return p


def cnn_rnn_forward(params, content, hidden):
    # Embedding lookup (gather) in plain JAX; result is channels-last (B, L, E),
    # which absorbs PyTorch's .squeeze().transpose(2, 1).
    x = params["embed"][content]
    probs = cnn_rnn_pallas(x, params)      # softmax(fc(layer3(...)[:, :, -1]))
    # TODO(synk): Dropout(0.5) and BatchNorm training-mode batch statistics are
    # not reproduced; eval-mode deterministic semantics are used instead.
    return probs, hidden                   # hidden is returned unchanged


if __name__ == "__main__":
    vocab_size, embed_dim = 100, 32
    batch, seq = 2, 512   # seq >= 429 is required by the conv/pool stack

    key = jax.random.PRNGKey(0)
    pkey, dkey = jax.random.split(key)
    params = init_params(pkey, vocab_size, embed_dim)

    content = jax.random.randint(dkey, (batch, seq), 0, vocab_size, dtype=jnp.int32)
    hidden = jnp.zeros((2, batch, 128), jnp.float32)        # init_hidden (non-LSTM)

    probs, h_out = cnn_rnn_forward(params, content, hidden)
    jax.block_until_ready((probs, h_out))

    assert probs.shape == (batch, 2)
    assert bool(jnp.all(jnp.isfinite(probs)))
    assert bool(jnp.allclose(jnp.sum(probs, axis=-1), 1.0, atol=1e-5))
    print("KERNEL_OK")
</pallas_src>

<mosaic_0001>
module attributes {stable_mosaic.version = 11 : i64} {
  func.func @_cnn_rnn_kernel(%arg0: i32, %arg1: memref<1x512x32xf32, #tpu.memory_space<vmem>>, %arg2: memref<160x48xbf16, #tpu.memory_space<vmem>>, %arg3: memref<1x48xf32, #tpu.memory_space<vmem>>, %arg4: memref<1x48xf32, #tpu.memory_space<vmem>>, %arg5: memref<1x48xf32, #tpu.memory_space<vmem>>, %arg6: memref<336x96xbf16, #tpu.memory_space<vmem>>, %arg7: memref<1x96xf32, #tpu.memory_space<vmem>>, %arg8: memref<1x96xf32, #tpu.memory_space<vmem>>, %arg9: memref<1x96xf32, #tpu.memory_space<vmem>>, %arg10: memref<864x128xbf16, #tpu.memory_space<vmem>>, %arg11: memref<1x128xf32, #tpu.memory_space<vmem>>, %arg12: memref<1x128xf32, #tpu.memory_space<vmem>>, %arg13: memref<1x128xf32, #tpu.memory_space<vmem>>, %arg14: memref<128x2xf32, #tpu.memory_space<vmem>>, %arg15: memref<1x2xf32, #tpu.memory_space<vmem>>, %arg16: memref<1x1x2xf32, #tpu.memory_space<vmem>>, %arg17: memref<508x48xf32, #tpu.memory_space<vmem>>, %arg18: memref<252x48xf32, #tpu.memory_space<vmem>>, %arg19: memref<123x96xf32, #tpu.memory_space<vmem>>, %arg20: memref<30x96xf32, #tpu.memory_space<vmem>>, %arg21: memref<11x128xf32, #tpu.memory_space<vmem>>) attributes {dimension_semantics = [#tpu.dimension_semantics<parallel>], iteration_bounds = array<i64: 2>, scalar_prefetch = 0 : i64, scratch_operands = 5 : i64, tpu.core_type = #tpu.core_type<tc>, window_params = [{transform_indices = @transform_0, window_bounds = array<i64: 1, 512, 32>}, {pipeline_mode = #tpu.pipeline_mode<synchronous>, transform_indices = @transform_1, window_bounds = array<i64: 160, 48>}, {pipeline_mode = #tpu.pipeline_mode<synchronous>, transform_indices = @transform_2, window_bounds = array<i64: 1, 48>}, {pipeline_mode = #tpu.pipeline_mode<synchronous>, transform_indices = @transform_3, window_bounds = array<i64: 1, 48>}, {pipeline_mode = #tpu.pipeline_mode<synchronous>, transform_indices = @transform_4, window_bounds = array<i64: 1, 48>}, {pipeline_mode = #tpu.pipeline_mode<synchronous>, transform_indices = @transform_5, window_bounds = array<i64: 336, 96>}, {pipeline_mode = #tpu.pipeline_mode<synchronous>, transform_indices = @transform_6, window_bounds = array<i64: 1, 96>}, {pipeline_mode = #tpu.pipeline_mode<synchronous>, transform_indices = @transform_7, window_bounds = array<i64: 1, 96>}, {pipeline_mode = #tpu.pipeline_mode<synchronous>, transform_indices = @transform_8, window_bounds = array<i64: 1, 96>}, {pipeline_mode = #tpu.pipeline_mode<synchronous>, transform_indices = @transform_9, window_bounds = array<i64: 864, 128>}, {pipeline_mode = #tpu.pipeline_mode<synchronous>, transform_indices = @transform_10, window_bounds = array<i64: 1, 128>}, {pipeline_mode = #tpu.pipeline_mode<synchronous>, transform_indices = @transform_11, window_bounds = array<i64: 1, 128>}, {pipeline_mode = #tpu.pipeline_mode<synchronous>, transform_indices = @transform_12, window_bounds = array<i64: 1, 128>}, {pipeline_mode = #tpu.pipeline_mode<synchronous>, transform_indices = @transform_13, window_bounds = array<i64: 128, 2>}, {pipeline_mode = #tpu.pipeline_mode<synchronous>, transform_indices = @transform_14, window_bounds = array<i64: 1, 2>}, {transform_indices = @transform_15, window_bounds = array<i64: 1, 1, 2>}]} {
    %c0 = arith.constant 0 : index
    %c0_0 = arith.constant 0 : index
    %c0_1 = arith.constant 0 : index
    %0 = vector.load %arg1[%c0, %c0_0, %c0_1] : memref<1x512x32xf32, #tpu.memory_space<vmem>>, vector<1x508x32xf32>
    %1 = vector.shape_cast %0 : vector<1x508x32xf32> to vector<508x32xf32>
    %c0_2 = arith.constant 0 : index
    %c1 = arith.constant 1 : index
    %c0_3 = arith.constant 0 : index
    %2 = vector.load %arg1[%c0_2, %c1, %c0_3] : memref<1x512x32xf32, #tpu.memory_space<vmem>>, vector<1x508x32xf32>
    %3 = vector.shape_cast %2 : vector<1x508x32xf32> to vector<508x32xf32>
    %c0_4 = arith.constant 0 : index
    %c2 = arith.constant 2 : index
    %c0_5 = arith.constant 0 : index
    %4 = vector.load %arg1[%c0_4, %c2, %c0_5] : memref<1x512x32xf32, #tpu.memory_space<vmem>>, vector<1x508x32xf32>
    %5 = vector.shape_cast %4 : vector<1x508x32xf32> to vector<508x32xf32>
    %c0_6 = arith.constant 0 : index
    %c3 = arith.constant 3 : index
    %c0_7 = arith.constant 0 : index
    %6 = vector.load %arg1[%c0_6, %c3, %c0_7] : memref<1x512x32xf32, #tpu.memory_space<vmem>>, vector<1x508x32xf32>
    %7 = vector.shape_cast %6 : vector<1x508x32xf32> to vector<508x32xf32>
    %c0_8 = arith.constant 0 : index
    %c4 = arith.constant 4 : index
    %c0_9 = arith.constant 0 : index
    %8 = vector.load %arg1[%c0_8, %c4, %c0_9] : memref<1x512x32xf32, #tpu.memory_space<vmem>>, vector<1x508x32xf32>
    %9 = vector.shape_cast %8 : vector<1x508x32xf32> to vector<508x32xf32>
    %10 = tpu.concatenate %1, %3, %5, %7, %9 in 1 : vector<508x32xf32>, vector<508x32xf32>, vector<508x32xf32>, vector<508x32xf32>, vector<508x32xf32> -> vector<508x160xf32>
    %11 = arith.truncf %10 : vector<508x160xf32> to vector<508x160xbf16>
    %c0_10 = arith.constant 0 : index
    %c0_11 = arith.constant 0 : index
    %12 = vector.load %arg2[%c0_10, %c0_11] : memref<160x48xbf16, #tpu.memory_space<vmem>>, vector<160x48xbf16>
    %cst = arith.constant dense<0.000000e+00> : vector<508x48xf32>
    %13 = tpu.matmul %11, %12, %cst {dimension_numbers = #tpu.dot_dimension_numbers<[1], [0], [0], [1], [0, 0, 1, 1], [], []>} : vector<508x160xbf16>, vector<160x48xbf16>, vector<508x48xf32> -> vector<508x48xf32>
    %c0_12 = arith.constant 0 : index
    %c0_13 = arith.constant 0 : index
    %14 = vector.load %arg3[%c0_12, %c0_13] : memref<1x48xf32, #tpu.memory_space<vmem>>, vector<1x48xf32>
    %15 = vector.broadcast %14 : vector<1x48xf32> to vector<508x48xf32>
    %16 = arith.addf %13, %15 : vector<508x48xf32>
    %c0_14 = arith.constant 0 : index
    %c0_15 = arith.constant 0 : index
    %17 = vector.load %arg17[%c0_14, %c0_15] : memref<508x48xf32, #tpu.memory_space<vmem>>, vector<508x48xf32>
    tpu.vector_store %arg17[%c0_14, %c0_15], %16 {strides = array<i32>} : memref<508x48xf32, #tpu.memory_space<vmem>>, vector<508x48xf32>,
    %c0_16 = arith.constant 0 : index
    %c0_17 = arith.constant 0 : index
    %18 = tpu.strided_load %arg17[%c0_16, %c0_17] {strides = array<i32: 2, 1>} : memref<508x48xf32, #tpu.memory_space<vmem>>, vector<252x48xf32>
    %c1_18 = arith.constant 1 : index
    %c0_19 = arith.constant 0 : index
    %19 = tpu.strided_load %arg17[%c1_18, %c0_19] {strides = array<i32: 2, 1>} : memref<508x48xf32, #tpu.memory_space<vmem>>, vector<252x48xf32>
    %20 = arith.maximumf %18, %19 : vector<252x48xf32>
    %c2_20 = arith.constant 2 : index
    %c0_21 = arith.constant 0 : index
    %21 = tpu.strided_load %arg17[%c2_20, %c0_21] {strides = array<i32: 2, 1>} : memref<508x48xf32, #tpu.memory_space<vmem>>, vector<252x48xf32>
    %22 = arith.maximumf %20, %21 : vector<252x48xf32>
    %c3_22 = arith.constant 3 : index
    %c0_23 = arith.constant 0 : index
    %23 = tpu.strided_load %arg17[%c3_22, %c0_23] {strides = array<i32: 2, 1>} : memref<508x48xf32, #tpu.memory_space<vmem>>, vector<252x48xf32>
    %24 = arith.maximumf %22, %23 : vector<252x48xf32>
    %c4_24 = arith.constant 4 : index
    %c0_25 = arith.constant 0 : index
    %25 = tpu.strided_load %arg17[%c4_24, %c0_25] {strides = array<i32: 2, 1>} : memref<508x48xf32, #tpu.memory_space<vmem>>, vector<252x48xf32>
    %26 = arith.maximumf %24, %25 : vector<252x48xf32>
    %c0_26 = arith.constant 0 : index
    %c0_27 = arith.constant 0 : index
    %27 = vector.load %arg4[%c0_26, %c0_27] : memref<1x48xf32, #tpu.memory_space<vmem>>, vector<1x48xf32>
    %28 = vector.broadcast %27 : vector<1x48xf32> to vector<252x48xf32>
    %29 = arith.mulf %26, %28 : vector<252x48xf32>
    %c0_28 = arith.constant 0 : index
    %c0_29 = arith.constant 0 : index
    %30 = vector.load %arg5[%c0_28, %c0_29] : memref<1x48xf32, #tpu.memory_space<vmem>>, vector<1x48xf32>
    %31 = vector.broadcast %30 : vector<1x48xf32> to vector<252x48xf32>
    %32 = arith.addf %29, %31 : vector<252x48xf32>
    %cst_30 = arith.constant 0.000000e+00 : f32
    %33 = vector.broadcast %cst_30 : f32 to vector<252x48xf32>
    %34 = arith.maximumf %32, %33 : vector<252x48xf32>
    %c0_31 = arith.constant 0 : index
    %c0_32 = arith.constant 0 : index
    %35 = vector.load %arg18[%c0_31, %c0_32] : memref<252x48xf32, #tpu.memory_space<vmem>>, vector<252x48xf32>
    tpu.vector_store %arg18[%c0_31, %c0_32], %34 {strides = array<i32>} : memref<252x48xf32, #tpu.memory_space<vmem>>, vector<252x48xf32>,
    %c0_33 = arith.constant 0 : index
    %c0_34 = arith.constant 0 : index
    %36 = tpu.strided_load %arg18[%c0_33, %c0_34] {strides = array<i32: 2, 1>} : memref<252x48xf32, #tpu.memory_space<vmem>>, vector<123x48xf32>
    %c1_35 = arith.constant 1 : index
    %c0_36 = arith.constant 0 : index
    %37 = tpu.strided_load %arg18[%c1_35, %c0_36] {strides = array<i32: 2, 1>} : memref<252x48xf32, #tpu.memory_space<vmem>>, vector<123x48xf32>
    %c2_37 = arith.constant 2 : index
    %c0_38 = arith.constant 0 : index
    %38 = tpu.strided_load %arg18[%c2_37, %c0_38] {strides = array<i32: 2, 1>} : memref<252x48xf32, #tpu.memory_space<vmem>>, vector<123x48xf32>
    %c3_39 = arith.constant 3 : index
    %c0_40 = arith.constant 0 : index
    %39 = tpu.strided_load %arg18[%c3_39, %c0_40] {strides = array<i32: 2, 1>} : memref<252x48xf32, #tpu.memory_space<vmem>>, vector<123x48xf32>
    %c4_41 = arith.constant 4 : index
    %c0_42 = arith.constant 0 : index
    %40 = tpu.strided_load %arg18[%c4_41, %c0_42] {strides = array<i32: 2, 1>} : memref<252x48xf32, #tpu.memory_space<vmem>>, vector<123x48xf32>
    %c5 = arith.constant 5 : index
    %c0_43 = arith.constant 0 : index
    %41 = tpu.strided_load %arg18[%c5, %c0_43] {strides = array<i32: 2, 1>} : memref<252x48xf32, #tpu.memory_space<vmem>>, vector<123x48xf32>
    %c6 = arith.constant 6 : index
    %c0_44 = arith.constant 0 : index
    %42 = tpu.strided_load %arg18[%c6, %c0_44] {strides = array<i32: 2, 1>} : memref<252x48xf32, #tpu.memory_space<vmem>>, vector<123x48xf32>
    %43 = tpu.concatenate %36, %37, %38, %39, %40, %41, %42 in 1 : vector<123x48xf32>, vector<123x48xf32>, vector<123x48xf32>, vector<123x48xf32>, vector<123x48xf32>, vector<123x48xf32>, vector<123x48xf32> -> vector<123x336xf32>
    %44 = arith.truncf %43 : vector<123x336xf32> to vector<123x336xbf16>
    %c0_45 = arith.constant 0 : index
    %c0_46 = arith.constant 0 : index
    %45 = vector.load %arg6[%c0_45, %c0_46] : memref<336x96xbf16, #tpu.memory_space<vmem>>, vector<336x96xbf16>
    %cst_47 = arith.constant dense<0.000000e+00> : vector<123x96xf32>
    %46 = tpu.matmul %44, %45, %cst_47 {dimension_numbers = #tpu.dot_dimension_numbers<[1], [0], [0], [1], [0, 0, 1, 1], [], []>} : vector<123x336xbf16>, vector<336x96xbf16>, vector<123x96xf32> -> vector<123x96xf32>
    %c0_48 = arith.constant 0 : index
    %c0_49 = arith.constant 0 : index
    %47 = vector.load %arg7[%c0_48, %c0_49] : memref<1x96xf32, #tpu.memory_space<vmem>>, vector<1x96xf32>
    %48 = vector.broadcast %47 : vector<1x96xf32> to vector<123x96xf32>
    %49 = arith.addf %46, %48 : vector<123x96xf32>
    %c0_50 = arith.constant 0 : index
    %c0_51 = arith.constant 0 : index
    %50 = vector.load %arg19[%c0_50, %c0_51] : memref<123x96xf32, #tpu.memory_space<vmem>>, vector<123x96xf32>
    tpu.vector_store %arg19[%c0_50, %c0_51], %49 {strides = array<i32>} : memref<123x96xf32, #tpu.memory_space<vmem>>, vector<123x96xf32>,
    %c0_52 = arith.constant 0 : index
    %c0_53 = arith.constant 0 : index
    %51 = tpu.strided_load %arg19[%c0_52, %c0_53] {strides = array<i32: 4, 1>} : memref<123x96xf32, #tpu.memory_space<vmem>>, vector<30x96xf32>
    %c1_54 = arith.constant 1 : index
    %c0_55 = arith.constant 0 : index
    %52 = tpu.strided_load %arg19[%c1_54, %c0_55] {strides = array<i32: 4, 1>} : memref<123x96xf32, #tpu.memory_space<vmem>>, vector<30x96xf32>
    %53 = arith.maximumf %51, %52 : vector<30x96xf32>
    %c2_56 = arith.constant 2 : index
    %c0_57 = arith.constant 0 : index
    %54 = tpu.strided_load %arg19[%c2_56, %c0_57] {strides = array<i32: 4, 1>} : memref<123x96xf32, #tpu.memory_space<vmem>>, vector<30x96xf32>
    %55 = arith.maximumf %53, %54 : vector<30x96xf32>
    %c3_58 = arith.constant 3 : index
    %c0_59 = arith.constant 0 : index
    %56 = tpu.strided_load %arg19[%c3_58, %c0_59] {strides = array<i32: 4, 1>} : memref<123x96xf32, #tpu.memory_space<vmem>>, vector<30x96xf32>
    %57 = arith.maximumf %55, %56 : vector<30x96xf32>
    %c4_60 = arith.constant 4 : index
    %c0_61 = arith.constant 0 : index
    %58 = tpu.strided_load %arg19[%c4_60, %c0_61] {strides = array<i32: 4, 1>} : memref<123x96xf32, #tpu.memory_space<vmem>>, vector<30x96xf32>
    %59 = arith.maximumf %57, %58 : vector<30x96xf32>
    %c5_62 = arith.constant 5 : index
    %c0_63 = arith.constant 0 : index
    %60 = tpu.strided_load %arg19[%c5_62, %c0_63] {strides = array<i32: 4, 1>} : memref<123x96xf32, #tpu.memory_space<vmem>>, vector<30x96xf32>
    %61 = arith.maximumf %59, %60 : vector<30x96xf32>
    %c6_64 = arith.constant 6 : index
    %c0_65 = arith.constant 0 : index
    %62 = tpu.strided_load %arg19[%c6_64, %c0_65] {strides = array<i32: 4, 1>} : memref<123x96xf32, #tpu.memory_space<vmem>>, vector<30x96xf32>
    %63 = arith.maximumf %61, %62 : vector<30x96xf32>
    %c0_66 = arith.constant 0 : index
    %c0_67 = arith.constant 0 : index
    %64 = vector.load %arg8[%c0_66, %c0_67] : memref<1x96xf32, #tpu.memory_space<vmem>>, vector<1x96xf32>
    %65 = vector.broadcast %64 : vector<1x96xf32> to vector<30x96xf32>
    %66 = arith.mulf %63, %65 : vector<30x96xf32>
    %c0_68 = arith.constant 0 : index
    %c0_69 = arith.constant 0 : index
    %67 = vector.load %arg9[%c0_68, %c0_69] : memref<1x96xf32, #tpu.memory_space<vmem>>, vector<1x96xf32>
    %68 = vector.broadcast %67 : vector<1x96xf32> to vector<30x96xf32>
    %69 = arith.addf %66, %68 : vector<30x96xf32>
    %cst_70 = arith.constant 0.000000e+00 : f32
    %70 = vector.broadcast %cst_70 : f32 to vector<30x96xf32>
    %71 = arith.maximumf %69, %70 : vector<30x96xf32>
    %c0_71 = arith.constant 0 : index
    %c0_72 = arith.constant 0 : index
    %72 = vector.load %arg20[%c0_71, %c0_72] : memref<30x96xf32, #tpu.memory_space<vmem>>, vector<30x96xf32>
    tpu.vector_store %arg20[%c0_71, %c0_72], %71 {strides = array<i32>} : memref<30x96xf32, #tpu.memory_space<vmem>>, vector<30x96xf32>,
    %c0_73 = arith.constant 0 : index
    %c0_74 = arith.constant 0 : index
    %73 = tpu.strided_load %arg20[%c0_73, %c0_74] {strides = array<i32: 2, 1>} : memref<30x96xf32, #tpu.memory_space<vmem>>, vector<11x96xf32>
    %c1_75 = arith.constant 1 : index
    %c0_76 = arith.constant 0 : index
    %74 = tpu.strided_load %arg20[%c1_75, %c0_76] {strides = array<i32: 2, 1>} : memref<30x96xf32, #tpu.memory_space<vmem>>, vector<11x96xf32>
    %c2_77 = arith.constant 2 : index
    %c0_78 = arith.constant 0 : index
    %75 = tpu.strided_load %arg20[%c2_77, %c0_78] {strides = array<i32: 2, 1>} : memref<30x96xf32, #tpu.memory_space<vmem>>, vector<11x96xf32>
    %c3_79 = arith.constant 3 : index
    %c0_80 = arith.constant 0 : index
    %76 = tpu.strided_load %arg20[%c3_79, %c0_80] {strides = array<i32: 2, 1>} : memref<30x96xf32, #tpu.memory_space<vmem>>, vector<11x96xf32>
    %c4_81 = arith.constant 4 : index
    %c0_82 = arith.constant 0 : index
    %77 = tpu.strided_load %arg20[%c4_81, %c0_82] {strides = array<i32: 2, 1>} : memref<30x96xf32, #tpu.memory_space<vmem>>, vector<11x96xf32>
    %c5_83 = arith.constant 5 : index
    %c0_84 = arith.constant 0 : index
    %78 = tpu.strided_load %arg20[%c5_83, %c0_84] {strides = array<i32: 2, 1>} : memref<30x96xf32, #tpu.memory_space<vmem>>, vector<11x96xf32>
    %c6_85 = arith.constant 6 : index
    %c0_86 = arith.constant 0 : index
    %79 = tpu.strided_load %arg20[%c6_85, %c0_86] {strides = array<i32: 2, 1>} : memref<30x96xf32, #tpu.memory_space<vmem>>, vector<11x96xf32>
    %c7 = arith.constant 7 : index
    %c0_87 = arith.constant 0 : index
    %80 = tpu.strided_load %arg20[%c7, %c0_87] {strides = array<i32: 2, 1>} : memref<30x96xf32, #tpu.memory_space<vmem>>, vector<11x96xf32>
    %c8 = arith.constant 8 : index
    %c0_88 = arith.constant 0 : index
    %81 = tpu.strided_load %arg20[%c8, %c0_88] {strides = array<i32: 2, 1>} : memref<30x96xf32, #tpu.memory_space<vmem>>, vector<11x96xf32>
    %82 = tpu.concatenate %73, %74, %75, %76, %77, %78, %79, %80, %81 in 1 : vector<11x96xf32>, vector<11x96xf32>, vector<11x96xf32>, vector<11x96xf32>, vector<11x96xf32>, vector<11x96xf32>, vector<11x96xf32>, vector<11x96xf32>, vector<11x96xf32> -> vector<11x864xf32>
    %83 = arith.truncf %82 : vector<11x864xf32> to vector<11x864xbf16>
    %c0_89 = arith.constant 0 : index
    %c0_90 = arith.constant 0 : index
    %84 = vector.load %arg10[%c0_89, %c0_90] : memref<864x128xbf16, #tpu.memory_space<vmem>>, vector<864x128xbf16>
    %cst_91 = arith.constant dense<0.000000e+00> : vector<11x128xf32>
    %85 = tpu.matmul %83, %84, %cst_91 {dimension_numbers = #tpu.dot_dimension_numbers<[1], [0], [0], [1], [0, 0, 1, 1], [], []>} : vector<11x864xbf16>, vector<864x128xbf16>, vector<11x128xf32> -> vector<11x128xf32>
    %c0_92 = arith.constant 0 : index
    %c0_93 = arith.constant 0 : index
    %86 = vector.load %arg11[%c0_92, %c0_93] : memref<1x128xf32, #tpu.memory_space<vmem>>, vector<1x128xf32>
    %87 = vector.broadcast %86 : vector<1x128xf32> to vector<11x128xf32>
    %88 = arith.addf %85, %87 : vector<11x128xf32>
    %c0_94 = arith.constant 0 : index
    %c0_95 = arith.constant 0 : index
    %89 = vector.load %arg21[%c0_94, %c0_95] : memref<11x128xf32, #tpu.memory_space<vmem>>, vector<11x128xf32>
    tpu.vector_store %arg21[%c0_94, %c0_95], %88 {strides = array<i32>} : memref<11x128xf32, #tpu.memory_space<vmem>>, vector<11x128xf32>,
    %c0_96 = arith.constant 0 : index
    %c0_97 = arith.constant 0 : index
    %90 = vector.load %arg21[%c0_96, %c0_97] : memref<11x128xf32, #tpu.memory_space<vmem>>, vector<1x128xf32>
    %c1_98 = arith.constant 1 : index
    %c0_99 = arith.constant 0 : index
    %91 = vector.load %arg21[%c1_98, %c0_99] : memref<11x128xf32, #tpu.memory_space<vmem>>, vector<1x128xf32>
    %92 = arith.maximumf %90, %91 : vector<1x128xf32>
    %c2_100 = arith.constant 2 : index
    %c0_101 = arith.constant 0 : index
    %93 = vector.load %arg21[%c2_100, %c0_101] : memref<11x128xf32, #tpu.memory_space<vmem>>, vector<1x128xf32>
    %94 = arith.maximumf %92, %93 : vector<1x128xf32>
    %c3_102 = arith.constant 3 : index
    %c0_103 = arith.constant 0 : index
    %95 = vector.load %arg21[%c3_102, %c0_103] : memref<11x128xf32, #tpu.memory_space<vmem>>, vector<1x128xf32>
    %96 = arith.maximumf %94, %95 : vector<1x128xf32>
    %c4_104 = arith.constant 4 : index
    %c0_105 = arith.constant 0 : index
    %97 = vector.load %arg21[%c4_104, %c0_105] : memref<11x128xf32, #tpu.memory_space<vmem>>, vector<1x128xf32>
    %98 = arith.maximumf %96, %97 : vector<1x128xf32>
    %c5_106 = arith.constant 5 : index
    %c0_107 = arith.constant 0 : index
    %99 = vector.load %arg21[%c5_106, %c0_107] : memref<11x128xf32, #tpu.memory_space<vmem>>, vector<1x128xf32>
    %100 = arith.maximumf %98, %99 : vector<1x128xf32>
    %c6_108 = arith.constant 6 : index
    %c0_109 = arith.constant 0 : index
    %101 = vector.load %arg21[%c6_108, %c0_109] : memref<11x128xf32, #tpu.memory_space<vmem>>, vector<1x128xf32>
    %102 = arith.maximumf %100, %101 : vector<1x128xf32>
    %c7_110 = arith.constant 7 : index
    %c0_111 = arith.constant 0 : index
    %103 = vector.load %arg21[%c7_110, %c0_111] : memref<11x128xf32, #tpu.memory_space<vmem>>, vector<1x128xf32>
    %104 = arith.maximumf %102, %103 : vector<1x128xf32>
    %c8_112 = arith.constant 8 : index
    %c0_113 = arith.constant 0 : index
    %105 = vector.load %arg21[%c8_112, %c0_113] : memref<11x128xf32, #tpu.memory_space<vmem>>, vector<1x128xf32>
    %106 = arith.maximumf %104, %105 : vector<1x128xf32>
    %c0_114 = arith.constant 0 : index
    %c0_115 = arith.constant 0 : index
    %107 = vector.load %arg12[%c0_114, %c0_115] : memref<1x128xf32, #tpu.memory_space<vmem>>, vector<1x128xf32>
    %108 = arith.mulf %106, %107 : vector<1x128xf32>
    %c0_116 = arith.constant 0 : index
    %c0_117 = arith.constant 0 : index
    %109 = vector.load %arg13[%c0_116, %c0_117] : memref<1x128xf32, #tpu.memory_space<vmem>>, vector<1x128xf32>
    %110 = arith.addf %108, %109 : vector<1x128xf32>
    %cst_118 = arith.constant 0.000000e+00 : f32
    %111 = vector.broadcast %cst_118 : f32 to vector<1x128xf32>
    %112 = arith.maximumf %110, %111 : vector<1x128xf32>
    %c0_119 = arith.constant 0 : index
    %c0_120 = arith.constant 0 : index
    %113 = vector.load %arg14[%c0_119, %c0_120] : memref<128x2xf32, #tpu.memory_space<vmem>>, vector<128x2xf32>
    %cst_121 = arith.constant dense<0.000000e+00> : vector<1x2xf32>
    %114 = tpu.matmul %112, %113, %cst_121 {dimension_numbers = #tpu.dot_dimension_numbers<[1], [0], [0], [1], [0, 0, 1, 1], [], []>} : vector<1x128xf32>, vector<128x2xf32>, vector<1x2xf32> -> vector<1x2xf32>
    %c0_122 = arith.constant 0 : index
    %c0_123 = arith.constant 0 : index
    %115 = vector.load %arg15[%c0_122, %c0_123] : memref<1x2xf32, #tpu.memory_space<vmem>>, vector<1x2xf32>
    %116 = arith.addf %114, %115 : vector<1x2xf32>
    %cst_124 = arith.constant dense<0xFF800000> : vector<1xf32>
    %117 = vector.multi_reduction <maximumf>, %116, %cst_124 [1] : vector<1x2xf32> to vector<1xf32>
    %118 = vector.shape_cast %117 : vector<1xf32> to vector<1x1xf32>
    %119 = vector.broadcast %118 : vector<1x1xf32> to vector<1x2xf32>
    %120 = arith.subf %116, %119 : vector<1x2xf32>
    %121 = math.exp %120 : vector<1x2xf32>
    %cst_125 = arith.constant dense<0.000000e+00> : vector<1xf32>
    %122 = vector.multi_reduction <add>, %121, %cst_125 [1] : vector<1x2xf32> to vector<1xf32>
    %123 = vector.shape_cast %122 : vector<1xf32> to vector<1x1xf32>
    %124 = vector.broadcast %123 : vector<1x1xf32> to vector<1x2xf32>
    %125 = arith.divf %121, %124 : vector<1x2xf32>
    %c0_126 = arith.constant 0 : index
    %c0_127 = arith.constant 0 : index
    %c0_128 = arith.constant 0 : index
    %126 = vector.load %arg16[%c0_126, %c0_127, %c0_128] : memref<1x1x2xf32, #tpu.memory_space<vmem>>, vector<1x1x2xf32>
    %127 = vector.shape_cast %126 : vector<1x1x2xf32> to vector<1x2xf32>
    %128 = vector.shape_cast %125 : vector<1x2xf32> to vector<1x1x2xf32>
    tpu.vector_store %arg16[%c0_126, %c0_127, %c0_128], %128 {strides = array<i32>} : memref<1x1x2xf32, #tpu.memory_space<vmem>>, vector<1x1x2xf32>,
    return
  }
  func.func @transform_0(%arg0: i32) -> (i32, i32, i32) {
    %c0_i32 = arith.constant 0 : i32
    %c0_i32_0 = arith.constant 0 : i32
    %c0_i32_1 = arith.constant 0 : i32
    return %arg0, %c0_i32, %c0_i32_0 : i32, i32, i32
  }
  func.func @transform_1(%arg0: i32) -> (i32, i32) {
    %c0_i32 = arith.constant 0 : i32
    %c0_i32_0 = arith.constant 0 : i32
    %c0_i32_1 = arith.constant 0 : i32
    return %c0_i32, %c0_i32_0 : i32, i32
  }
  func.func @transform_2(%arg0: i32) -> (i32, i32) {
    %c0_i32 = arith.constant 0 : i32
    %c0_i32_0 = arith.constant 0 : i32
    %c0_i32_1 = arith.constant 0 : i32
    return %c0_i32, %c0_i32_0 : i32, i32
  }
  func.func @transform_3(%arg0: i32) -> (i32, i32) {
    %c0_i32 = arith.constant 0 : i32
    %c0_i32_0 = arith.constant 0 : i32
    %c0_i32_1 = arith.constant 0 : i32
    return %c0_i32, %c0_i32_0 : i32, i32
  }
  func.func @transform_4(%arg0: i32) -> (i32, i32) {
    %c0_i32 = arith.constant 0 : i32
    %c0_i32_0 = arith.constant 0 : i32
    %c0_i32_1 = arith.constant 0 : i32
    return %c0_i32, %c0_i32_0 : i32, i32
  }
  func.func @transform_5(%arg0: i32) -> (i32, i32) {
    %c0_i32 = arith.constant 0 : i32
    %c0_i32_0 = arith.constant 0 : i32
    %c0_i32_1 = arith.constant 0 : i32
    return %c0_i32, %c0_i32_0 : i32, i32
  }
  func.func @transform_6(%arg0: i32) -> (i32, i32) {
    %c0_i32 = arith.constant 0 : i32
    %c0_i32_0 = arith.constant 0 : i32
    %c0_i32_1 = arith.constant 0 : i32
    return %c0_i32, %c0_i32_0 : i32, i32
  }
  func.func @transform_7(%arg0: i32) -> (i32, i32) {
    %c0_i32 = arith.constant 0 : i32
    %c0_i32_0 = arith.constant 0 : i32
    %c0_i32_1 = arith.constant 0 : i32
    return %c0_i32, %c0_i32_0 : i32, i32
  }
  func.func @transform_8(%arg0: i32) -> (i32, i32) {
    %c0_i32 = arith.constant 0 : i32
    %c0_i32_0 = arith.constant 0 : i32
    %c0_i32_1 = arith.constant 0 : i32
    return %c0_i32, %c0_i32_0 : i32, i32
  }
  func.func @transform_9(%arg0: i32) -> (i32, i32) {
    %c0_i32 = arith.constant 0 : i32
    %c0_i32_0 = arith.constant 0 : i32
    %c0_i32_1 = arith.constant 0 : i32
    return %c0_i32, %c0_i32_0 : i32, i32
  }
  func.func @transform_10(%arg0: i32) -> (i32, i32) {
    %c0_i32 = arith.constant 0 : i32
    %c0_i32_0 = arith.constant 0 : i32
    %c0_i32_1 = arith.constant 0 : i32
    return %c0_i32, %c0_i32_0 : i32, i32
  }
  func.func @transform_11(%arg0: i32) -> (i32, i32) {
    %c0_i32 = arith.constant 0 : i32
    %c0_i32_0 = arith.constant 0 : i32
    %c0_i32_1 = arith.constant 0 : i32
    return %c0_i32, %c0_i32_0 : i32, i32
  }
  func.func @transform_12(%arg0: i32) -> (i32, i32) {
    %c0_i32 = arith.constant 0 : i32
    %c0_i32_0 = arith.constant 0 : i32
    %c0_i32_1 = arith.constant 0 : i32
    return %c0_i32, %c0_i32_0 : i32, i32
  }
  func.func @transform_13(%arg0: i32) -> (i32, i32) {
    %c0_i32 = arith.constant 0 : i32
    %c0_i32_0 = arith.constant 0 : i32
    %c0_i32_1 = arith.constant 0 : i32
    return %c0_i32, %c0_i32_0 : i32, i32
  }
  func.func @transform_14(%arg0: i32) -> (i32, i32) {
    %c0_i32 = arith.constant 0 : i32
    %c0_i32_0 = arith.constant 0 : i32
    %c0_i32_1 = arith.constant 0 : i32
    return %c0_i32, %c0_i32_0 : i32, i32
  }
  func.func @transform_15(%arg0: i32) -> (i32, i32, i32) {
    %c0_i32 = arith.constant 0 : i32
    %c0_i32_0 = arith.constant 0 : i32
    %c0_i32_1 = arith.constant 0 : i32
    return %arg0, %c0_i32, %c0_i32_0 : i32, i32, i32
  }
}

</mosaic_0001>

<bundles_post_ra>
// kernel: tpu_custom_call.1
= control target key start
LH: loop header
LB: loop body
LE: loop exit
PB: predicated region body
PF: predicated region fallthrough
CT: control target
= control target key end

     0   :  { %s8276_s0 = inlined_call_operand.vmem [shape: f32[2,512,32], index: 0, kind: input, shape index: {}]   ;;  %s8277_s1 = inlined_call_operand.vmem [shape: bf16[160,48], index: 1, kind: input, shape index: {}]   ;;  %s8278_s2 = inlined_call_operand.vmem [shape: f32[1,48], index: 2, kind: input, shape index: {}]   ;;  %s8279_s3 = inlined_call_operand.vmem [shape: f32[1,48], index: 3, kind: input, shape index: {}]   ;;  %s8280_s4 = inlined_call_operand.vmem [shape: f32[1,48], index: 4, kind: input, shape index: {}]   ;;  %s8281_s5 = inlined_call_operand.vmem [shape: bf16[336,96], index: 5, kind: input, shape index: {}]   ;;  %s8282_s6 = inlined_call_operand.vmem [shape: f32[1,96], index: 6, kind: input, shape index: {}]   ;;  %s8283_s7 = inlined_call_operand.vmem [shape: f32[1,96], index: 7, kind: input, shape index: {}]   ;;  %s8284_s8 = inlined_call_operand.vmem [shape: f32[1,96], index: 8, kind: input, shape index: {}]   ;;  %s8285_s9 = inlined_call_operand.vmem [shape: bf16[864,128], index: 9, kind: input, shape index: {}]   ;;  %s8286_s10 = inlined_call_operand.vmem [shape: f32[1,128], index: 10, kind: input, shape index: {}]   ;;  %s8287_s11 = inlined_call_operand.vmem [shape: f32[1,128], index: 11, kind: input, shape index: {}]   ;;  %s8288_s12 = inlined_call_operand.vmem [shape: f32[1,128], index: 12, kind: input, shape index: {}]   ;;  %s8289_s13 = inlined_call_operand.vmem [shape: f32[128,2], index: 13, kind: input, shape index: {}]   ;;  %s8290_s14 = inlined_call_operand.vmem [shape: f32[1,2], index: 14, kind: input, shape index: {}]   ;;  %s8291_s15 = inlined_call_operand.hbm [shape: f32[2,1,2], index: 15, kind: output, shape index: {}]  }
   0x1   :  { %8302 = sst [smem:[#allocation14_spill]] %s8276_s0 }
   0x2   :  { %8303 = sst [smem:[#allocation15_spill]] %s8277_s1 }
   0x3   :  { %20 = vsyncpa [#allocation8], 0 }
   0x4   :  { %22 = vsyncpa [#allocation8 + $0x1], 0  ;;  %s6546_s18 = smov 0   ;;  %s6548_s19 = smov 0  }
   0x5   :  { %s6550_s20 = smov 0   ;;  %s6552_s21 = smov 0  }
   0x6 LB: > { %8304 = sst [smem:[#allocation10_spill]] %s6450_s20  ;;  %s6567_s22 = sadd.s32 4294967295, %s6454_s21   ;;  %s6454_s21 = sphi %s6552_s21, %s8316_s21   ;;  %s6450_s20 = sphi %s6550_s20, %s8318_s20   ;;  %s6446_s19 = sphi %s6548_s19, %s8320_s19   ;;  %s6442_s18 = sphi %s6546_s18, %s8319_s18  }
   0x7   : > { %s5117_s23 = sadd.s32 4294967294, %s6454_s21   ;;  %s6571_s24 = sadd.s32 1, %s6454_s21  }
   0x8   : > { %8305 = sst [smem:[#allocation11_spill]] %s6571_s24  ;;  %s355_s25 = sadd.s32 1, %s6450_s20 }
   0x9   : > { %s352_s26 = ssub.s32 %s6454_s21, %s6571_s24  ;;  %p365_p0 = scmp.ne.s32.totalorder %s6450_s20, %s6446_s19 }
   0xa   : > { %p353_p1 = scmp.eq.s32.totalorder %s352_s26, 0  ;;  %p366_p2 = scmp.eq.s32.totalorder %s6567_s22, 1 }
   0xb   : > { %p371_p3 = scmp.ne.s32.totalorder %s6446_s19, %s6442_s18  ;;  %p372_p4 = scmp.eq.s32.totalorder %s5117_s23, 1 }
   0xc   : > { %s6582_s27 = scalar_select %p353_p1, %s6450_s20, %s355_s25  }
   0xd   : > { %p6584_p5 = por %p366_p2, %p365_p0  ;;  %p6588_p6 = por %p372_p4, %p371_p3 }
   0xe   : > { %8306 = sst [smem:[#allocation12_spill]] %s6582_s27  ;;  %p5120_p7 = scmp.ge.s32.totalorder %s6454_s21, 1 }
   0xf   : > { %s8308_s29 = scalar_select %p6588_p6, 1, 0 }
  0x10   : > { %p440_p8 = scmp.lt.s32.totalorder %s6454_s21, 3 }
  0x11   : > { %8309 = sst [smem:[#allocation13_spill]] %s8308_s29 }
  0x12   : > { %p441_p9 = pnand %p5120_p7, %p440_p8 }
  0x13   : > { %p487_p10 = scmp.lt.s32.totalorder (!%p441_p9), %s6567_s22, 1  ;;  %s8310_s1 = sld [smem:[#allocation15_spill]] (!%p441_p9) }
  0x14   : > { %444 = sbr.rel (%p441_p9) target bundleno = 1977 (0x7b9), region = 80  ;;  %s8311_s0 = sld [smem:[#allocation14_spill]] (!%p441_p9) }
  0x15   : > { %s8296_s20 = smov (!%p441_p9), 32   ;;  %s8298_s27 = smov (!%p441_p9), 96  }
  0x16   : > { %s6460_s30 = smov (!%p441_p9), 48   ;;  %s6461_s16 = smov (!%p441_p9), 16  }
  0x17   : > { %s6462_s23 = smov (!%p441_p9), 112  }
  0x19   : > { %v6302_v0 = vld [vmem:[%s8310_s1 + $0x38] sm:$0xff]   ;;  %v6456_v1 = vmov 0   ;;  %s488_s17 = scalar_select %p487_p10, %s6567_s22, 1  ;;  %v6303_v2 = vld [vmem:[%s8310_s1 + $0x30] sm:$0xff]   ;;  %v6304_v3 = vld [vmem:[%s8310_s1 + $0x28] sm:$0xff]   ;;  %vm1581_vm0 = vcmask 261120  }
  0x1a   : > { %2023 = vmatprep.subr.bf16.mxu0 %v6456_v1  ;;  %v6305_v18 = vld [vmem:[%s8310_s1 + $0x20] sm:$0xff]   ;;  %v6306_v25 = vld [vmem:[%s8310_s1 + $0x18] sm:$0xff]   ;;  %v6307_v54 = vld [vmem:[%s8310_s1 + $0x10] sm:$0xff]   ;;  %vm1646_vm1 = vcmask 523264   ;;  %vm1711_vm2 = vcmask 785408   ;;  %vm2312_vm3 = vcmask 392192  }
  0x1b   : > { %2024 = vmatpush1.bf16.msra.mxu0 %v6302_v0  ;;  %s5259_s26 = sshll.u32 %s488_s17, 9  ;;  %s8300_s17 = smov 64   ;;  %v6308_v59 = vld [vmem:[%s8310_s1 + $0x8] sm:$0xff]   ;;  %vm3606_vm4 = vcmask 130048   ;;  %vm3639_vm5 = vcmask 916480   ;;  %vm2376_vm6 = vcmask 388096  }
  0x1c   : > { %2025 = vmatprep.subr.bf16.mxu0 %v6456_v1  ;;  %s6607_s24 = scalar_lea.vmem %s8311_s0, %s5259_s26  ;;  %vm3871_vm7 = vcmask 654336   ;;  %vm4105_vm8 = vcmask 780288   ;;  %vm4215_vm9 = vcmask 783360   ;;  %vm6464_vm10 = vmmov 0  }
  0x1d   : > { %v557_v4 = vld [vmem:[%s6607_s24 + $0x1] sm:$0xff]  ;;  %v558_v5 = vld [vmem:[%s6607_s24 + $0x9] sm:$0xff]  ;;  %v559_v12 = vld [vmem:[%s6607_s24 + $0x11] sm:$0xff]  ;;  %vm5036_vm11 = vcmask 8192  }
  0x1e   : > { %v685_v6 = vld [vmem:[%s6607_s24 + $0x3] sm:$0xff]  ;;  %v5552_v7 = vpack.i.bf16 %v558_v5, %v557_v4  ;;  %v686_v8 = vld [vmem:[%s6607_s24 + $0xb] sm:$0xff]  ;;  %v560_v13 = vld [vmem:[%s6607_s24 + $0x19] sm:$0xff] }
  0x1f   : > { %2026 = vmatpush1.bf16.msra.mxu0 %v6303_v2  ;;  %v621_v9 = vld [vmem:[%s6607_s24 + $0x2] sm:$0xff]  ;;  %v622_v10 = vld [vmem:[%s6607_s24 + $0xa] sm:$0xff]  ;;  %v5562_v11 = vpack.i.bf16 %v686_v8, %v685_v6  ;;  %v5567_v15 = vpack.i.bf16 %v560_v13, %v559_v12  ;;  %v623_v16 = vld [vmem:[%s6607_s24 + $0x12] sm:$0xff] }
  0x20   : > { %2027 = vmatprep.subr.bf16.mxu0 %v6456_v1  ;;  %5553 = vrot.lane.b32.xlu0 %v5552_v7, %s8296_s20  ;;  %v5557_v14 = vpack.i.bf16 %v622_v10, %v621_v9  ;;  %v624_v17 = vld [vmem:[%s6607_s24 + $0x1a] sm:$0xff]  ;;  %v562_v24 = vld [vmem:[%s6607_s24 + $0x29] sm:$0xff]  ;;  %v563_v32 = vld [vmem:[%s6607_s24 + $0x31] sm:$0xff] }
  0x21   : > { %5563 = vrot.lane.b32.xlu1 %v5562_v11, %s8298_s27  ;;  %v687_v19 = vld [vmem:[%s6607_s24 + $0x13] sm:$0xff]  ;;  %v688_v20 = vld [vmem:[%s6607_s24 + $0x1b] sm:$0xff]  ;;  %v5572_v21 = vpack.i.bf16 %v624_v17, %v623_v16  ;;  %v626_v27 = vld [vmem:[%s6607_s24 + $0x2a] sm:$0xff] }
  0x22   : > { %v5577_v22 = vpack.i.bf16 %v688_v20, %v687_v19  ;;  %v561_v23 = vld [vmem:[%s6607_s24 + $0x21] sm:$0xff]  ;;  %v690_v31 = vld [vmem:[%s6607_s24 + $0x2b] sm:$0xff]  ;;  %v564_v33 = vld [vmem:[%s6607_s24 + $0x39] sm:$0xff] }
  0x23   : > { %2028 = vmatpush1.bf16.msra.mxu0 %v6304_v3  ;;  %v625_v26 = vld [vmem:[%s6607_s24 + $0x22] sm:$0xff]  ;;  %v5582_v28 = vpack.i.bf16 %v562_v24, %v561_v23  ;;  %v5597_v35 = vpack.i.bf16 %v564_v33, %v563_v32  ;;  %v627_v36 = vld [vmem:[%s6607_s24 + $0x32] sm:$0xff]  ;;  %v628_v37 = vld [vmem:[%s6607_s24 + $0x3a] sm:$0xff] }
  0x24   : > { %2029 = vmatprep.subr.bf16.mxu0 %v6456_v1  ;;  %5558 = vrot.lane.b32.xlu0 %v5557_v14, %s8300_s17  ;;  %v5587_v29 = vpack.i.bf16 %v626_v27, %v625_v26  ;;  %v689_v30 = vld [vmem:[%s6607_s24 + $0x23] sm:$0xff]  ;;  %v691_v38 = vld [vmem:[%s6607_s24 + $0x33] sm:$0xff]  ;;  %v692_v39 = vld [vmem:[%s6607_s24 + $0x3b] sm:$0xff]  ;;  %v5602_v40 = vpack.i.bf16 %v628_v37, %v627_v36 }
  0x25   : > { %5568 = vrot.lane.b32.xlu1 %v5567_v15, %s8296_s20  ;;  %v5592_v34 = vpack.i.bf16 %v690_v31, %v689_v30  ;;  %v5607_v41 = vpack.i.bf16 %v692_v39, %v691_v38  ;;  %v565_v42 = vld [vmem:[%s6607_s24 + $0x41] sm:$0xff]  ;;  %v566_v43 = vld [vmem:[%s6607_s24 + $0x49] sm:$0xff]  ;;  %v567_v50 = vld [vmem:[%s6607_s24 + $0x51] sm:$0xff] }
  0x26   : > { %v629_v44 = vld [vmem:[%s6607_s24 + $0x42] sm:$0xff]  ;;  %v630_v45 = vld [vmem:[%s6607_s24 + $0x4a] sm:$0xff]  ;;  %v5612_v46 = vpack.i.bf16 %v566_v43, %v565_v42  ;;  %v568_v51 = vld [vmem:[%s6607_s24 + $0x59] sm:$0xff] }
  0x27   : > { %2030 = vmatpush1.bf16.msra.mxu0 %v6305_v18  ;;  %v5617_v47 = vpack.i.bf16 %v630_v45, %v629_v44  ;;  %v693_v48 = vld [vmem:[%s6607_s24 + $0x43] sm:$0xff]  ;;  %v694_v49 = vld [vmem:[%s6607_s24 + $0x4b] sm:$0xff]  ;;  %v5627_v55 = vpack.i.bf16 %v568_v51, %v567_v50  ;;  %v632_v56 = vld [vmem:[%s6607_s24 + $0x5a] sm:$0xff] }
  0x28   : > { %2031 = vmatprep.subr.bf16.mxu0 %v6456_v1  ;;  %5573 = vrot.lane.b32.xlu0 %v5572_v21, %s8300_s17  ;;  %v5622_v52 = vpack.i.bf16 %v694_v49, %v693_v48  ;;  %v631_v53 = vld [vmem:[%s6607_s24 + $0x52] sm:$0xff]  ;;  %v696_v58 = vld [vmem:[%s6607_s24 + $0x5b] sm:$0xff]  ;;  %v570_v63 = vld [vmem:[%s6607_s24 + $0x69] sm:$0xff] }
  0x29   : > { %5578 = vrot.lane.b32.xlu1 %v5577_v22, %s8298_s27  ;;  %v695_v57 = vld [vmem:[%s6607_s24 + $0x53] sm:$0xff]  ;;  %v5632_v60 = vpack.i.bf16 %v632_v56, %v631_v53  ;;  %v569_v61 = vld [vmem:[%s6607_s24 + $0x61] sm:$0xff]  ;;  %v634_v2 = vld [vmem:[%s6607_s24 + $0x6a] sm:$0xff] }
  0x2a   : > { %v5637_v62 = vpack.i.bf16 %v696_v58, %v695_v57  ;;  %v633_v0 = vld [vmem:[%s6607_s24 + $0x62] sm:$0xff]  ;;  %v5642_v4 = vpack.i.bf16 %v570_v63, %v569_v61  ;;  %v698_v7 = vld [vmem:[%s6607_s24 + $0x6b] sm:$0xff]  ;;  %v572_v9 = vld [vmem:[%s6607_s24 + $0x79] sm:$0xff] }
  0x2b   : > { %2032 = vmatpush1.bf16.msra.mxu0 %v6306_v25  ;;  %v6309_v3 = vld [vmem:[%s8310_s1] sm:$0xff]   ;;  %v5647_v5 = vpack.i.bf16 %v634_v2, %v633_v0  ;;  %v571_v8 = vld [vmem:[%s6607_s24 + $0x71] sm:$0xff]  ;;  %v6310_v10 = vld [vmem:[%s8310_s1 + $0x48] sm:$0xff]  }
  0x2c   : > { %2033 = vmatprep.subr.bf16.mxu0 %v6456_v1  ;;  %5583 = vrot.lane.b32.xlu0 %v5582_v28, %s8296_s20  ;;  %v697_v6 = vld [vmem:[%s6607_s24 + $0x63] sm:$0xff]  ;;  %v750_v12 = vld [vmem:[%s6607_s24 + $0xc] sm:$0xff]  ;;  %v5657_v15 = vpack.i.bf16 %v572_v9, %v571_v8  ;;  %v636_v17 = vld [vmem:[%s6607_s24 + $0x7a] sm:$0xff] }
  0x2d   : > { %5588 = vrot.lane.b32.xlu1 %v5587_v29, %s8300_s17  ;;  %v749_v11 = vld [vmem:[%s6607_s24 + $0x4] sm:$0xff]  ;;  %v5652_v13 = vpack.i.bf16 %v698_v7, %v697_v6  ;;  %v635_v16 = vld [vmem:[%s6607_s24 + $0x72] sm:$0xff]  ;;  %v700_v19 = vld [vmem:[%s6607_s24 + $0x7b] sm:$0xff] }
  0x2e   : > { %v1777_v14 = vpack.c.bf16 %v750_v12, %v749_v11  ;;  %v699_v18 = vld [vmem:[%s6607_s24 + $0x73] sm:$0xff]  ;;  %v6311_v20 = vld [vmem:[%s8310_s1 + $0x40] sm:$0xff]   ;;  %v5662_v21 = vpack.i.bf16 %v636_v17, %v635_v16  ;;  %v574_v24 = vld [vmem:[%s6607_s24 + $0x89] sm:$0xff] }
  0x2f   : > { %2034 = vmatpush1.bf16.msra.mxu0 %v6307_v54  ;;  %v5667_v22 = vpack.i.bf16 %v700_v19, %v699_v18  ;;  %v573_v23 = vld [vmem:[%s6607_s24 + $0x81] sm:$0xff]  ;;  %v638_v26 = vld [vmem:[%s6607_s24 + $0x8a] sm:$0xff]  ;;  %v576_v31 = vld [vmem:[%s6607_s24 + $0x99] sm:$0xff] }
  0x30   : > { %5593 = vrot.lane.b32.xlu0 %v5592_v34, %s8298_s27  ;;  %2035 = vmatprep.subr.bf16.mxu0 %v6456_v1  ;;  %v637_v25 = vld [vmem:[%s6607_s24 + $0x82] sm:$0xff]  ;;  %v702_v29 = vld [vmem:[%s6607_s24 + $0x8b] sm:$0xff]  ;;  %v703_v36 = vld [vmem:[%s6607_s24 + $0x93] sm:$0xff] }
  0x31   : > { %5598 = vrot.lane.b32.xlu1 %v5597_v35, %s8296_s20  ;;  %5134 = vmatprep.mubr.msk.bf16.mxu0 %vm1581_vm0, %v1777_v14  ;;  %v5677_v27 = vpack.i.bf16 %v638_v26, %v637_v25  ;;  %v701_v28 = vld [vmem:[%s6607_s24 + $0x83] sm:$0xff]  ;;  %v575_v30 = vld [vmem:[%s6607_s24 + $0x91] sm:$0xff]  ;;  %v640_v35 = vld [vmem:[%s6607_s24 + $0x9a] sm:$0xff] }
  0x32   : > { %v5682_v32 = vpack.i.bf16 %v702_v29, %v701_v28  ;;  %v5687_v33 = vpack.i.bf16 %v576_v31, %v575_v30  ;;  %v639_v34 = vld [vmem:[%s6607_s24 + $0x92] sm:$0xff]  ;;  %v704_v37 = vld [vmem:[%s6607_s24 + $0x9b] sm:$0xff]  ;;  %v642_v43 = vld [vmem:[%s6607_s24 + $0xaa] sm:$0xff] }
  0x33   : > { %2036 = vmatpush1.bf16.msra.mxu0 %v6308_v59  ;;  %v5692_v38 = vpack.i.bf16 %v640_v35, %v639_v34  ;;  %v5697_v39 = vpack.i.bf16 %v704_v37, %v703_v36  ;;  %v641_v42 = vld [vmem:[%s6607_s24 + $0xa2] sm:$0xff]  ;;  %v579_v48 = vld [vmem:[%s6607_s24 + $0xb1] sm:$0xff]  ;;  %v580_v49 = vld [vmem:[%s6607_s24 + $0xb9] sm:$0xff] }
  0x34   : > { %5603 = vrot.lane.b32.xlu0 %v5602_v40, %s8300_s17  ;;  %2037 = vmatprep.subr.bf16.mxu0 %v6456_v1  ;;  %v577_v40 = vld [vmem:[%s6607_s24 + $0xa1] sm:$0xff]  ;;  %v5707_v45 = vpack.i.bf16 %v642_v43, %v641_v42  ;;  %v5717_v51 = vpack.i.bf16 %v580_v49, %v579_v48  ;;  %v707_v54 = vld [vmem:[%s6607_s24 + $0xb3] sm:$0xff]  ;;  %v582_v58 = vld [vmem:[%s6607_s24 + $0xc9] sm:$0xff] }
  0x35   : > { %5608 = vrot.lane.b32.xlu1 %v5607_v41, %s8298_s27  ;;  %v578_v41 = vld [vmem:[%s6607_s24 + $0xa9] sm:$0xff]  ;;  %v644_v53 = vld [vmem:[%s6607_s24 + $0xba] sm:$0xff]  ;;  %v651_v25 = vld [vmem:[%s6607_s24 + $0xf2] sm:$0xff] }
  0x36   : > { %v5702_v44 = vpack.i.bf16 %v578_v41, %v577_v40  ;;  %v581_v57 = vld [vmem:[%s6607_s24 + $0xc1] sm:$0xff]  ;;  %v646_v61 = vld [vmem:[%s6607_s24 + $0xca] sm:$0xff]  ;;  %v711_v8 = vld [vmem:[%s6607_s24 + $0xd3] sm:$0xff] }
  0x37   : > { %2038 = vmatpush1.bf16.msra.mxu0 %v6309_v3  ;;  %v709_v0 = vld [vmem:[%s6607_s24 + $0xc3] sm:$0xff]  ;;  %v710_v2 = vld [vmem:[%s6607_s24 + $0xcb] sm:$0xff]  ;;  %v648_v6 = vld [vmem:[%s6607_s24 + $0xda] sm:$0xff] }
  0x38   : > { %5613 = vrot.lane.b32.xlu0 %v5612_v46, %s8296_s20  ;;  %2051 = vmatprep.subr.bf16.mxu0 %v6456_v1  ;;  %v705_v46 = vld [vmem:[%s6607_s24 + $0xa3] sm:$0xff]  ;;  %v583_v3 = vld [vmem:[%s6607_s24 + $0xd1] sm:$0xff]  ;;  %v5742_v7 = vpack.i.bf16 %v710_v2, %v709_v0  ;;  %v712_v9 = vld [vmem:[%s6607_s24 + $0xdb] sm:$0xff] }
  0x39   : > { %5618 = vrot.lane.b32.xlu1 %v5617_v47, %s8300_s17  ;;  %v706_v47 = vld [vmem:[%s6607_s24 + $0xab] sm:$0xff]  ;;  %v5757_v12 = vpack.i.bf16 %v712_v9, %v711_v8  ;;  %v713_v17 = vld [vmem:[%s6607_s24 + $0xe3] sm:$0xff]  ;;  %v652_v26 = vld [vmem:[%s6607_s24 + $0xfa] sm:$0xff] }
  0x3a   : > { %v5712_v50 = vpack.i.bf16 %v706_v47, %v705_v46  ;;  %v586_v14 = vld [vmem:[%s6607_s24 + $0xe9] sm:$0xff]  ;;  %v589_v28 = vld [vmem:[%s6607_s24 + $0x101] sm:$0xff]  ;;  %v5782_v30 = vpack.i.bf16 %v652_v26, %v651_v25  ;;  %v655_v40 = vld [vmem:[%s6607_s24 + $0x112] sm:$0xff] }
  0x3b   : > { %2052 = vmatpush2.bf16.msra.mxu0 %v6310_v10  ;;  %v650_v16 = vld [vmem:[%s6607_s24 + $0xea] sm:$0xff]  ;;  %v653_v31 = vld [vmem:[%s6607_s24 + $0x102] sm:$0xff]  ;;  %v656_v41 = vld [vmem:[%s6607_s24 + $0x11a] sm:$0xff] }
  0x3c   : > { %5623 = vrot.lane.b32.xlu0 %v5622_v52, %s8298_s27  ;;  %2053 = vmatprep.subr.bf16.mxu0 %v6456_v1  ;;  %v5672_v1 = vpack.i.bf16 %v574_v24, %v573_v23  ;;  %v643_v52 = vld [vmem:[%s6607_s24 + $0xb2] sm:$0xff]  ;;  %v590_v29 = vld [vmem:[%s6607_s24 + $0x109] sm:$0xff]  ;;  %v5812_v46 = vpack.i.bf16 %v656_v41, %v655_v40  ;;  %v593_v48 = vld [vmem:[%s6607_s24 + $0x121] sm:$0xff] }
  0x3d   : > { %5628 = vrot.lane.b32.xlu1 %v5627_v55, %s8296_s20  ;;  %v708_v55 = vld [vmem:[%s6607_s24 + $0xbb] sm:$0xff]  ;;  %v5722_v56 = vpack.i.bf16 %v644_v53, %v643_v52  ;;  %v714_v18 = vld [vmem:[%s6607_s24 + $0xeb] sm:$0xff]  ;;  %v5792_v34 = vpack.i.bf16 %v590_v29, %v589_v28  ;;  %v717_v36 = vld [vmem:[%s6607_s24 + $0x103] sm:$0xff] }
  0x3e   : > { %v5727_v59 = vpack.i.bf16 %v708_v55, %v707_v54  ;;  %v5772_v23 = vpack.i.bf16 %v714_v18, %v713_v17  ;;  %v718_v37 = vld [vmem:[%s6607_s24 + $0x10b] sm:$0xff]  ;;  %v719_v43 = vld [vmem:[%s6607_s24 + $0x113] sm:$0xff]  ;;  %v721_v52 = vld [vmem:[%s6607_s24 + $0x123] sm:$0xff] }
  0x3f   : > { %2054 = vmatpush2.bf16.msra.mxu0 %v6311_v20  ;;  %v587_v20 = vld [vmem:[%s6607_s24 + $0xf1] sm:$0xff]  ;;  %v5802_v42 = vpack.i.bf16 %v718_v37, %v717_v36  ;;  %v594_v49 = vld [vmem:[%s6607_s24 + $0x129] sm:$0xff]  ;;  %v597_v0 = vld [vmem:[%s6607_s24 + $0x141] sm:$0xff] }
  0x40   : > { %5633 = vrot.lane.b32.xlu0 %v5632_v60, %s8300_s17  ;;  %v645_v60 = vld [vmem:[%s6607_s24 + $0xc2] sm:$0xff]  ;;  %v722_v53 = vld [vmem:[%s6607_s24 + $0x12b] sm:$0xff]  ;;  %v5822_v54 = vpack.i.bf16 %v594_v49, %v593_v48  ;;  %v496_v17 = vld [vmem:[%s6607_s24 + $0x18] sm:$0xff] }
  0x41   : > { %5638 = vrot.lane.b32.xlu1 %v5637_v62, %s8298_s27  ;;  %v5732_v62 = vpack.i.bf16 %v582_v58, %v581_v57  ;;  %v5737_v63 = vpack.i.bf16 %v646_v61, %v645_v60  ;;  %v595_v55 = vld [vmem:[%s6607_s24 + $0x131] sm:$0xff]  ;;  %v5832_v58 = vpack.i.bf16 %v722_v53, %v721_v52  ;;  %v660_v61 = vld [vmem:[%s6607_s24 + $0x13a] sm:$0xff]  ;;  %v598_v2 = vld [vmem:[%s6607_s24 + $0x149] sm:$0xff] }
  0x42   : > { %v659_v60 = vld [vmem:[%s6607_s24 + $0x132] sm:$0xff]  ;;  %v493_v8 = vld [vmem:[%s6607_s24] sm:$0xff]  ;;  %v494_v9 = vld [vmem:[%s6607_s24 + $0x8] sm:$0xff] }
  0x43   : > { %v751_v18 = vld [vmem:[%s6607_s24 + $0x14] sm:$0xff]  ;;  %v497_v53 = vld [vmem:[%s6607_s24 + $0x20] sm:$0xff] }
  0x44   : > { %5643 = vrot.lane.b32.xlu0 %v5642_v4, %s8296_s20  ;;  %v584_v4 = vld [vmem:[%s6607_s24 + $0xd9] sm:$0xff] }
  0x45   : > { %5648 = vrot.lane.b32.xlu1 %v5647_v5, %s8300_s17  ;;  %v647_v5 = vld [vmem:[%s6607_s24 + $0xd2] sm:$0xff]  ;;  %v5747_v10 = vpack.i.bf16 %v584_v4, %v583_v3  ;;  %v5842_v3 = vpack.i.bf16 %v660_v61, %v659_v60  ;;  %v661_v4 = vld [vmem:[%s6607_s24 + $0x142] sm:$0xff] }
  0x46   : > { %v5752_v11 = vpack.i.bf16 %v648_v6, %v647_v5  ;;  %v662_v5 = vld [vmem:[%s6607_s24 + $0x14a] sm:$0xff]  ;;  %v600_v25 = vld [vmem:[%s6607_s24 + $0x159] sm:$0xff]  ;;  %v601_v60 = vld [vmem:[%s6607_s24 + $0x161] sm:$0xff] }
  0x47   : > { %v663_v29 = vld [vmem:[%s6607_s24 + $0x152] sm:$0xff]  ;;  %v728_v36 = vld [vmem:[%s6607_s24 + $0x15b] sm:$0xff]  ;;  %v602_v61 = vld [vmem:[%s6607_s24 + $0x169] sm:$0xff] }
  0x48   : > { %5653 = vrot.lane.b32.xlu0 %v5652_v13, %s8298_s27  ;;  %v585_v13 = vld [vmem:[%s6607_s24 + $0xe1] sm:$0xff] }
  0x49   : > { %5658 = vrot.lane.b32.xlu1 %v5657_v15, %s8296_s20  ;;  %v649_v15 = vld [vmem:[%s6607_s24 + $0xe2] sm:$0xff]  ;;  %v5762_v19 = vpack.i.bf16 %v586_v14, %v585_v13  ;;  %v5852_v13 = vpack.i.bf16 %v598_v2, %v597_v0  ;;  %v666_v0 = vld [vmem:[%s6607_s24 + $0x16a] sm:$0xff] }
  0x4a   : > { %v725_v14 = vld [vmem:[%s6607_s24 + $0x143] sm:$0xff] }
  0x4c   : > { %5663 = vrot.lane.b32.xlu0 %v5662_v21, %s8300_s17  ;;  %v588_v21 = vld [vmem:[%s6607_s24 + $0xf9] sm:$0xff] }
  0x4d   : > { %5668 = vrot.lane.b32.xlu1 %v5667_v22, %s8298_s27  ;;  %v5767_v22 = vpack.i.bf16 %v650_v16, %v649_v15  ;;  %v5777_v24 = vpack.i.bf16 %v588_v21, %v587_v20  ;;  %v726_v15 = vld [vmem:[%s6607_s24 + $0x14b] sm:$0xff] }
  0x4e   : > { %v495_v16 = vld [vmem:[%s6607_s24 + $0x10] sm:$0xff]  ;;  %v5862_v28 = vpack.i.bf16 %v726_v15, %v725_v14 }
  0x50   : > { %5673 = vrot.lane.b32.xlu0 %v5672_v1, %s8296_s20  ;;  %v715_v1 = vld [vmem:[%s6607_s24 + $0xf3] sm:$0xff] }
  0x51   : > { %5678 = vrot.lane.b32.xlu1 %v5677_v27, %s8300_s17  ;;  %v716_v27 = vld [vmem:[%s6607_s24 + $0xfb] sm:$0xff] }
  0x54   : > { %5683 = vrot.lane.b32.xlu0 %v5682_v32, %s8298_s27  ;;  %v654_v32 = vld [vmem:[%s6607_s24 + $0x10a] sm:$0xff] }
  0x55   : > { %5688 = vrot.lane.b32.xlu1 %v5687_v33, %s8296_s20  ;;  %v5787_v33 = vpack.i.bf16 %v716_v27, %v715_v1  ;;  %v5797_v35 = vpack.i.bf16 %v654_v32, %v653_v31 }
  0x58   : > { %5693 = vrot.lane.b32.xlu0 %v5692_v38, %s8300_s17  ;;  %v591_v38 = vld [vmem:[%s6607_s24 + $0x111] sm:$0xff] }
  0x59   : > { %5698 = vrot.lane.b32.xlu1 %v5697_v39, %s8298_s27  ;;  %v592_v39 = vld [vmem:[%s6607_s24 + $0x119] sm:$0xff] }
  0x5c   : > { %5703 = vrot.lane.b32.xlu0 %v5702_v44, %s8296_s20  ;;  %v720_v44 = vld [vmem:[%s6607_s24 + $0x11b] sm:$0xff] }
  0x5d   : > { %5708 = vrot.lane.b32.xlu1 %v5707_v45, %s8300_s17  ;;  %v5807_v45 = vpack.i.bf16 %v592_v39, %v591_v38  ;;  %v5817_v47 = vpack.i.bf16 %v720_v44, %v719_v43 }
  0x60   : > { %5713 = vrot.lane.b32.xlu0 %v5712_v50, %s8298_s27  ;;  %v657_v50 = vld [vmem:[%s6607_s24 + $0x122] sm:$0xff] }
  0x61   : > { %5718 = vrot.lane.b32.xlu1 %v5717_v51, %s8296_s20  ;;  %v658_v51 = vld [vmem:[%s6607_s24 + $0x12a] sm:$0xff] }
  0x62   : > { %v5827_v57 = vpack.i.bf16 %v658_v51, %v657_v50 }
  0x64   : > { %5723 = vrot.lane.b32.xlu0 %v5722_v56, %s8300_s17  ;;  %v596_v56 = vld [vmem:[%s6607_s24 + $0x139] sm:$0xff] }
  0x65   : > { %5728 = vrot.lane.b32.xlu1 %v5727_v59, %s8298_s27  ;;  %v5837_v59 = vpack.i.bf16 %v596_v56, %v595_v55 }
  0x68   : > { %5733 = vrot.lane.b32.xlu0 %v5732_v62, %s8296_s20  ;;  %v723_v62 = vld [vmem:[%s6607_s24 + $0x133] sm:$0xff] }
  0x69   : > { %5738 = vrot.lane.b32.xlu1 %v5737_v63, %s8300_s17  ;;  %v724_v63 = vld [vmem:[%s6607_s24 + $0x13b] sm:$0xff] }
  0x6a   : > { %v5847_v6 = vpack.i.bf16 %v724_v63, %v723_v62  ;;  %v665_v62 = vld [vmem:[%s6607_s24 + $0x162] sm:$0xff] }
  0x6b   : > { %v5887_v14 = vpack.i.bf16 %v666_v0, %v665_v62  ;;  %v734_v62 = vld [vmem:[%s6607_s24 + $0x18b] sm:$0xff] }
  0x6c   : > { %5743 = vrot.lane.b32.xlu0 %v5742_v7, %s8298_s27 }
  0x6d   : > { %5748 = vrot.lane.b32.xlu1 %v5747_v10, %s8296_s20 }
  0x70   : > { %5753 = vrot.lane.b32.xlu0 %v5752_v11, %s8300_s17 }
  0x71   : > { %5758 = vrot.lane.b32.xlu1 %v5757_v12, %s8298_s27 }
  0x74   : > { %5763 = vrot.lane.b32.xlu0 %v5762_v19, %s8296_s20  ;;  %v5857_v19 = vpack.i.bf16 %v662_v5, %v661_v4  ;;  %v729_v5 = vld [vmem:[%s6607_s24 + $0x163] sm:$0xff] }
  0x75   : > { %5768 = vrot.lane.b32.xlu1 %v5767_v22, %s8300_s17 }
  0x78   : > { %5773 = vrot.lane.b32.xlu0 %v5772_v23, %s8298_s27  ;;  %v752_v23 = vld [vmem:[%s6607_s24 + $0x1c] sm:$0xff] }
  0x79   : > { %5778 = vrot.lane.b32.xlu1 %v5777_v24, %s8296_s20  ;;  %v599_v24 = vld [vmem:[%s6607_s24 + $0x151] sm:$0xff]  ;;  %v1779_v39 = vpack.c.bf16 %v752_v23, %v751_v18 }
  0x7a   : > { %v5867_v40 = vpack.i.bf16 %v600_v25, %v599_v24  ;;  %v499_v24 = vld [vmem:[%s6607_s24 + $0x30] sm:$0xff]  ;;  %v500_v25 = vld [vmem:[%s6607_s24 + $0x38] sm:$0xff] }
  0x7c   : > { %5783 = vrot.lane.b32.xlu0 %v5782_v30, %s8300_s17  ;;  %v664_v30 = vld [vmem:[%s6607_s24 + $0x15a] sm:$0xff] }
  0x7d   : > { %5788 = vrot.lane.b32.xlu1 %v5787_v33, %s8298_s27  ;;  %v5872_v52 = vpack.i.bf16 %v664_v30, %v663_v29  ;;  %v667_v30 = vld [vmem:[%s6607_s24 + $0x172] sm:$0xff] }
  0x80   : > { %5793 = vrot.lane.b32.xlu0 %v5792_v34, %s8296_s20 }
  0x81   : > { %5798 = vrot.lane.b32.xlu1 %v5797_v35, %s8300_s17  ;;  %v727_v35 = vld [vmem:[%s6607_s24 + $0x153] sm:$0xff] }
  0x84   : > { %5803 = vrot.lane.b32.xlu0 %v5802_v42, %s8298_s27 }
  0x85   : > { %5808 = vrot.lane.b32.xlu1 %v5807_v45, %s8296_s20 }
  0x88   : > { %5813 = vrot.lane.b32.xlu0 %v5812_v46, %s8300_s17 }
  0x89   : > { %5818 = vrot.lane.b32.xlu1 %v5817_v47, %s8298_s27 }
  0x8c   : > { %5823 = vrot.lane.b32.xlu0 %v5822_v54, %s8296_s20  ;;  %v498_v54 = vld [vmem:[%s6607_s24 + $0x28] sm:$0xff] }
  0x8d   : > { %5828 = vrot.lane.b32.xlu1 %v5827_v57, %s8300_s17  ;;  %v753_v57 = vld [vmem:[%s6607_s24 + $0x24] sm:$0xff] }
  0x90   : > { %5833 = vrot.lane.b32.xlu0 %v5832_v58, %s8298_s27  ;;  %v754_v58 = vld [vmem:[%s6607_s24 + $0x2c] sm:$0xff] }
  0x91   : > { %5838 = vrot.lane.b32.xlu1 %v5837_v59, %s8296_s20  ;;  %v5877_v59 = vpack.i.bf16 %v728_v36, %v727_v35  ;;  %v1781_v18 = vpack.c.bf16 %v754_v58, %v753_v57  ;;  %v732_v36 = vld [vmem:[%s6607_s24 + $0x17b] sm:$0xff] }
  0x92   : > { %v5554_v7 = vpop.permute.xlu0 %5553 }
  0x93   : > { %v5564_v10 = vpop.permute.xlu1 %5563  ;;  %v5556_v11 = vunpack.i.h.bf16 %v5554_v7  ;;  %v5555_v12 = vunpack.i.l.bf16 %v5554_v7 }
  0x94   : > { %5843 = vrot.lane.b32.xlu0 %v5842_v3, %s8300_s17  ;;  %v5566_v20 = vunpack.i.h.bf16 %v5564_v10  ;;  %v5565_v21 = vunpack.i.l.bf16 %v5564_v10  ;;  %v603_v10 = vld [vmem:[%s6607_s24 + $0x171] sm:$0xff] }
  0x95   : > { %5848 = vrot.lane.b32.xlu1 %v5847_v6, %s8298_s27  ;;  %v1582_v31 = vsel %vm1581_vm0, %v493_v8, %v5555_v12  ;;  %v1583_v32 = vsel %vm1581_vm0, %v494_v9, %v5556_v11  ;;  %v730_v6 = vld [vmem:[%s6607_s24 + $0x16b] sm:$0xff]  ;;  %v5882_v9 = vpack.i.bf16 %v602_v61, %v601_v60  ;;  %v604_v11 = vld [vmem:[%s6607_s24 + $0x179] sm:$0xff]  ;;  %v733_v61 = vld [vmem:[%s6607_s24 + $0x183] sm:$0xff] }
  0x96   : > { %v5559_v22 = vpop.permute.xlu0 %5558  ;;  %v5892_v23 = vpack.i.bf16 %v730_v6, %v729_v5  ;;  %v5897_v29 = vpack.i.bf16 %v604_v11, %v603_v10  ;;  %v757_v5 = vld [vmem:[%s6607_s24 + $0x44] sm:$0xff]  ;;  %v758_v6 = vld [vmem:[%s6607_s24 + $0x4c] sm:$0xff] }
  0x97   : > { %v5561_v26 = vunpack.i.h.bf16 %v5559_v22  ;;  %v5560_v1 = vunpack.i.l.bf16 %v5559_v22  ;;  %v5569_v27 = vpop.permute.xlu1 %5568 }
  0x98   : > { %v5571_v33 = vunpack.i.h.bf16 %v5569_v27  ;;  %v5570_v34 = vunpack.i.l.bf16 %v5569_v27  ;;  %5853 = vrot.lane.b32.xlu0 %v5852_v13, %s8296_s20  ;;  %v755_v27 = vld [vmem:[%s6607_s24 + $0x34] sm:$0xff] }
  0x99   : > { %v1647_v37 = vsel %vm1646_vm1, %v1582_v31, %v5560_v1  ;;  %v1648_v38 = vsel %vm1646_vm1, %v1583_v32, %v5561_v26  ;;  %5858 = vrot.lane.b32.xlu1 %v5857_v19, %s8300_s17  ;;  %v668_v31 = vld [vmem:[%s6607_s24 + $0x17a] sm:$0xff] }
  0x9a   : > { %v1584_v41 = vsel %vm1581_vm0, %v495_v16, %v5570_v34  ;;  %v1585_v42 = vsel %vm1581_vm0, %v496_v17, %v5571_v33  ;;  %v5574_v43 = vpop.permute.xlu0 %5573  ;;  %v1712_v44 = vsel %vm1711_vm2, %v1647_v37, %v5565_v21  ;;  %v1713_v45 = vsel %vm1711_vm2, %v1648_v38, %v5566_v20  ;;  %v731_v32 = vld [vmem:[%s6607_s24 + $0x173] sm:$0xff]  ;;  %v605_v37 = vld [vmem:[%s6607_s24 + $0x181] sm:$0xff]  ;;  %v606_v38 = vld [vmem:[%s6607_s24 + $0x189] sm:$0xff] }
  0x9b   : > { %v5576_v46 = vunpack.i.h.bf16 %v5574_v43  ;;  %v5575_v47 = vunpack.i.l.bf16 %v5574_v43  ;;  %v5579_v48 = vpop.permute.xlu1 %5578  ;;  %v1776_v49 = vpack.c.bf16 %v1713_v45, %v1712_v44  ;;  %v670_v43 = vld [vmem:[%s6607_s24 + $0x18a] sm:$0xff] }
  0x9c   : > { %v5581_v50 = vunpack.i.h.bf16 %v5579_v48  ;;  %v5580_v51 = vunpack.i.l.bf16 %v5579_v48  ;;  %5863 = vrot.lane.b32.xlu0 %v5862_v28, %s8298_s27  ;;  %v756_v28 = vld [vmem:[%s6607_s24 + $0x3c] sm:$0xff] }
  0x9d   : > { %2056 = vmatmul.mubr.bf16.vlgmr.msra.gmra.mxu0 %v1776_v49  ;;  %v1649_v55 = vsel %vm1646_vm1, %v1584_v41, %v5575_v47  ;;  %v1650_v56 = vsel %vm1646_vm1, %v1585_v42, %v5576_v46  ;;  %5868 = vrot.lane.b32.xlu1 %v5867_v40, %s8296_s20  ;;  %v5902_v41 = vpack.i.bf16 %v668_v31, %v667_v30  ;;  %v669_v42 = vld [vmem:[%s6607_s24 + $0x182] sm:$0xff] }
  0x9e   : > { %v5584_v63 = vpop.permute.xlu0 %5583  ;;  %5135 = vmatprep.mubr.msk.bf16.mxu0 %vm1581_vm0, %v1779_v39  ;;  %v1714_v7 = vsel %vm1711_vm2, %v1649_v55, %v5580_v51  ;;  %v1715_v8 = vsel %vm1711_vm2, %v1650_v56, %v5581_v50  ;;  %v5907_v47 = vpack.i.bf16 %v732_v36, %v731_v32  ;;  %v1783_v50 = vpack.c.bf16 %v756_v28, %v755_v27  ;;  %v501_v56 = vld [vmem:[%s6607_s24 + $0x40] sm:$0xff]  ;;  %v610_v30 = vld [vmem:[%s6607_s24 + $0x1a9] sm:$0xff]  ;;  %v504_v36 = vld [vmem:[%s6607_s24 + $0x58] sm:$0xff] }
  0x9f   : > { %v5586_v2 = vunpack.i.h.bf16 %v5584_v63  ;;  %v5585_v3 = vunpack.i.l.bf16 %v5584_v63  ;;  %v5589_v4 = vpop.permute.xlu1 %5588  ;;  %v1778_v19 = vpack.c.bf16 %v1715_v8, %v1714_v7  ;;  %v5912_v55 = vpack.i.bf16 %v606_v38, %v605_v37  ;;  %v607_v63 = vld [vmem:[%s6607_s24 + $0x191] sm:$0xff]  ;;  %v760_v38 = vld [vmem:[%s6607_s24 + $0x5c] sm:$0xff] }
  0xa0   : > { %5873 = vrot.lane.b32.xlu0 %v5872_v52, %s8300_s17  ;;  %v5591_v12 = vunpack.i.h.bf16 %v5589_v4  ;;  %v5590_v13 = vunpack.i.l.bf16 %v5589_v4  ;;  %v5917_v60 = vpack.i.bf16 %v670_v43, %v669_v42  ;;  %v502_v4 = vld [vmem:[%s6607_s24 + $0x48] sm:$0xff]  ;;  %v759_v37 = vld [vmem:[%s6607_s24 + $0x54] sm:$0xff] }
  0xa1   : > { %5878 = vrot.lane.b32.xlu1 %v5877_v59, %s8298_s27  ;;  %v1586_v15 = vsel %vm1581_vm0, %v497_v53, %v5585_v3  ;;  %v1587_v16 = vsel %vm1581_vm0, %v498_v54, %v5586_v2  ;;  %v608_v3 = vld [vmem:[%s6607_s24 + $0x199] sm:$0xff] }
  0xa2   : > { %v5594_v17 = vpop.permute.xlu0 %5593  ;;  %v1651_v26 = vsel %vm1646_vm1, %v1586_v15, %v5590_v13  ;;  %v1652_v1 = vsel %vm1646_vm1, %v1587_v16, %v5591_v12  ;;  %v5927_v13 = vpack.i.bf16 %v608_v3, %v607_v63  ;;  %v672_v15 = vld [vmem:[%s6607_s24 + $0x19a] sm:$0xff] }
  0xa3   : > { %v5599_v20 = vpop.permute.xlu1 %5598  ;;  %v5596_v21 = vunpack.i.h.bf16 %v5594_v17  ;;  %v5595_v22 = vunpack.i.l.bf16 %v5594_v17  ;;  %v676_v63 = vld [vmem:[%s6607_s24 + $0x1ba] sm:$0xff] }
  0xa4   : > { %5883 = vrot.lane.b32.xlu0 %v5882_v9, %s8296_s20  ;;  %v5601_v33 = vunpack.i.h.bf16 %v5599_v20  ;;  %v5600_v34 = vunpack.i.l.bf16 %v5599_v20  ;;  %v5922_v9 = vpack.i.bf16 %v734_v62, %v733_v61  ;;  %v736_v20 = vld [vmem:[%s6607_s24 + $0x19b] sm:$0xff]  ;;  %v675_v62 = vld [vmem:[%s6607_s24 + $0x1b2] sm:$0xff] }
  0xa5   : > { %2064 = vmatmul.mubr.bf16.gmra.mxu0 %v1778_v19  ;;  %5888 = vrot.lane.b32.xlu1 %v5887_v14, %s8300_s17  ;;  %v1716_v39 = vsel %vm1711_vm2, %v1651_v26, %v5595_v22  ;;  %v1717_v40 = vsel %vm1711_vm2, %v1652_v1, %v5596_v21  ;;  %v671_v14 = vld [vmem:[%s6607_s24 + $0x192] sm:$0xff]  ;;  %v505_v3 = vld [vmem:[%s6607_s24 + $0x60] sm:$0xff] }
  0xa6   : > { %v5604_v35 = vpop.permute.xlu0 %5603  ;;  %5136 = vmatprep.mubr.msk.bf16.mxu0 %vm1581_vm0, %v1781_v18  ;;  %v1588_v48 = vsel %vm1581_vm0, %v499_v24, %v5600_v34  ;;  %v1589_v49 = vsel %vm1581_vm0, %v500_v25, %v5601_v33  ;;  %v1780_v51 = vpack.c.bf16 %v1717_v40, %v1716_v39  ;;  %v1785_v18 = vpack.c.bf16 %v758_v6, %v757_v5  ;;  %v735_v19 = vld [vmem:[%s6607_s24 + $0x193] sm:$0xff]  ;;  %v673_v34 = vld [vmem:[%s6607_s24 + $0x1a2] sm:$0xff] }
  0xa7   : > { %v5606_v44 = vunpack.i.h.bf16 %v5604_v35  ;;  %v5605_v45 = vunpack.i.l.bf16 %v5604_v35  ;;  %v5609_v46 = vpop.permute.xlu1 %5608  ;;  %v5932_v25 = vpack.i.bf16 %v672_v15, %v671_v14  ;;  %v5937_v28 = vpack.i.bf16 %v736_v20, %v735_v19  ;;  %v503_v33 = vld [vmem:[%s6607_s24 + $0x50] sm:$0xff]  ;;  %v740_v5 = vld [vmem:[%s6607_s24 + $0x1bb] sm:$0xff]  ;;  %v506_v6 = vld [vmem:[%s6607_s24 + $0x68] sm:$0xff] }
  0xa8   : > { %5893 = vrot.lane.b32.xlu0 %v5892_v23, %s8298_s27  ;;  %v5611_v53 = vunpack.i.h.bf16 %v5609_v46  ;;  %v5610_v54 = vunpack.i.l.bf16 %v5609_v46  ;;  %v674_v35 = vld [vmem:[%s6607_s24 + $0x1aa] sm:$0xff] }
  0xa9   : > { %5898 = vrot.lane.b32.xlu1 %v5897_v29, %s8296_s20  ;;  %v1653_v58 = vsel %vm1646_vm1, %v1588_v48, %v5605_v45  ;;  %v1654_v59 = vsel %vm1646_vm1, %v1589_v49, %v5606_v44  ;;  %v609_v29 = vld [vmem:[%s6607_s24 + $0x1a1] sm:$0xff]  ;;  %v5947_v45 = vpack.i.bf16 %v674_v35, %v673_v34  ;;  %v507_v35 = vld [vmem:[%s6607_s24 + $0x70] sm:$0xff] }
  0xaa   : > { %v5614_v52 = vpop.permute.xlu0 %5613  ;;  %v1718_v7 = vsel %vm1711_vm2, %v1653_v58, %v5610_v54  ;;  %v1719_v8 = vsel %vm1711_vm2, %v1654_v59, %v5611_v53  ;;  %v737_v46 = vld [vmem:[%s6607_s24 + $0x1a3] sm:$0xff] }
  0xab   : > { %v5619_v57 = vpop.permute.xlu1 %5618  ;;  %v5616_v0 = vunpack.i.h.bf16 %v5614_v52  ;;  %v5615_v2 = vunpack.i.l.bf16 %v5614_v52  ;;  %v1782_v21 = vpack.c.bf16 %v1719_v8, %v1718_v7  ;;  %v612_v52 = vld [vmem:[%s6607_s24 + $0x1b9] sm:$0xff]  ;;  %v761_v7 = vld [vmem:[%s6607_s24 + $0x64] sm:$0xff]  ;;  %v762_v8 = vld [vmem:[%s6607_s24 + $0x6c] sm:$0xff] }
  0xac   : > { %5903 = vrot.lane.b32.xlu0 %v5902_v41, %s8300_s17  ;;  %v5621_v10 = vunpack.i.h.bf16 %v5619_v57  ;;  %v5620_v11 = vunpack.i.l.bf16 %v5619_v57  ;;  %v5942_v41 = vpack.i.bf16 %v610_v30, %v609_v29  ;;  %v1789_v20 = vpack.c.bf16 %v762_v8, %v761_v7  ;;  %v682_v7 = vld [vmem:[%s6607_s24 + $0x1ea] sm:$0xff] }
  0xad   : > { %2072 = vmatmul.mubr.bf16.gmra.mxu0 %v1780_v51  ;;  %5908 = vrot.lane.b32.xlu1 %v5907_v47, %s8298_s27  ;;  %v1590_v16 = vsel %vm1581_vm0, %v501_v56, %v5615_v2  ;;  %v1591_v17 = vsel %vm1581_vm0, %v502_v4, %v5616_v0  ;;  %v738_v47 = vld [vmem:[%s6607_s24 + $0x1ab] sm:$0xff]  ;;  %v739_v4 = vld [vmem:[%s6607_s24 + $0x1b3] sm:$0xff] }
  0xae   : > { %5137 = vmatprep.mubr.msk.bf16.mxu0 %vm1581_vm0, %v1783_v50  ;;  %v5624_v12 = vpop.permute.xlu0 %5623  ;;  %v1655_v1 = vsel %vm1646_vm1, %v1590_v16, %v5620_v11  ;;  %v1656_v27 = vsel %vm1646_vm1, %v1591_v17, %v5621_v10  ;;  %v1787_v50 = vpack.c.bf16 %v760_v38, %v759_v37  ;;  %v611_v51 = vld [vmem:[%s6607_s24 + $0x1b1] sm:$0xff]  ;;  %v5952_v57 = vpack.i.bf16 %v738_v47, %v737_v46  ;;  %v613_v16 = vld [vmem:[%s6607_s24 + $0x1c1] sm:$0xff]  ;;  %v614_v17 = vld [vmem:[%s6607_s24 + $0x1c9] sm:$0xff] }
  0xaf   : > { %v5629_v22 = vpop.permute.xlu1 %5628  ;;  %v5626_v23 = vunpack.i.h.bf16 %v5624_v12  ;;  %v5625_v24 = vunpack.i.l.bf16 %v5624_v12  ;;  %v5957_v61 = vpack.i.bf16 %v612_v52, %v611_v51  ;;  %v5962_v11 = vpack.i.bf16 %v676_v63, %v675_v62  ;;  %v616_v37 = vld [vmem:[%s6607_s24 + $0x1d9] sm:$0xff]  ;;  %v510_v8 = vld [vmem:[%s6607_s24 + $0x88] sm:$0xff] }
  0xb0   : > { %5913 = vrot.lane.b32.xlu0 %v5912_v55, %s8296_s20  ;;  %v5631_v31 = vunpack.i.h.bf16 %v5629_v22  ;;  %v5630_v32 = vunpack.i.l.bf16 %v5629_v22  ;;  %v5967_v15 = vpack.i.bf16 %v740_v5, %v739_v4  ;;  %v678_v22 = vld [vmem:[%s6607_s24 + $0x1ca] sm:$0xff]  ;;  %v508_v38 = vld [vmem:[%s6607_s24 + $0x78] sm:$0xff]  ;;  %v509_v5 = vld [vmem:[%s6607_s24 + $0x80] sm:$0xff] }
  0xb1   : > { %5918 = vrot.lane.b32.xlu1 %v5917_v60, %s8300_s17  ;;  %v1720_v39 = vsel %vm1711_vm2, %v1655_v1, %v5625_v24  ;;  %v1721_v40 = vsel %vm1711_vm2, %v1656_v27, %v5626_v23  ;;  %v5972_v1 = vpack.i.bf16 %v614_v17, %v613_v16 }
  0xb2   : > { %v5634_v26 = vpop.permute.xlu0 %5633  ;;  %v1592_v48 = vsel %vm1581_vm0, %v503_v33, %v5630_v32  ;;  %v1593_v49 = vsel %vm1581_vm0, %v504_v36, %v5631_v31  ;;  %v1784_v53 = vpack.c.bf16 %v1721_v40, %v1720_v39  ;;  %v741_v31 = vld [vmem:[%s6607_s24 + $0x1c3] sm:$0xff]  ;;  %v742_v32 = vld [vmem:[%s6607_s24 + $0x1cb] sm:$0xff]  ;;  %v763_v39 = vld [vmem:[%s6607_s24 + $0x74] sm:$0xff] }
  0xb3   : > { %v5636_v42 = vunpack.i.h.bf16 %v5634_v26  ;;  %v5635_v43 = vunpack.i.l.bf16 %v5634_v26  ;;  %v5639_v44 = vpop.permute.xlu1 %5638  ;;  %v615_v36 = vld [vmem:[%s6607_s24 + $0x1d1] sm:$0xff]  ;;  %v764_v40 = vld [vmem:[%s6607_s24 + $0x7c] sm:$0xff] }
  0xb4   : > { %5923 = vrot.lane.b32.xlu0 %v5922_v9, %s8298_s27  ;;  %v5641_v55 = vunpack.i.h.bf16 %v5639_v44  ;;  %v5640_v56 = vunpack.i.l.bf16 %v5639_v44  ;;  %v5987_v47 = vpack.i.bf16 %v616_v37, %v615_v36  ;;  %v1791_v52 = vpack.c.bf16 %v764_v40, %v763_v39  ;;  %v511_v37 = vld [vmem:[%s6607_s24 + $0x90] sm:$0xff]  ;;  %v748_v39 = vld [vmem:[%s6607_s24 + $0x1fb] sm:$0xf] }
  0xb5   : > { %2080 = vmatmul.mubr.bf16.gmra.mxu0 %v1782_v21  ;;  %5928 = vrot.lane.b32.xlu1 %v5927_v13, %s8296_s20  ;;  %v1657_v59 = vsel %vm1646_vm1, %v1592_v48, %v5635_v43  ;;  %v1658_v60 = vsel %vm1646_vm1, %v1593_v49, %v5636_v42  ;;  %v677_v21 = vld [vmem:[%s6607_s24 + $0x1c2] sm:$0xff]  ;;  %v5982_v43 = vpack.i.bf16 %v742_v32, %v741_v31  ;;  %v679_v48 = vld [vmem:[%s6607_s24 + $0x1d2] sm:$0xff]  ;;  %v680_v49 = vld [vmem:[%s6607_s24 + $0x1da] sm:$0xff] }
  0xb6   : > { %5138 = vmatprep.mubr.msk.bf16.mxu0 %vm1581_vm0, %v1785_v18  ;;  %v5644_v54 = vpop.permute.xlu0 %5643  ;;  %v1722_v9 = vsel %vm1711_vm2, %v1657_v59, %v5640_v56  ;;  %v1723_v10 = vsel %vm1711_vm2, %v1658_v60, %v5641_v55  ;;  %v5977_v30 = vpack.i.bf16 %v678_v22, %v677_v21  ;;  %v5992_v59 = vpack.i.bf16 %v680_v49, %v679_v48  ;;  %v512_v40 = vld [vmem:[%s6607_s24 + $0x98] sm:$0xff] }
  0xb7   : > { %v5649_v58 = vpop.permute.xlu1 %5648  ;;  %v5646_v0 = vunpack.i.h.bf16 %v5644_v54  ;;  %v5645_v2 = vunpack.i.l.bf16 %v5644_v54  ;;  %v1786_v23 = vpack.c.bf16 %v1723_v10, %v1722_v9  ;;  %v744_v54 = vld [vmem:[%s6607_s24 + $0x1db] sm:$0xff]  ;;  %v765_v9 = vld [vmem:[%s6607_s24 + $0x84] sm:$0xff]  ;;  %v766_v10 = vld [vmem:[%s6607_s24 + $0x8c] sm:$0xff] }
  0xb8   : > { %5933 = vrot.lane.b32.xlu0 %v5932_v25, %s8300_s17  ;;  %v5651_v12 = vunpack.i.h.bf16 %v5649_v58  ;;  %v5650_v13 = vunpack.i.l.bf16 %v5649_v58  ;;  %v1793_v22 = vpack.c.bf16 %v766_v10, %v765_v9 }
  0xb9   : > { %5938 = vrot.lane.b32.xlu1 %v5937_v28, %s8298_s27  ;;  %v1594_v18 = vsel %vm1581_vm0, %v505_v3, %v5645_v2  ;;  %v1595_v19 = vsel %vm1581_vm0, %v506_v6, %v5646_v0  ;;  %v617_v0 = vld [vmem:[%s6607_s24 + $0x1e1] sm:$0xff]  ;;  %v618_v2 = vld [vmem:[%s6607_s24 + $0x1e9] sm:$0xff] }
  0xba   : > { %v5654_v14 = vpop.permute.xlu0 %5653  ;;  %v1659_v28 = vsel %vm1646_vm1, %v1594_v18, %v5650_v13  ;;  %v1660_v29 = vsel %vm1646_vm1, %v1595_v19, %v5651_v12  ;;  %v681_v6 = vld [vmem:[%s6607_s24 + $0x1e2] sm:$0xff]  ;;  %v6002_v13 = vpack.i.bf16 %v618_v2, %v617_v0  ;;  %v746_v19 = vld [vmem:[%s6607_s24 + $0x1eb] sm:$0xff] }
  0xbb   : > { %v5659_v24 = vpop.permute.xlu1 %5658  ;;  %v5656_v25 = vunpack.i.h.bf16 %v5654_v14  ;;  %v5655_v26 = vunpack.i.l.bf16 %v5654_v14  ;;  %v6007_v17 = vpack.i.bf16 %v682_v7, %v681_v6  ;;  %v745_v18 = vld [vmem:[%s6607_s24 + $0x1e3] sm:$0xff]  ;;  %v770_v2 = vld [vmem:[%s6607_s24 + $0xac] sm:$0xff] }
  0xbc   : > { %5943 = vrot.lane.b32.xlu0 %v5942_v41, %s8296_s20  ;;  %v5661_v33 = vunpack.i.h.bf16 %v5659_v24  ;;  %v5660_v34 = vunpack.i.l.bf16 %v5659_v24  ;;  %v620_v24 = vld [vmem:[%s6607_s24 + $0x1f9] sm:$0xf]  ;;  %v769_v0 = vld [vmem:[%s6607_s24 + $0xa4] sm:$0xff] }
  0xbd   : > { %2088 = vmatmul.mubr.bf16.gmra.mxu0 %v1784_v53  ;;  %5948 = vrot.lane.b32.xlu1 %v5947_v45, %s8300_s17  ;;  %v1724_v41 = vsel %vm1711_vm2, %v1659_v28, %v5655_v26  ;;  %v1725_v42 = vsel %vm1711_vm2, %v1660_v29, %v5656_v25  ;;  %v743_v53 = vld [vmem:[%s6607_s24 + $0x1d3] sm:$0xff]  ;;  %v6012_v28 = vpack.i.bf16 %v746_v19, %v745_v18 }
  0xbe   : > { %5139 = vmatprep.mubr.msk.bf16.mxu0 %vm1581_vm0, %v1787_v50  ;;  %v5664_v27 = vpop.permute.xlu0 %5663  ;;  %v1596_v50 = vsel %vm1581_vm0, %v507_v35, %v5660_v34  ;;  %v1597_v51 = vsel %vm1581_vm0, %v508_v38, %v5661_v33  ;;  %v1788_v55 = vpack.c.bf16 %v1725_v42, %v1724_v41  ;;  %v5997_v63 = vpack.i.bf16 %v744_v54, %v743_v53  ;;  %v683_v33 = vld [vmem:[%s6607_s24 + $0x1f2] sm:$0xff]  ;;  %v684_v34 = vld [vmem:[%s6607_s24 + $0x1fa] sm:$0xf] }
  0xbf   : > { %v5666_v44 = vunpack.i.h.bf16 %v5664_v27  ;;  %v5665_v45 = vunpack.i.l.bf16 %v5664_v27  ;;  %v5669_v46 = vpop.permute.xlu1 %5668  ;;  %v747_v38 = vld [vmem:[%s6607_s24 + $0x1f3] sm:$0xff]  ;;  %v768_v42 = vld [vmem:[%s6607_s24 + $0x9c] sm:$0xff]  ;;  %v1797_v10 = vpack.c.bf16 %v770_v2, %v769_v0 }
  0xc0   : > { %5953 = vrot.lane.b32.xlu0 %v5952_v57, %s8298_s27  ;;  %v5671_v57 = vunpack.i.h.bf16 %v5669_v46  ;;  %v5670_v58 = vunpack.i.l.bf16 %v5669_v46  ;;  %v767_v41 = vld [vmem:[%s6607_s24 + $0x94] sm:$0xff]  ;;  %v6027_v49 = vpack.i.bf16 %v748_v39, %v747_v38  ;;  %v776_v0 = vld [vmem:[%s6607_s24 + $0xdc] sm:$0xff] }
  0xc1   : > { %5958 = vrot.lane.b32.xlu1 %v5957_v61, %s8296_s20  ;;  %v1661_v61 = vsel %vm1646_vm1, %v1596_v50, %v5665_v45  ;;  %v1662_v62 = vsel %vm1646_vm1, %v1597_v51, %v5666_v44  ;;  %v6022_v45 = vpack.i.bf16 %v684_v34, %v683_v33 }
  0xc2   : > { %v5674_v56 = vpop.permute.xlu0 %5673  ;;  %v1727_v12 = vsel %vm1711_vm2, %v1662_v62, %v5671_v57  ;;  %v513_v62 = vld [vmem:[%s6607_s24 + $0xa0] sm:$0xff] }
  0xc3   : > { %v5679_v60 = vpop.permute.xlu1 %5678  ;;  %v5676_v3 = vunpack.i.h.bf16 %v5674_v56  ;;  %v5675_v4 = vunpack.i.l.bf16 %v5674_v56 }
  0xc4   : > { %5963 = vrot.lane.b32.xlu0 %v5962_v11, %s8300_s17  ;;  %v1726_v11 = vsel %vm1711_vm2, %v1661_v61, %v5670_v58  ;;  %v5681_v14 = vunpack.i.h.bf16 %v5679_v60 }
  0xc5   : > { %2096 = vmatmul.mubr.bf16.gmra.mxu0 %v1786_v23  ;;  %5968 = vrot.lane.b32.xlu1 %v5967_v15, %s8298_s27  ;;  %v5680_v15 = vunpack.i.l.bf16 %v5679_v60  ;;  %v1599_v21 = vsel %vm1581_vm0, %v510_v8, %v5676_v3  ;;  %v619_v23 = vld [vmem:[%s6607_s24 + $0x1f1] sm:$0xff]  ;;  %v1790_v25 = vpack.c.bf16 %v1727_v12, %v1726_v11 }
  0xc6   : > { %5140 = vmatprep.mubr.msk.bf16.mxu0 %vm1581_vm0, %v1789_v20  ;;  %v5684_v16 = vpop.permute.xlu0 %5683  ;;  %v1598_v20 = vsel %vm1581_vm0, %v509_v5, %v5675_v4  ;;  %v1664_v31 = vsel %vm1646_vm1, %v1599_v21, %v5681_v14  ;;  %v6017_v32 = vpack.i.bf16 %v620_v24, %v619_v23  ;;  %v516_v21 = vld [vmem:[%s6607_s24 + $0xb8] sm:$0xff] }
  0xc7   : > { %v5689_v26 = vpop.permute.xlu1 %5688  ;;  %v5685_v27 = vunpack.i.l.bf16 %v5684_v16  ;;  %v772_v23 = vld [vmem:[%s6607_s24 + $0xbc] sm:$0xff] }
  0xc8   : > { %5973 = vrot.lane.b32.xlu0 %v5972_v1, %s8296_s20  ;;  %v5686_v1 = vunpack.i.h.bf16 %v5684_v16  ;;  %v5691_v35 = vunpack.i.h.bf16 %v5689_v26  ;;  %v5690_v36 = vunpack.i.l.bf16 %v5689_v26 }
  0xc9   : > { %5978 = vrot.lane.b32.xlu1 %v5977_v30, %s8300_s17  ;;  %v1663_v30 = vsel %vm1646_vm1, %v1598_v20, %v5680_v15  ;;  %v515_v20 = vld [vmem:[%s6607_s24 + $0xb0] sm:$0xff] }
  0xca   : > { %v5694_v29 = vpop.permute.xlu0 %5693  ;;  %v1729_v44 = vsel %vm1711_vm2, %v1664_v31, %v5686_v1  ;;  %v1600_v50 = vsel %vm1581_vm0, %v511_v37, %v5690_v36  ;;  %v1601_v51 = vsel %vm1581_vm0, %v512_v40, %v5691_v35  ;;  %v517_v40 = vld [vmem:[%s6607_s24 + $0xc0] sm:$0xff] }
  0xcb   : > { %v5696_v46 = vunpack.i.h.bf16 %v5694_v29  ;;  %v5699_v48 = vpop.permute.xlu1 %5698 }
  0xcc   : > { %5983 = vrot.lane.b32.xlu0 %v5982_v43, %s8298_s27  ;;  %v1728_v43 = vsel %vm1711_vm2, %v1663_v30, %v5685_v27  ;;  %v5700_v56 = vunpack.i.l.bf16 %v5699_v48 }
  0xcd   : > { %2104 = vmatmul.mubr.bf16.gmra.mxu0 %v1788_v55  ;;  %5988 = vrot.lane.b32.xlu1 %v5987_v47, %s8296_s20  ;;  %v5695_v47 = vunpack.i.l.bf16 %v5694_v29  ;;  %v1792_v53 = vpack.c.bf16 %v1729_v44, %v1728_v43  ;;  %v5701_v55 = vunpack.i.h.bf16 %v5699_v48  ;;  %v774_v43 = vld [vmem:[%s6607_s24 + $0xcc] sm:$0xff] }
  0xce   : > { %5141 = vmatprep.mubr.msk.bf16.mxu0 %vm1581_vm0, %v1791_v52  ;;  %v1795_v52 = vpack.c.bf16 %v768_v42, %v767_v41  ;;  %v5704_v54 = vpop.permute.xlu0 %5703  ;;  %v518_v41 = vld [vmem:[%s6607_s24 + $0xc8] sm:$0xff] }
  0xcf   : > { %v5709_v57 = vpop.permute.xlu1 %5708  ;;  %v1665_v58 = vsel %vm1646_vm1, %v1600_v50, %v5695_v47  ;;  %v5706_v60 = vunpack.i.h.bf16 %v5704_v54  ;;  %v5705_v61 = vunpack.i.l.bf16 %v5704_v54  ;;  %v773_v42 = vld [vmem:[%s6607_s24 + $0xc4] sm:$0xff] }
  0xd0   : > { %5993 = vrot.lane.b32.xlu0 %v5992_v59, %s8300_s17  ;;  %v1666_v59 = vsel %vm1646_vm1, %v1601_v51, %v5696_v46  ;;  %v1730_v3 = vsel %vm1711_vm2, %v1665_v58, %v5700_v56  ;;  %v5711_v5 = vunpack.i.h.bf16 %v5709_v57  ;;  %v5710_v6 = vunpack.i.l.bf16 %v5709_v57 }
  0xd1   : > { %5998 = vrot.lane.b32.xlu1 %v5997_v63, %s8298_s27  ;;  %v514_v63 = vld [vmem:[%s6607_s24 + $0xa8] sm:$0xff]  ;;  %v1731_v4 = vsel %vm1711_vm2, %v1666_v59, %v5701_v55  ;;  %v1602_v8 = vsel %vm1581_vm0, %v513_v62, %v5705_v61  ;;  %v1801_v51 = vpack.c.bf16 %v774_v43, %v773_v42  ;;  %v519_v61 = vld [vmem:[%s6607_s24 + $0xd0] sm:$0xff]  ;;  %v520_v62 = vld [vmem:[%s6607_s24 + $0xd8] sm:$0xff] }
  0xd2   : > { %v5714_v7 = vpop.permute.xlu0 %5713  ;;  %v1603_v9 = vsel %vm1581_vm0, %v514_v63, %v5706_v60  ;;  %v1794_v11 = vpack.c.bf16 %v1731_v4, %v1730_v3  ;;  %v1667_v16 = vsel %vm1646_vm1, %v1602_v8, %v5710_v6  ;;  %v775_v63 = vld [vmem:[%s6607_s24 + $0xd4] sm:$0xff]  ;;  %v780_v42 = vld [vmem:[%s6607_s24 + $0xfc] sm:$0xff] }
  0xd3   : > { %v5719_v12 = vpop.permute.xlu1 %5718  ;;  %v5715_v14 = vunpack.i.l.bf16 %v5714_v7 }
  0xd4   : > { %6003 = vrot.lane.b32.xlu0 %v6002_v13, %s8296_s20  ;;  %v5716_v13 = vunpack.i.h.bf16 %v5714_v7  ;;  %v5721_v18 = vunpack.i.h.bf16 %v5719_v12  ;;  %v5720_v19 = vunpack.i.l.bf16 %v5719_v12 }
  0xd5   : > { %2112 = vmatmul.mubr.bf16.gmra.mxu0 %v1790_v25  ;;  %6008 = vrot.lane.b32.xlu1 %v6007_v17, %s8300_s17  ;;  %v1668_v17 = vsel %vm1646_vm1, %v1603_v9, %v5711_v5  ;;  %v1732_v24 = vsel %vm1711_vm2, %v1667_v16, %v5715_v14  ;;  %v1803_v9 = vpack.c.bf16 %v776_v0, %v775_v63  ;;  %v782_v63 = vld [vmem:[%s6607_s24 + $0x10c] sm:$0xff] }
  0xd6   : > { %5142 = vmatprep.mubr.msk.bf16.mxu0 %vm1581_vm0, %v1793_v22  ;;  %v5724_v15 = vpop.permute.xlu0 %5723  ;;  %v771_v22 = vld [vmem:[%s6607_s24 + $0xb4] sm:$0xff]  ;;  %v1733_v25 = vsel %vm1711_vm2, %v1668_v17, %v5716_v13  ;;  %v1605_v29 = vsel %vm1581_vm0, %v516_v21, %v5721_v18  ;;  %v777_v21 = vld [vmem:[%s6607_s24 + $0xe4] sm:$0xff] }
  0xd7   : > { %v5726_v26 = vunpack.i.h.bf16 %v5724_v15  ;;  %v5725_v1 = vunpack.i.l.bf16 %v5724_v15  ;;  %v5729_v27 = vpop.permute.xlu1 %5728  ;;  %v1799_v30 = vpack.c.bf16 %v772_v23, %v771_v22  ;;  %v1796_v31 = vpack.c.bf16 %v1733_v25, %v1732_v24  ;;  %v778_v22 = vld [vmem:[%s6607_s24 + $0xec] sm:$0xff] }
  0xd8   : > { %6013 = vrot.lane.b32.xlu0 %v6012_v28, %s8298_s27  ;;  %v1604_v28 = vsel %vm1581_vm0, %v515_v20, %v5720_v19  ;;  %v5731_v33 = vunpack.i.h.bf16 %v5729_v27  ;;  %v5730_v34 = vunpack.i.l.bf16 %v5729_v27  ;;  %v521_v19 = vld [vmem:[%s6607_s24 + $0xe0] sm:$0xff]  ;;  %v522_v20 = vld [vmem:[%s6607_s24 + $0xe8] sm:$0xff] }
  0xd9   : > { %6018 = vrot.lane.b32.xlu1 %v6017_v32, %s8296_s20  ;;  %v1669_v36 = vsel %vm1646_vm1, %v1604_v28, %v5725_v1  ;;  %v1670_v37 = vsel %vm1646_vm1, %v1605_v29, %v5726_v26  ;;  %v1805_v29 = vpack.c.bf16 %v778_v22, %v777_v21  ;;  %v784_v21 = vld [vmem:[%s6607_s24 + $0x11c] sm:$0xff] }
  0xda   : > { %v5734_v32 = vpop.permute.xlu0 %5733  ;;  %v1734_v44 = vsel %vm1711_vm2, %v1669_v36, %v5730_v34 }
  0xdb   : > { %v5739_v35 = vpop.permute.xlu1 %5738  ;;  %v5736_v38 = vunpack.i.h.bf16 %v5734_v32  ;;  %v5735_v39 = vunpack.i.l.bf16 %v5734_v32 }
  0xdc   : > { %6023 = vrot.lane.b32.xlu0 %v6022_v45, %s8300_s17  ;;  %v1735_v45 = vsel %vm1711_vm2, %v1670_v37, %v5731_v33  ;;  %v5741_v46 = vunpack.i.h.bf16 %v5739_v35  ;;  %v5740_v47 = vunpack.i.l.bf16 %v5739_v35 }
  0xdd   : > { %2120 = vmatmul.mubr.bf16.gmra.mxu0 %v1792_v53  ;;  %6028 = vrot.lane.b32.xlu1 %v6027_v49, %s8298_s27  ;;  %v1606_v49 = vsel %vm1581_vm0, %v517_v40, %v5735_v39  ;;  %v1607_v50 = vsel %vm1581_vm0, %v518_v41, %v5736_v38  ;;  %v523_v39 = vld [vmem:[%s6607_s24 + $0xf0] sm:$0xff]  ;;  %v524_v40 = vld [vmem:[%s6607_s24 + $0xf8] sm:$0xff] }
  0xde   : > { %5143 = vmatprep.mubr.msk.bf16.mxu0 %vm1581_vm0, %v1795_v52  ;;  %v5744_v48 = vpop.permute.xlu0 %5743  ;;  %v1798_v52 = vpack.c.bf16 %v1735_v45, %v1734_v44  ;;  %v1671_v57 = vsel %vm1646_vm1, %v1606_v49, %v5740_v47  ;;  %v1672_v58 = vsel %vm1646_vm1, %v1607_v50, %v5741_v46  ;;  %v779_v41 = vld [vmem:[%s6607_s24 + $0xf4] sm:$0xff] }
  0xdf   : > { %v5749_v53 = vpop.permute.xlu1 %5748  ;;  %v5746_v54 = vunpack.i.h.bf16 %v5744_v48  ;;  %v5745_v55 = vunpack.i.l.bf16 %v5744_v48  ;;  %v1807_v50 = vpack.c.bf16 %v780_v42, %v779_v41  ;;  %v786_v41 = vld [vmem:[%s6607_s24 + $0x12c] sm:$0xff] }
  0xe0   : > { %v5751_v59 = vunpack.i.h.bf16 %v5749_v53  ;;  %v5750_v60 = vunpack.i.l.bf16 %v5749_v53 }
  0xe1   : > { %v1736_v2 = vsel %vm1711_vm2, %v1671_v57, %v5745_v55  ;;  %v1737_v3 = vsel %vm1711_vm2, %v1672_v58, %v5746_v54 }
  0xe2   : > { %v5754_v56 = vpop.permute.xlu0 %5753  ;;  %v1608_v7 = vsel %vm1581_vm0, %v519_v61, %v5750_v60  ;;  %v1609_v8 = vsel %vm1581_vm0, %v520_v62, %v5751_v59  ;;  %v525_v60 = vld [vmem:[%s6607_s24 + $0x100] sm:$0xff]  ;;  %v526_v61 = vld [vmem:[%s6607_s24 + $0x108] sm:$0xff] }
  0xe3   : > { %v5756_v4 = vunpack.i.h.bf16 %v5754_v56  ;;  %v5755_v5 = vunpack.i.l.bf16 %v5754_v56  ;;  %v5759_v6 = vpop.permute.xlu1 %5758  ;;  %v781_v62 = vld [vmem:[%s6607_s24 + $0x104] sm:$0xff] }
  0xe4   : > { %v5761_v12 = vunpack.i.h.bf16 %v5759_v6  ;;  %v5760_v13 = vunpack.i.l.bf16 %v5759_v6 }
  0xe5   : > { %2128 = vmatmul.mubr.bf16.gmra.mxu0 %v1794_v11  ;;  %v1673_v15 = vsel %vm1646_vm1, %v1608_v7, %v5755_v5  ;;  %v1674_v16 = vsel %vm1646_vm1, %v1609_v8, %v5756_v4  ;;  %v1809_v8 = vpack.c.bf16 %v782_v63, %v781_v62  ;;  %v788_v62 = vld [vmem:[%s6607_s24 + $0x13c] sm:$0xff] }
  0xe6   : > { %5144 = vmatprep.mubr.msk.bf16.mxu0 %vm1581_vm0, %v1797_v10  ;;  %v1800_v10 = vpack.c.bf16 %v1737_v3, %v1736_v2  ;;  %v5764_v11 = vpop.permute.xlu0 %5763  ;;  %v1738_v23 = vsel %vm1711_vm2, %v1673_v15, %v5760_v13  ;;  %v1739_v24 = vsel %vm1711_vm2, %v1674_v16, %v5761_v12 }
  0xe7   : > { %v5769_v14 = vpop.permute.xlu1 %5768  ;;  %v5766_v17 = vunpack.i.h.bf16 %v5764_v11  ;;  %v5765_v18 = vunpack.i.l.bf16 %v5764_v11 }
  0xe8   : > { %v5771_v25 = vunpack.i.h.bf16 %v5769_v14  ;;  %v5770_v26 = vunpack.i.l.bf16 %v5769_v14 }
  0xe9   : > { %v1610_v27 = vsel %vm1581_vm0, %v521_v19, %v5765_v18  ;;  %v1611_v28 = vsel %vm1581_vm0, %v522_v20, %v5766_v17  ;;  %v527_v18 = vld [vmem:[%s6607_s24 + $0x110] sm:$0xff]  ;;  %v528_v19 = vld [vmem:[%s6607_s24 + $0x118] sm:$0xff] }
  0xea   : > { %v5774_v1 = vpop.permute.xlu0 %5773  ;;  %v1675_v35 = vsel %vm1646_vm1, %v1610_v27, %v5770_v26  ;;  %v1676_v36 = vsel %vm1646_vm1, %v1611_v28, %v5771_v25  ;;  %v783_v20 = vld [vmem:[%s6607_s24 + $0x114] sm:$0xff] }
  0xeb   : > { %v5776_v32 = vunpack.i.h.bf16 %v5774_v1  ;;  %v5775_v33 = vunpack.i.l.bf16 %v5774_v1  ;;  %v1811_v28 = vpack.c.bf16 %v784_v21, %v783_v20  ;;  %v790_v20 = vld [vmem:[%s6607_s24 + $0x14c] sm:$0xff] }
  0xed   : > { %2136 = vmatmul.mubr.bf16.gmra.mxu0 %v1796_v31  ;;  %v5779_v31 = vpop.permute.xlu1 %5778  ;;  %v1740_v43 = vsel %vm1711_vm2, %v1675_v35, %v5775_v33  ;;  %v1741_v44 = vsel %vm1711_vm2, %v1676_v36, %v5776_v32 }
  0xee   : > { %5145 = vmatprep.mubr.msk.bf16.mxu0 %vm1581_vm0, %v1799_v30  ;;  %v1802_v30 = vpack.c.bf16 %v1739_v24, %v1738_v23  ;;  %v5784_v34 = vpop.permute.xlu0 %5783  ;;  %v5781_v37 = vunpack.i.h.bf16 %v5779_v31  ;;  %v5780_v38 = vunpack.i.l.bf16 %v5779_v31 }
  0xef   : > { %v5786_v45 = vunpack.i.h.bf16 %v5784_v34  ;;  %v5785_v46 = vunpack.i.l.bf16 %v5784_v34 }
  0xf0   : > { %v1612_v48 = vsel %vm1581_vm0, %v523_v39, %v5780_v38  ;;  %v1613_v49 = vsel %vm1581_vm0, %v524_v40, %v5781_v37  ;;  %v529_v38 = vld [vmem:[%s6607_s24 + $0x120] sm:$0xff]  ;;  %v530_v39 = vld [vmem:[%s6607_s24 + $0x128] sm:$0xff] }
  0xf1   : > { %v5789_v47 = vpop.permute.xlu1 %5788  ;;  %v1677_v56 = vsel %vm1646_vm1, %v1612_v48, %v5785_v46  ;;  %v1678_v57 = vsel %vm1646_vm1, %v1613_v49, %v5786_v45  ;;  %v785_v40 = vld [vmem:[%s6607_s24 + $0x124] sm:$0xff] }
  0xf2   : > { %v5791_v53 = vunpack.i.h.bf16 %v5789_v47  ;;  %v5790_v54 = vunpack.i.l.bf16 %v5789_v47  ;;  %v1813_v49 = vpack.c.bf16 %v786_v41, %v785_v40  ;;  %v792_v40 = vld [vmem:[%s6607_s24 + $0x15c] sm:$0xff] }
  0xf4   : > { %v1742_v0 = vsel %vm1711_vm2, %v1677_v56, %v5790_v54  ;;  %v1743_v2 = vsel %vm1711_vm2, %v1678_v57, %v5791_v53 }
  0xf5   : > { %2144 = vmatmul.mubr.bf16.gmra.mxu0 %v1798_v52  ;;  %v5794_v52 = vpop.permute.xlu0 %5793  ;;  %v5799_v55 = vpop.permute.xlu1 %5798 }
  0xf6   : > { %5146 = vmatprep.mubr.msk.bf16.mxu0 %vm1581_vm0, %v1801_v51  ;;  %v1804_v51 = vpack.c.bf16 %v1741_v44, %v1740_v43  ;;  %v5796_v58 = vunpack.i.h.bf16 %v5794_v52  ;;  %v5795_v59 = vunpack.i.l.bf16 %v5794_v52  ;;  %v5801_v3 = vunpack.i.h.bf16 %v5799_v55 }
  0xf7   : > { %v5800_v4 = vunpack.i.l.bf16 %v5799_v55 }
  0xf8   : > { %v1614_v6 = vsel %vm1581_vm0, %v525_v60, %v5795_v59  ;;  %v1615_v7 = vsel %vm1581_vm0, %v526_v61, %v5796_v58  ;;  %v531_v59 = vld [vmem:[%s6607_s24 + $0x130] sm:$0xff]  ;;  %v532_v60 = vld [vmem:[%s6607_s24 + $0x138] sm:$0xff] }
  0xf9   : > { %v5804_v5 = vpop.permute.xlu0 %5803  ;;  %v1679_v14 = vsel %vm1646_vm1, %v1614_v6, %v5800_v4  ;;  %v1680_v15 = vsel %vm1646_vm1, %v1615_v7, %v5801_v3  ;;  %v787_v61 = vld [vmem:[%s6607_s24 + $0x134] sm:$0xff] }
  0xfa   : > { %v5806_v11 = vunpack.i.h.bf16 %v5804_v5  ;;  %v5805_v12 = vunpack.i.l.bf16 %v5804_v5  ;;  %v1815_v7 = vpack.c.bf16 %v788_v62, %v787_v61  ;;  %v794_v61 = vld [vmem:[%s6607_s24 + $0x16c] sm:$0xff] }
  0xfc   : > { %v1744_v22 = vsel %vm1711_vm2, %v1679_v14, %v5805_v12  ;;  %v1745_v23 = vsel %vm1711_vm2, %v1680_v15, %v5806_v11 }
  0xfd   : > { %2152 = vmatmul.mubr.bf16.gmra.mxu0 %v1800_v10  ;;  %v5809_v10 = vpop.permute.xlu1 %5808  ;;  %v5814_v13 = vpop.permute.xlu0 %5813 }
  0xfe   : > { %5147 = vmatprep.mubr.msk.bf16.mxu0 %vm1581_vm0, %v1803_v9  ;;  %v1806_v9 = vpack.c.bf16 %v1743_v2, %v1742_v0  ;;  %v5811_v16 = vunpack.i.h.bf16 %v5809_v10  ;;  %v5810_v17 = vunpack.i.l.bf16 %v5809_v10  ;;  %v5816_v24 = vunpack.i.h.bf16 %v5814_v13 }
  0xff   : > { %v5815_v25 = vunpack.i.l.bf16 %v5814_v13 }
 0x100   : > { %v1616_v1 = vsel %vm1581_vm0, %v527_v18, %v5810_v17  ;;  %v1617_v27 = vsel %vm1581_vm0, %v528_v19, %v5811_v16  ;;  %v533_v17 = vld [vmem:[%s6607_s24 + $0x140] sm:$0xff]  ;;  %v534_v18 = vld [vmem:[%s6607_s24 + $0x148] sm:$0xff] }
 0x101   : > { %v5819_v26 = vpop.permute.xlu1 %5818  ;;  %v1681_v34 = vsel %vm1646_vm1, %v1616_v1, %v5815_v25  ;;  %v1682_v35 = vsel %vm1646_vm1, %v1617_v27, %v5816_v24  ;;  %v789_v19 = vld [vmem:[%s6607_s24 + $0x144] sm:$0xff] }
 0x102   : > { %v5821_v31 = vunpack.i.h.bf16 %v5819_v26  ;;  %v5820_v32 = vunpack.i.l.bf16 %v5819_v26  ;;  %v1817_v27 = vpack.c.bf16 %v790_v20, %v789_v19  ;;  %v796_v19 = vld [vmem:[%s6607_s24 + $0x17c] sm:$0xff] }
 0x104   : > { %v1746_v42 = vsel %vm1711_vm2, %v1681_v34, %v5820_v32  ;;  %v1747_v43 = vsel %vm1711_vm2, %v1682_v35, %v5821_v31 }
 0x105   : > { %2160 = vmatmul.mubr.bf16.gmra.mxu0 %v1802_v30  ;;  %v5824_v30 = vpop.permute.xlu0 %5823  ;;  %v5829_v33 = vpop.permute.xlu1 %5828 }
 0x106   : > { %5148 = vmatprep.mubr.msk.bf16.mxu0 %vm1581_vm0, %v1805_v29  ;;  %v1808_v29 = vpack.c.bf16 %v1745_v23, %v1744_v22  ;;  %v5826_v36 = vunpack.i.h.bf16 %v5824_v30  ;;  %v5825_v37 = vunpack.i.l.bf16 %v5824_v30  ;;  %v5831_v44 = vunpack.i.h.bf16 %v5829_v33 }
 0x107   : > { %v5830_v45 = vunpack.i.l.bf16 %v5829_v33 }
 0x108   : > { %v1618_v47 = vsel %vm1581_vm0, %v529_v38, %v5825_v37  ;;  %v1619_v48 = vsel %vm1581_vm0, %v530_v39, %v5826_v36  ;;  %v535_v37 = vld [vmem:[%s6607_s24 + $0x150] sm:$0xff]  ;;  %v536_v38 = vld [vmem:[%s6607_s24 + $0x158] sm:$0xff] }
 0x109   : > { %v5834_v46 = vpop.permute.xlu0 %5833  ;;  %v1683_v54 = vsel %vm1646_vm1, %v1618_v47, %v5830_v45  ;;  %v1684_v55 = vsel %vm1646_vm1, %v1619_v48, %v5831_v44  ;;  %v791_v39 = vld [vmem:[%s6607_s24 + $0x154] sm:$0xff] }
 0x10a   : > { %v5836_v52 = vunpack.i.h.bf16 %v5834_v46  ;;  %v5835_v53 = vunpack.i.l.bf16 %v5834_v46  ;;  %v1819_v48 = vpack.c.bf16 %v792_v40, %v791_v39  ;;  %v798_v39 = vld [vmem:[%s6607_s24 + $0x18c] sm:$0xff] }
 0x10c   : > { %v1748_v63 = vsel %vm1711_vm2, %v1683_v54, %v5835_v53  ;;  %v1749_v0 = vsel %vm1711_vm2, %v1684_v55, %v5836_v52 }
 0x10d   : > { %2168 = vmatmul.mubr.bf16.gmra.mxu0 %v1804_v51  ;;  %v5839_v51 = vpop.permute.xlu1 %5838  ;;  %v5844_v56 = vpop.permute.xlu0 %5843 }
 0x10e   : > { %5149 = vmatprep.mubr.msk.bf16.mxu0 %vm1581_vm0, %v1807_v50  ;;  %v1810_v50 = vpack.c.bf16 %v1747_v43, %v1746_v42  ;;  %v5841_v57 = vunpack.i.h.bf16 %v5839_v51  ;;  %v5840_v58 = vunpack.i.l.bf16 %v5839_v51  ;;  %v5846_v2 = vunpack.i.h.bf16 %v5844_v56 }
 0x10f   : > { %v5845_v3 = vunpack.i.l.bf16 %v5844_v56 }
 0x110   : > { %v1620_v5 = vsel %vm1581_vm0, %v531_v59, %v5840_v58  ;;  %v1621_v6 = vsel %vm1581_vm0, %v532_v60, %v5841_v57  ;;  %v537_v58 = vld [vmem:[%s6607_s24 + $0x160] sm:$0xff]  ;;  %v538_v59 = vld [vmem:[%s6607_s24 + $0x168] sm:$0xff] }
 0x111   : > { %v5849_v4 = vpop.permute.xlu1 %5848  ;;  %v1685_v12 = vsel %vm1646_vm1, %v1620_v5, %v5845_v3  ;;  %v1686_v13 = vsel %vm1646_vm1, %v1621_v6, %v5846_v2  ;;  %v793_v60 = vld [vmem:[%s6607_s24 + $0x164] sm:$0xff] }
 0x112   : > { %v5851_v10 = vunpack.i.h.bf16 %v5849_v4  ;;  %v5850_v11 = vunpack.i.l.bf16 %v5849_v4  ;;  %v1821_v6 = vpack.c.bf16 %v794_v61, %v793_v60  ;;  %v800_v60 = vld [vmem:[%s6607_s24 + $0x19c] sm:$0xff] }
 0x114   : > { %v1750_v21 = vsel %vm1711_vm2, %v1685_v12, %v5850_v11  ;;  %v1751_v22 = vsel %vm1711_vm2, %v1686_v13, %v5851_v10 }
 0x115   : > { %2176 = vmatmul.mubr.bf16.gmra.mxu0 %v1806_v9  ;;  %v5854_v9 = vpop.permute.xlu0 %5853  ;;  %v5859_v14 = vpop.permute.xlu1 %5858 }
 0x116   : > { %5150 = vmatprep.mubr.msk.bf16.mxu0 %vm1581_vm0, %v1809_v8  ;;  %v1812_v8 = vpack.c.bf16 %v1749_v0, %v1748_v63  ;;  %v5856_v15 = vunpack.i.h.bf16 %v5854_v9  ;;  %v5855_v16 = vunpack.i.l.bf16 %v5854_v9  ;;  %v5861_v23 = vunpack.i.h.bf16 %v5859_v14 }
 0x117   : > { %v5860_v24 = vunpack.i.l.bf16 %v5859_v14 }
 0x118   : > { %v1622_v26 = vsel %vm1581_vm0, %v533_v17, %v5855_v16  ;;  %v1623_v1 = vsel %vm1581_vm0, %v534_v18, %v5856_v15  ;;  %v539_v16 = vld [vmem:[%s6607_s24 + $0x170] sm:$0xff]  ;;  %v540_v17 = vld [vmem:[%s6607_s24 + $0x178] sm:$0xff] }
 0x119   : > { %v5864_v25 = vpop.permute.xlu0 %5863  ;;  %v1687_v32 = vsel %vm1646_vm1, %v1622_v26, %v5860_v24  ;;  %v1688_v33 = vsel %vm1646_vm1, %v1623_v1, %v5861_v23  ;;  %v795_v18 = vld [vmem:[%s6607_s24 + $0x174] sm:$0xff] }
 0x11a   : > { %v5866_v30 = vunpack.i.h.bf16 %v5864_v25  ;;  %v5865_v31 = vunpack.i.l.bf16 %v5864_v25  ;;  %v1823_v1 = vpack.c.bf16 %v796_v19, %v795_v18  ;;  %v545_v18 = vld [vmem:[%s6607_s24 + $0x1a0] sm:$0xff] }
 0x11c   : > { %v1752_v41 = vsel %vm1711_vm2, %v1687_v32, %v5865_v31  ;;  %v1753_v42 = vsel %vm1711_vm2, %v1688_v33, %v5866_v30 }
 0x11d   : > { %2184 = vmatmul.mubr.bf16.gmra.mxu0 %v1808_v29  ;;  %v5869_v29 = vpop.permute.xlu1 %5868  ;;  %v5874_v34 = vpop.permute.xlu0 %5873 }
 0x11e   : > { %5151 = vmatprep.mubr.msk.bf16.mxu0 %vm1581_vm0, %v1811_v28  ;;  %v1814_v28 = vpack.c.bf16 %v1751_v22, %v1750_v21  ;;  %v5871_v35 = vunpack.i.h.bf16 %v5869_v29  ;;  %v5870_v36 = vunpack.i.l.bf16 %v5869_v29  ;;  %v5876_v43 = vunpack.i.h.bf16 %v5874_v34 }
 0x11f   : > { %v5875_v44 = vunpack.i.l.bf16 %v5874_v34 }
 0x120   : > { %v1624_v46 = vsel %vm1581_vm0, %v535_v37, %v5870_v36  ;;  %v1625_v47 = vsel %vm1581_vm0, %v536_v38, %v5871_v35  ;;  %v541_v36 = vld [vmem:[%s6607_s24 + $0x180] sm:$0xff]  ;;  %v542_v37 = vld [vmem:[%s6607_s24 + $0x188] sm:$0xff] }
 0x121   : > { %v5879_v45 = vpop.permute.xlu1 %5878  ;;  %v1689_v53 = vsel %vm1646_vm1, %v1624_v46, %v5875_v44  ;;  %v1690_v54 = vsel %vm1646_vm1, %v1625_v47, %v5876_v43  ;;  %v797_v38 = vld [vmem:[%s6607_s24 + $0x184] sm:$0xff] }
 0x122   : > { %v5881_v51 = vunpack.i.h.bf16 %v5879_v45  ;;  %v5880_v52 = vunpack.i.l.bf16 %v5879_v45  ;;  %v1825_v47 = vpack.c.bf16 %v798_v39, %v797_v38 }
 0x124   : > { %v1754_v62 = vsel %vm1711_vm2, %v1689_v53, %v5880_v52  ;;  %v1755_v63 = vsel %vm1711_vm2, %v1690_v54, %v5881_v51 }
 0x125   : > { %2192 = vmatmul.mubr.bf16.gmra.mxu0 %v1810_v50  ;;  %v5884_v50 = vpop.permute.xlu0 %5883  ;;  %v5889_v55 = vpop.permute.xlu1 %5888 }
 0x126   : > { %5152 = vmatprep.mubr.msk.bf16.mxu0 %vm1581_vm0, %v1813_v49  ;;  %v1816_v49 = vpack.c.bf16 %v1753_v42, %v1752_v41  ;;  %v5886_v56 = vunpack.i.h.bf16 %v5884_v50  ;;  %v5885_v57 = vunpack.i.l.bf16 %v5884_v50  ;;  %v5891_v0 = vunpack.i.h.bf16 %v5889_v55 }
 0x127   : > { %v5890_v2 = vunpack.i.l.bf16 %v5889_v55 }
 0x128   : > { %v1626_v4 = vsel %vm1581_vm0, %v537_v58, %v5885_v57  ;;  %v1627_v5 = vsel %vm1581_vm0, %v538_v59, %v5886_v56  ;;  %v543_v57 = vld [vmem:[%s6607_s24 + $0x190] sm:$0xff]  ;;  %v544_v58 = vld [vmem:[%s6607_s24 + $0x198] sm:$0xff] }
 0x129   : > { %v5894_v3 = vpop.permute.xlu0 %5893  ;;  %v1691_v11 = vsel %vm1646_vm1, %v1626_v4, %v5890_v2  ;;  %v1692_v12 = vsel %vm1646_vm1, %v1627_v5, %v5891_v0  ;;  %v799_v59 = vld [vmem:[%s6607_s24 + $0x194] sm:$0xff] }
 0x12a   : > { %v5896_v9 = vunpack.i.h.bf16 %v5894_v3  ;;  %v5895_v10 = vunpack.i.l.bf16 %v5894_v3  ;;  %v1827_v5 = vpack.c.bf16 %v800_v60, %v799_v59 }
 0x12c   : > { %v1756_v20 = vsel %vm1711_vm2, %v1691_v11, %v5895_v10  ;;  %v1757_v21 = vsel %vm1711_vm2, %v1692_v12, %v5896_v9 }
 0x12d   : > { %2200 = vmatmul.mubr.bf16.gmra.mxu0 %v1812_v8  ;;  %v5899_v8 = vpop.permute.xlu1 %5898  ;;  %v5904_v13 = vpop.permute.xlu0 %5903 }
 0x12e   : > { %5153 = vmatprep.mubr.msk.bf16.mxu0 %vm1581_vm0, %v1815_v7  ;;  %v1818_v7 = vpack.c.bf16 %v1755_v63, %v1754_v62  ;;  %v5901_v14 = vunpack.i.h.bf16 %v5899_v8  ;;  %v5900_v15 = vunpack.i.l.bf16 %v5899_v8  ;;  %v5906_v22 = vunpack.i.h.bf16 %v5904_v13 }
 0x12f   : > { %v5905_v23 = vunpack.i.l.bf16 %v5904_v13 }
 0x130   : > { %v1628_v25 = vsel %vm1581_vm0, %v539_v16, %v5900_v15  ;;  %v1629_v26 = vsel %vm1581_vm0, %v540_v17, %v5901_v14 }
 0x131   : > { %v5909_v24 = vpop.permute.xlu1 %5908  ;;  %v1693_v31 = vsel %vm1646_vm1, %v1628_v25, %v5905_v23  ;;  %v1694_v32 = vsel %vm1646_vm1, %v1629_v26, %v5906_v22  ;;  %v802_v22 = vld [vmem:[%s6607_s24 + $0x1ac] sm:$0xff] }
 0x132   : > { %v5911_v29 = vunpack.i.h.bf16 %v5909_v24  ;;  %v5910_v30 = vunpack.i.l.bf16 %v5909_v24 }
 0x134   : > { %v1758_v40 = vsel %vm1711_vm2, %v1693_v31, %v5910_v30  ;;  %v1759_v41 = vsel %vm1711_vm2, %v1694_v32, %v5911_v29 }
 0x135   : > { %2208 = vmatmul.mubr.bf16.gmra.mxu0 %v1814_v28  ;;  %v5914_v28 = vpop.permute.xlu0 %5913  ;;  %v5919_v33 = vpop.permute.xlu1 %5918 }
 0x136   : > { %5154 = vmatprep.mubr.msk.bf16.mxu0 %vm1581_vm0, %v1817_v27  ;;  %v1820_v27 = vpack.c.bf16 %v1757_v21, %v1756_v20  ;;  %v5916_v34 = vunpack.i.h.bf16 %v5914_v28  ;;  %v5915_v35 = vunpack.i.l.bf16 %v5914_v28  ;;  %v5921_v42 = vunpack.i.h.bf16 %v5919_v33  ;;  %v546_v20 = vld [vmem:[%s6607_s24 + $0x1a8] sm:$0xff] }
 0x137   : > { %v5920_v43 = vunpack.i.l.bf16 %v5919_v33  ;;  %v801_v21 = vld [vmem:[%s6607_s24 + $0x1a4] sm:$0xff] }
 0x138   : > { %v1630_v45 = vsel %vm1581_vm0, %v541_v36, %v5915_v35  ;;  %v1631_v46 = vsel %vm1581_vm0, %v542_v37, %v5916_v34  ;;  %v1829_v31 = vpack.c.bf16 %v802_v22, %v801_v21 }
 0x139   : > { %v5924_v44 = vpop.permute.xlu0 %5923  ;;  %v1695_v52 = vsel %vm1646_vm1, %v1630_v45, %v5920_v43  ;;  %v1696_v53 = vsel %vm1646_vm1, %v1631_v46, %v5921_v42  ;;  %v548_v46 = vld [vmem:[%s6607_s24 + $0x1b8] sm:$0xff] }
 0x13a   : > { %v5926_v50 = vunpack.i.h.bf16 %v5924_v44  ;;  %v5925_v51 = vunpack.i.l.bf16 %v5924_v44  ;;  %v547_v44 = vld [vmem:[%s6607_s24 + $0x1b0] sm:$0xff] }
 0x13c   : > { %v1760_v61 = vsel %vm1711_vm2, %v1695_v52, %v5925_v51  ;;  %v1761_v62 = vsel %vm1711_vm2, %v1696_v53, %v5926_v50 }
 0x13d   : > { %2216 = vmatmul.mubr.bf16.gmra.mxu0 %v1816_v49  ;;  %v5929_v49 = vpop.permute.xlu1 %5928  ;;  %v5934_v54 = vpop.permute.xlu0 %5933 }
 0x13e   : > { %5155 = vmatprep.mubr.msk.bf16.mxu0 %vm1581_vm0, %v1819_v48  ;;  %v1822_v48 = vpack.c.bf16 %v1759_v41, %v1758_v40  ;;  %v5931_v55 = vunpack.i.h.bf16 %v5929_v49  ;;  %v5930_v56 = vunpack.i.l.bf16 %v5929_v49  ;;  %v5936_v63 = vunpack.i.h.bf16 %v5934_v54 }
 0x13f   : > { %v5935_v0 = vunpack.i.l.bf16 %v5934_v54 }
 0x140   : > { %v1632_v3 = vsel %vm1581_vm0, %v543_v57, %v5930_v56  ;;  %v1633_v4 = vsel %vm1581_vm0, %v544_v58, %v5931_v55 }
 0x141   : > { %v5939_v2 = vpop.permute.xlu1 %5938  ;;  %v5944_v8 = vpop.permute.xlu0 %5943  ;;  %v1697_v11 = vsel %vm1646_vm1, %v1632_v3, %v5935_v0  ;;  %v1698_v12 = vsel %vm1646_vm1, %v1633_v4, %v5936_v63 }
 0x142   : > { %v5941_v9 = vunpack.i.h.bf16 %v5939_v2  ;;  %v5940_v10 = vunpack.i.l.bf16 %v5939_v2  ;;  %v5946_v16 = vunpack.i.h.bf16 %v5944_v8  ;;  %v5945_v17 = vunpack.i.l.bf16 %v5944_v8 }
 0x144   : > { %v1762_v23 = vsel %vm1711_vm2, %v1697_v11, %v5940_v10  ;;  %v1763_v24 = vsel %vm1711_vm2, %v1698_v12, %v5941_v9  ;;  %v1634_v28 = vsel %vm1581_vm0, %v545_v18, %v5945_v17  ;;  %v1635_v29 = vsel %vm1581_vm0, %v546_v20, %v5946_v16  ;;  %v805_v12 = vld [vmem:[%s6607_s24 + $0x1c4] sm:$0xff] }
 0x145   : > { %2224 = vmatmul.mubr.bf16.gmra.mxu0 %v1818_v7  ;;  %v1824_v7 = vpack.c.bf16 %v1761_v62, %v1760_v61  ;;  %v5949_v14 = vpop.permute.xlu1 %5948  ;;  %v1826_v33 = vpack.c.bf16 %v1763_v24, %v1762_v23  ;;  %v549_v16 = vld [vmem:[%s6607_s24 + $0x1c0] sm:$0xff]  ;;  %v550_v17 = vld [vmem:[%s6607_s24 + $0x1c8] sm:$0xff] }
 0x146   : > { %5156 = vmatprep.mubr.msk.bf16.mxu0 %vm1581_vm0, %v1821_v6  ;;  %v7213_v6 = vld [vmem:[%s8278_s2] ss:$0 sm:$0xff]  ;;  %v5951_v26 = vunpack.i.h.bf16 %v5949_v14 }
 0x148   : > { %v1700_v38 = vsel %vm1646_vm1, %v1635_v29, %v5951_v26 }
 0x149   : > { %v5959_v34 = vpop.permute.xlu1 %5958 }
 0x14a   : > { %v5961_v42 = vunpack.i.h.bf16 %v5959_v34  ;;  %v5960_v43 = vunpack.i.l.bf16 %v5959_v34 }
 0x14c   : > { %v1636_v55 = vsel %vm1581_vm0, %v547_v44, %v5960_v43  ;;  %v1637_v56 = vsel %vm1581_vm0, %v548_v46, %v5961_v42 }
 0x14d   : > { %2232 = vmatmul.mubr.bf16.gmra.mxu0 %v1820_v27  ;;  %v5954_v27 = vpop.permute.xlu0 %5953  ;;  %v5969_v54 = vpop.permute.xlu1 %5968 }
 0x14e   : > { %5157 = vmatprep.mubr.msk.bf16.mxu0 %vm1581_vm0, %v1823_v1  ;;  %v5950_v1 = vunpack.i.l.bf16 %v5949_v14  ;;  %v5956_v35 = vunpack.i.h.bf16 %v5954_v27  ;;  %v5955_v36 = vunpack.i.l.bf16 %v5954_v27  ;;  %v5971_v0 = vunpack.i.h.bf16 %v5969_v54  ;;  %v7259_v27 = vld [vmem:[%s8279_s3] ss:$0 sm:$0xff] }
 0x14f   : > { %v5970_v2 = vunpack.i.l.bf16 %v5969_v54 }
 0x150   : > { %v1699_v37 = vsel %vm1646_vm1, %v1634_v28, %v5950_v1  ;;  %v1765_v50 = vsel %vm1711_vm2, %v1700_v38, %v5956_v35 }
 0x151   : > { %v5964_v40 = vpop.permute.xlu0 %5963  ;;  %v1764_v49 = vsel %vm1711_vm2, %v1699_v37, %v5955_v36 }
 0x152   : > { %v5966_v52 = vunpack.i.h.bf16 %v5964_v40  ;;  %v5965_v53 = vunpack.i.l.bf16 %v5964_v40  ;;  %v1828_v62 = vpack.c.bf16 %v1765_v50, %v1764_v49  ;;  %v551_v50 = vld [vmem:[%s6607_s24 + $0x1d0] sm:$0xff] }
 0x154   : > { %v1701_v3 = vsel %vm1646_vm1, %v1636_v55, %v5965_v53  ;;  %v1702_v4 = vsel %vm1646_vm1, %v1637_v56, %v5966_v52  ;;  %v808_v52 = vld [vmem:[%s6607_s24 + $0x1dc] sm:$0xff] }
 0x155   : > { %2240 = vmatmul.mubr.bf16.gmra.mxu0 %v1822_v48  ;;  %v804_v48 = vld [vmem:[%s6607_s24 + $0x1bc] sm:$0xff]  ;;  %v5974_v63 = vpop.permute.xlu0 %5973  ;;  %v1767_v20 = vsel %vm1711_vm2, %v1702_v4, %v5971_v0 }
 0x156   : > { %5158 = vmatprep.mubr.msk.bf16.mxu0 %vm1581_vm0, %v1825_v47  ;;  %v803_v47 = vld [vmem:[%s6607_s24 + $0x1b4] sm:$0xff]  ;;  %v5976_v10 = vunpack.i.h.bf16 %v5974_v63  ;;  %v5975_v11 = vunpack.i.l.bf16 %v5974_v63 }
 0x157   : > { %v1831_v58 = vpack.c.bf16 %v804_v48, %v803_v47  ;;  %v552_v55 = vld [vmem:[%s6607_s24 + $0x1d8] sm:$0xff] }
 0x158   : > { %v1638_v28 = vsel %vm1581_vm0, %v549_v16, %v5975_v11  ;;  %v1639_v29 = vsel %vm1581_vm0, %v550_v17, %v5976_v10 }
 0x15d   : > { %v2057_v13 = vpop.f32.mrf.mxu0  ;;  %2248 = vmatmul.mubr.bf16.gmra.mxu0 %v1824_v7  ;;  %v5979_v7 = vpop.permute.xlu1 %5978 }
 0x15e   : > { %v2058_v15 = vadd.f32 %v7213_v6, %v2057_v13  ;;  %5159 = vmatprep.mubr.msk.bf16.mxu0 %vm1581_vm0, %v1827_v5  ;;  %v806_v13 = vld [vmem:[%s6607_s24 + $0x1cc] sm:$0xff]  ;;  %v5981_v23 = vunpack.i.h.bf16 %v5979_v7  ;;  %v5980_v24 = vunpack.i.l.bf16 %v5979_v7 }
 0x15f   : > { %v2059_v19 = vpop.f32.mrf.mxu0  ;;  %v1833_v26 = vpack.c.bf16 %v806_v13, %v805_v12 }
 0x160   : > { %2313 = vst.msk [vmem:[#allocation2] sm:$0xff] %vm2312_vm3, %v2058_v15  ;;  %v1766_v19 = vsel %vm1711_vm2, %v1701_v3, %v5970_v2  ;;  %v1703_v40 = vsel %vm1646_vm1, %v1638_v28, %v5980_v24  ;;  %v809_v28 = vld [vmem:[%s6607_s24 + $0x1e4] sm:$0xff] }
 0x161   : > { %v2060_v25 = vpop.f32.mrf.mxu0  ;;  %v1830_v35 = vpack.c.bf16 %v1767_v20, %v1766_v19  ;;  %v5989_v36 = vpop.permute.xlu1 %5988 }
 0x162   : > { %v2061_v30 = vadd.f32 %v7213_v6, %v2060_v25  ;;  %v5984_v25 = vpop.permute.xlu0 %5983  ;;  %v5990_v43 = vunpack.i.l.bf16 %v5989_v36  ;;  %v5991_v49 = vunpack.i.h.bf16 %v5989_v36 }
 0x163   : > { %v2062_v32 = vpop.f32.mrf.mxu0  ;;  %v5986_v38 = vunpack.i.h.bf16 %v5984_v25 }
 0x164   : > { %2314 = vst.msk [vmem:[#allocation2 + $0x8] sm:$0xff] %vm2312_vm3, %v2061_v30 }
 0x165   : > { %v2065_v39 = vpop.f32.mrf.mxu0  ;;  %2256 = vmatmul.mubr.bf16.gmra.mxu0 %v1826_v33  ;;  %v5999_v2 = vpop.permute.xlu1 %5998 }
 0x166   : > { %v2066_v41 = vadd.f32 %v7213_v6, %v2065_v39  ;;  %5160 = vmatprep.mubr.msk.bf16.mxu0 %vm1581_vm0, %v1829_v31  ;;  %v5985_v39 = vunpack.i.l.bf16 %v5984_v25  ;;  %v5994_v44 = vpop.permute.xlu0 %5993  ;;  %v6001_v16 = vunpack.i.h.bf16 %v5999_v2  ;;  %v6000_v17 = vunpack.i.l.bf16 %v5999_v2 }
 0x167   : > { %v2067_v45 = vpop.f32.mrf.mxu0  ;;  %v5996_v63 = vunpack.i.h.bf16 %v5994_v44  ;;  %v5995_v0 = vunpack.i.l.bf16 %v5994_v44 }
 0x168   : > { %2315 = vst.msk [vmem:[#allocation2 + $0x10] sm:$0xff] %vm2312_vm3, %v2066_v41  ;;  %v1704_v41 = vsel %vm1646_vm1, %v1639_v29, %v5981_v23  ;;  %v7270_v45 = vld [vmem:[%s8280_s4] ss:$0 sm:$0xff]  ;;  %v810_v29 = vld [vmem:[%s6607_s24 + $0x1ec] sm:$0xff] }
 0x169   : > { %v2068_v51 = vpop.f32.mrf.mxu0 }
 0x16a   : > { %v2069_v57 = vadd.f32 %v7213_v6, %v2068_v51  ;;  %v807_v51 = vld [vmem:[%s6607_s24 + $0x1d4] sm:$0xff] }
 0x16b   : > { %v2378_v59 = vld [vmem:[#allocation2] ss:$2 sm:$0xff]  ;;  %v2442_v60 = vld [vmem:[#allocation2 + $0x1] ss:$2 sm:$0xff]  ;;  %v2070_v61 = vpop.f32.mrf.mxu0  ;;  %v1835_v3 = vpack.c.bf16 %v808_v52, %v807_v51 }
 0x16c   : > { %2316 = vst.msk [vmem:[#allocation2 + $0x18] sm:$0xff] %vm2312_vm3, %v2069_v57  ;;  %v2505_v8 = vmax.f32 %v2378_v59, %v2442_v60  ;;  %v1768_v57 = vsel %vm1711_vm2, %v1703_v40, %v5985_v39  ;;  %v1640_v61 = vsel %vm1581_vm0, %v551_v50, %v5990_v43  ;;  %v1837_v43 = vpack.c.bf16 %v810_v29, %v809_v28  ;;  %v6314_v28 = vld [vmem:[%s8281_s5 + $0x70] sm:$0xff]  }
 0x16d   : > { %v2073_v5 = vpop.f32.mrf.mxu0  ;;  %2264 = vmatmul.mubr.bf16.gmra.mxu0 %v1828_v62 }
 0x16e   : > { %v2074_v9 = vadd.f32 %v7213_v6, %v2073_v5  ;;  %5161 = vmatprep.mubr.msk.bf16.mxu0 %vm1581_vm0, %v1831_v58  ;;  %v1769_v58 = vsel %vm1711_vm2, %v1704_v41, %v5986_v38  ;;  %v1641_v5 = vsel %vm1581_vm0, %v552_v55, %v5991_v49 }
 0x16f   : > { %v2538_v14 = vld [vmem:[#allocation2 + $0x2] ss:$2 sm:$0xff]  ;;  %v2075_v15 = vpop.f32.mrf.mxu0  ;;  %v2634_v21 = vld [vmem:[#allocation2 + $0x3] ss:$2 sm:$0xff]  ;;  %v1832_v12 = vpack.c.bf16 %v1769_v58, %v1768_v57  ;;  %v1706_v19 = vsel %vm1646_vm1, %v1641_v5, %v5996_v63  ;;  %v811_v5 = vld [vmem:[%s6607_s24 + $0x1f4] sm:$0xff] }
 0x170   : > { %v2601_v18 = vmax.f32 %v2505_v8, %v2538_v14  ;;  %2317 = vst.msk [vmem:[#allocation2 + $0x20] sm:$0xff] %vm2312_vm3, %v2074_v9  ;;  %v2730_v31 = vld [vmem:[#allocation2 + $0x4] ss:$2 sm:$0xff]  ;;  %v6004_v14 = vpop.permute.xlu0 %6003 }
 0x171   : > { %v2076_v22 = vpop.f32.mrf.mxu0 }
 0x172   : > { %v2697_v1 = vmax.f32 %v2601_v18, %v2634_v21  ;;  %v2077_v30 = vadd.f32 %v7213_v6, %v2076_v22  ;;  %v1705_v18 = vsel %vm1646_vm1, %v1640_v61, %v5995_v0  ;;  %v6005_v21 = vunpack.i.l.bf16 %v6004_v14  ;;  %v6009_v22 = vpop.permute.xlu1 %6008 }
 0x173   : > { %v2380_v32 = vld [vmem:[#allocation2 + $0x10] ss:$2 sm:$0xff]  ;;  %v2444_v33 = vld [vmem:[#allocation2 + $0x11] ss:$2 sm:$0xff]  ;;  %v2078_v34 = vpop.f32.mrf.mxu0  ;;  %v6011_v40 = vunpack.i.h.bf16 %v6009_v22  ;;  %v6010_v41 = vunpack.i.l.bf16 %v6009_v22 }
 0x174   : > { %v2793_v37 = vmax.f32 %v2697_v1, %v2730_v31  ;;  %2318 = vst.msk [vmem:[#allocation2 + $0x28] sm:$0xff] %vm2312_vm3, %v2077_v30  ;;  %v2506_v47 = vmax.f32 %v2380_v32, %v2444_v33  ;;  %v553_v1 = vld [vmem:[%s6607_s24 + $0x1e0] sm:$0xff]  ;;  %v554_v32 = vld [vmem:[%s6607_s24 + $0x1e8] sm:$0xff]  ;;  %v1770_v34 = vsel %vm1711_vm2, %v1705_v18, %v6000_v17 }
 0x175   : > { %v2081_v42 = vpop.f32.mrf.mxu0  ;;  %2272 = vmatmul.mubr.bf16.gmra.mxu0 %v1830_v35  ;;  %v1771_v35 = vsel %vm1711_vm2, %v1706_v19, %v6001_v16  ;;  %v1642_v38 = vsel %vm1581_vm0, %v553_v1, %v6005_v21  ;;  %v6313_v16 = vld [vmem:[%s8281_s5 + $0x38] sm:$0xff]  }
 0x176   : > { %v2832_v46 = vmul.f32 %v7259_v27, %v2793_v37  ;;  %v2082_v48 = vadd.f32 %v7213_v6, %v2081_v42  ;;  %5162 = vmatprep.mubr.msk.bf16.mxu0 %vm1581_vm0, %v1833_v26  ;;  %v6006_v26 = vunpack.i.h.bf16 %v6004_v14  ;;  %v6014_v42 = vpop.permute.xlu0 %6013  ;;  %v1834_v52 = vpack.c.bf16 %v1771_v35, %v1770_v34 }
 0x177   : > { %v2540_v53 = vld [vmem:[#allocation2 + $0x12] ss:$2 sm:$0xff]  ;;  %v2083_v54 = vpop.f32.mrf.mxu0  ;;  %v2636_v60 = vld [vmem:[#allocation2 + $0x13] ss:$2 sm:$0xff]  ;;  %v6015_v57 = vunpack.i.l.bf16 %v6014_v42  ;;  %v1707_v58 = vsel %vm1646_vm1, %v1642_v38, %v6010_v41 }
 0x178   : > { %v2602_v56 = vmax.f32 %v2506_v47, %v2540_v53  ;;  %2319 = vst.msk [vmem:[#allocation2 + $0x30] sm:$0xff] %vm2312_vm3, %v2082_v48  ;;  %v2871_v59 = vadd.f32 %v7270_v45, %v2832_v46  ;;  %v2732_v9 = vld [vmem:[#allocation2 + $0x14] ss:$2 sm:$0xff]  ;;  %v1643_v46 = vsel %vm1581_vm0, %v554_v32, %v6006_v26  ;;  %v6019_v54 = vpop.permute.xlu1 %6018 }
 0x179   : > { %v2084_v62 = vpop.f32.mrf.mxu0  ;;  %v6020_v61 = vunpack.i.l.bf16 %v6019_v54 }
 0x17a   : > { %v2698_v4 = vmax.f32 %v2602_v56, %v2636_v60  ;;  %v2085_v7 = vadd.f32 %v7213_v6, %v2084_v62  ;;  %v2903_v8 = vmax.f32 %v2871_v59, 0.0  ;;  %v6016_v56 = vunpack.i.h.bf16 %v6014_v42  ;;  %v555_v62 = vld [vmem:[%s6607_s24 + $0x1f0] sm:$0xff] }
 0x17b   : > { %v2382_v10 = vld [vmem:[#allocation2 + $0x20] ss:$2 sm:$0xff]  ;;  %v2446_v11 = vld [vmem:[#allocation2 + $0x21] ss:$2 sm:$0xff]  ;;  %v2086_v13 = vpop.f32.mrf.mxu0  ;;  %v1708_v59 = vsel %vm1646_vm1, %v1643_v46, %v6011_v40  ;;  %v1644_v18 = vsel %vm1581_vm0, %v555_v62, %v6020_v61 }
 0x17c   : > { %v2794_v15 = vmax.f32 %v2698_v4, %v2732_v9  ;;  %2320 = vst.msk [vmem:[#allocation2 + $0x38] sm:$0xff] %vm2312_vm3, %v2085_v7  ;;  %2935 = vst.msk [vmem:[#allocation3] sm:$0xff] %vm2312_vm3, %v2903_v8  ;;  %v2507_v24 = vmax.f32 %v2382_v10, %v2446_v11  ;;  %v6024_v4 = vpop.permute.xlu0 %6023  ;;  %v812_v7 = vld [vmem:[%s6607_s24 + $0x1fc] sm:$0xf]  ;;  %v556_v11 = vld [vmem:[%s6607_s24 + $0x1f8] sm:$0xf]  ;;  %v1772_v13 = vsel %vm1711_vm2, %v1707_v58, %v6015_v57  ;;  %v6029_v22 = vpop.permute.xlu1 %6028 }
 0x17d   : > { %v2089_v20 = vpop.f32.mrf.mxu0  ;;  %2280 = vmatmul.mubr.bf16.gmra.mxu0 %v1832_v12  ;;  %v6312_v8 = vld [vmem:[%s8281_s5 + $0x78] sm:$0xff]   ;;  %v1773_v14 = vsel %vm1711_vm2, %v1708_v59, %v6016_v56  ;;  %v6025_v21 = vunpack.i.l.bf16 %v6024_v4  ;;  %v6031_v35 = vunpack.i.h.bf16 %v6029_v22  ;;  %v6318_v58 = vld [vmem:[%s8281_s5 + $0x60] sm:$0xff]   ;;  %s5256_s24 = sshll.u32 %s6567_s22, 4 }
 0x17e   : > { %v2833_v23 = vmul.f32 %v7259_v27, %v2794_v15  ;;  %v2090_v25 = vadd.f32 %v7213_v6, %v2089_v20  ;;  %5163 = vmatprep.mubr.msk.bf16.mxu0 %vm1581_vm0, %v1835_v3  ;;  %v6021_v3 = vunpack.i.h.bf16 %v6019_v54  ;;  %5260 = vmatprep.subr.bf16.mxu1 %v6312_v8  ;;  %v6026_v20 = vunpack.i.h.bf16 %v6024_v4  ;;  %v6320_v8 = vld [vmem:[%s8281_s5 + $0x58] sm:$0xff]   ;;  %s5060_s25 = scalar_lea.hbm %s8291_s15, %s5256_s24 }
 0x17f   : > { %v2542_v30 = vld [vmem:[#allocation2 + $0x22] ss:$2 sm:$0xff]  ;;  %v2091_v31 = vpop.f32.mrf.mxu0  ;;  %v2638_v37 = vld [vmem:[#allocation2 + $0x23] ss:$2 sm:$0xff]  ;;  %5261 = vmatpush3.bf16.msra.mxu1 %v6313_v16  ;;  %v1836_v32 = vpack.c.bf16 %v1773_v14, %v1772_v13  ;;  %v1709_v38 = vsel %vm1646_vm1, %v1644_v18, %v6025_v21  ;;  %v6321_v13 = vld [vmem:[%s8281_s5 + $0x18] sm:$0xff]  }
 0x180   : > { %v2603_v33 = vmax.f32 %v2507_v24, %v2542_v30  ;;  %2321 = vst.msk [vmem:[#allocation2 + $0x40] sm:$0xff] %vm2312_vm3, %v2090_v25  ;;  %v2872_v36 = vadd.f32 %v7270_v45, %v2833_v23  ;;  %v2734_v49 = vld [vmem:[#allocation2 + $0x24] ss:$2 sm:$0xff]  ;;  %v1839_v23 = vpack.c.bf16 %v812_v7, %v811_v5  ;;  %v1645_v25 = vsel %vm1581_vm0, %v556_v11, %v6021_v3 }
 0x181   : > { %v2092_v39 = vpop.f32.mrf.mxu0  ;;  %5262 = vmatprep.subr.bf16.mxu1 %v6314_v28  ;;  %v6319_v3 = vld [vmem:[%s8281_s5 + $0x20] sm:$0xff]   ;;  %v6322_v21 = vld [vmem:[%s8281_s5 + $0x50] sm:$0xff]  }
 0x182   : > { %v2699_v44 = vmax.f32 %v2603_v33, %v2638_v37  ;;  %v2093_v47 = vadd.f32 %v7213_v6, %v2092_v39  ;;  %v2904_v48 = vmax.f32 %v2872_v36, 0.0  ;;  %v6030_v36 = vunpack.i.l.bf16 %v6029_v22  ;;  %v6315_v37 = vld [vmem:[%s8281_s5 + $0x30] sm:$0xff]  }
 0x183   : > { %v2384_v50 = vld [vmem:[#allocation2 + $0x30] ss:$2 sm:$0xff]  ;;  %v2448_v51 = vld [vmem:[#allocation2 + $0x31] ss:$2 sm:$0xff]  ;;  %v2094_v53 = vpop.f32.mrf.mxu0  ;;  %v1710_v39 = vsel %vm1646_vm1, %v1645_v25, %v6026_v20  ;;  %5263 = vmatpush3.bf16.msra.mxu1 %v6315_v37 }
 0x184   : > { %v2795_v55 = vmax.f32 %v2699_v44, %v2734_v49  ;;  %2322 = vst.msk [vmem:[#allocation2 + $0x48] sm:$0xff] %vm2312_vm3, %v2093_v47  ;;  %2936 = vst.msk [vmem:[#allocation3 + $0x8] sm:$0xff] %vm2312_vm3, %v2904_v48  ;;  %v2508_v0 = vmax.f32 %v2384_v50, %v2448_v51  ;;  %v6316_v44 = vld [vmem:[%s8281_s5 + $0x68] sm:$0xff]   ;;  %v1774_v49 = vsel %vm1711_vm2, %v1709_v38, %v6030_v36  ;;  %v6323_v28 = vld [vmem:[%s8281_s5 + $0x10] sm:$0xff]  }
 0x185   : > { %v2097_v60 = vpop.f32.mrf.mxu0  ;;  %2288 = vmatmul.mubr.bf16.gmra.mxu0 %v1834_v52  ;;  %v1775_v50 = vsel %vm1711_vm2, %v1710_v39, %v6031_v35  ;;  %5264 = vmatprep.subr.bf16.mxu1 %v6316_v44  ;;  %v6317_v52 = vld [vmem:[%s8281_s5 + $0x28] sm:$0xff]  }
 0x186   : > { %v2834_v63 = vmul.f32 %v7259_v27, %v2795_v55  ;;  %v2098_v2 = vadd.f32 %v7213_v6, %v2097_v60  ;;  %5164 = vmatprep.mubr.msk.bf16.mxu0 %vm1581_vm0, %v1837_v43  ;;  %v1838_v62 = vpack.c.bf16 %v1775_v50, %v1774_v49  ;;  %v6325_v38 = vld [vmem:[%s8281_s5 + $0x8] sm:$0xff]  }
 0x187   : > { %v2544_v9 = vld [vmem:[#allocation2 + $0x32] ss:$2 sm:$0xff]  ;;  %v2099_v10 = vpop.f32.mrf.mxu0  ;;  %v2640_v17 = vld [vmem:[#allocation2 + $0x33] ss:$2 sm:$0xff]  ;;  %5265 = vmatpush3.bf16.msra.mxu1 %v6317_v52 }
 0x188   : > { %v2604_v12 = vmax.f32 %v2508_v0, %v2544_v9  ;;  %2323 = vst.msk [vmem:[#allocation2 + $0x50] sm:$0xff] %vm2312_vm3, %v2098_v2  ;;  %v2873_v15 = vadd.f32 %v7270_v45, %v2834_v63  ;;  %v2736_v29 = vld [vmem:[#allocation2 + $0x34] ss:$2 sm:$0xff]  ;;  %5266 = vmatprep.subr.bf16.mxu1 %v6318_v58 }
 0x189   : > { %v2100_v19 = vpop.f32.mrf.mxu0 }
 0x18a   : > { %v2700_v24 = vmax.f32 %v2604_v12, %v2640_v17  ;;  %v2101_v26 = vadd.f32 %v7213_v6, %v2100_v19  ;;  %v2905_v1 = vmax.f32 %v2873_v15, 0.0 }
 0x18b   : > { %v2386_v30 = vld [vmem:[#allocation2 + $0x40] ss:$2 sm:$0xff]  ;;  %v2450_v31 = vld [vmem:[#allocation2 + $0x41] ss:$2 sm:$0xff]  ;;  %v2102_v33 = vpop.f32.mrf.mxu0  ;;  %5267 = vmatpush3.bf16.msra.mxu1 %v6319_v3 }
 0x18c   : > { %v2796_v34 = vmax.f32 %v2700_v24, %v2736_v29  ;;  %2324 = vst.msk [vmem:[#allocation2 + $0x58] sm:$0xff] %vm2312_vm3, %v2101_v26  ;;  %2937 = vst.msk [vmem:[#allocation3 + $0x10] sm:$0xff] %vm2312_vm3, %v2905_v1  ;;  %v2509_v42 = vmax.f32 %v2386_v30, %v2450_v31  ;;  %5268 = vmatprep.subr.bf16.mxu1 %v6320_v8  ;;  %v2999_v19 = vld [vmem:[#allocation3 + $0x1] ss:$2 sm:$0xff] }
 0x18d   : > { %v2105_v40 = vpop.f32.mrf.mxu0  ;;  %2296 = vmatmul.mubr.bf16.gmra.mxu0 %v1836_v32  ;;  %v6324_v33 = vld [vmem:[%s8281_s5 + $0x48] sm:$0xff]  }
 0x18e   : > { %v2835_v41 = vmul.f32 %v7259_v27, %v2796_v34  ;;  %v2106_v43 = vadd.f32 %v7213_v6, %v2105_v40  ;;  %5165 = vmatprep.mubr.msk.bf16.mxu0 %vm1581_vm0, %v1839_v23 }
 0x18f   : > { %v2546_v46 = vld [vmem:[#allocation2 + $0x42] ss:$2 sm:$0xff]  ;;  %v2107_v47 = vpop.f32.mrf.mxu0  ;;  %v2642_v53 = vld [vmem:[#allocation2 + $0x43] ss:$2 sm:$0xff]  ;;  %5269 = vmatpush3.bf16.msra.mxu1 %v6321_v13 }
 0x190   : > { %v2605_v48 = vmax.f32 %v2509_v42, %v2546_v46  ;;  %2325 = vst.msk [vmem:[#allocation2 + $0x60] sm:$0xff] %vm2312_vm3, %v2106_v43  ;;  %v2874_v51 = vadd.f32 %v7270_v45, %v2835_v41  ;;  %v2738_v59 = vld [vmem:[#allocation2 + $0x44] ss:$2 sm:$0xff]  ;;  %5270 = vmatprep.subr.bf16.mxu1 %v6322_v21 }
 0x191   : > { %v2108_v54 = vpop.f32.mrf.mxu0  ;;  %v6326_v47 = vld [vmem:[%s8281_s5 + $0x40] sm:$0xff]  }
 0x192   : > { %v2701_v55 = vmax.f32 %v2605_v48, %v2642_v53  ;;  %v2109_v56 = vadd.f32 %v7213_v6, %v2108_v54  ;;  %v2906_v57 = vmax.f32 %v2874_v51, 0.0 }
 0x193   : > { %v2388_v60 = vld [vmem:[#allocation2 + $0x50] ss:$2 sm:$0xff]  ;;  %v2452_v61 = vld [vmem:[#allocation2 + $0x51] ss:$2 sm:$0xff]  ;;  %v2110_v63 = vpop.f32.mrf.mxu0  ;;  %5271 = vmatpush3.bf16.msra.mxu1 %v6323_v28 }
 0x194   : > { %v2797_v0 = vmax.f32 %v2701_v55, %v2738_v59  ;;  %2326 = vst.msk [vmem:[#allocation2 + $0x68] sm:$0xff] %vm2312_vm3, %v2109_v56  ;;  %2938 = vst.msk [vmem:[#allocation3 + $0x18] sm:$0xff] %vm2312_vm3, %v2906_v57  ;;  %v2510_v5 = vmax.f32 %v2388_v60, %v2452_v61  ;;  %5272 = vmatprep.subr.bf16.mxu1 %v6324_v33  ;;  %v3031_v46 = vld [vmem:[#allocation3 + $0x2] ss:$2 sm:$0xff]  ;;  %v3063_v54 = vld [vmem:[#allocation3 + $0x3] ss:$2 sm:$0xff] }
 0x195   : > { %v2113_v2 = vpop.f32.mrf.mxu0  ;;  %2304 = vmatmul.mubr.bf16.gmra.mxu0 %v1838_v62  ;;  %v6327_v59 = vld [vmem:[%s8281_s5] sm:$0xff]  }
 0x196   : > { %v2836_v4 = vmul.f32 %v7259_v27, %v2797_v0  ;;  %v2114_v7 = vadd.f32 %v7213_v6, %v2113_v2  ;;  %v3095_v2 = vld [vmem:[#allocation3 + $0x4] ss:$2 sm:$0xff]  ;;  %v3127_v13 = vld [vmem:[#allocation3 + $0x5] ss:$2 sm:$0xff] }
 0x197   : > { %v2548_v9 = vld [vmem:[#allocation2 + $0x52] ss:$2 sm:$0xff]  ;;  %v2115_v10 = vpop.f32.mrf.mxu0  ;;  %v2644_v14 = vld [vmem:[#allocation2 + $0x53] ss:$2 sm:$0xff]  ;;  %5273 = vmatpush3.bf16.msra.mxu1 %v6325_v38 }
 0x198   : > { %v2606_v11 = vmax.f32 %v2510_v5, %v2548_v9  ;;  %2327 = vst.msk [vmem:[#allocation2 + $0x70] sm:$0xff] %vm2312_vm3, %v2114_v7  ;;  %v2875_v12 = vadd.f32 %v7270_v45, %v2836_v4  ;;  %v2740_v17 = vld [vmem:[#allocation2 + $0x54] ss:$2 sm:$0xff]  ;;  %5274 = vmatprep.subr.bf16.mxu1 %v6326_v47 }
 0x199   : > { %v2116_v15 = vpop.f32.mrf.mxu0 }
 0x19a   : > { %v2702_v16 = vmax.f32 %v2606_v11, %v2644_v14  ;;  %v2117_v18 = vadd.f32 %v7213_v6, %v2116_v15  ;;  %v2907_v20 = vmax.f32 %v2875_v12, 0.0 }
 0x19b   : > { %v2390_v22 = vld [vmem:[#allocation2 + $0x60] ss:$2 sm:$0xff]  ;;  %v2454_v23 = vld [vmem:[#allocation2 + $0x61] ss:$2 sm:$0xff]  ;;  %v2118_v24 = vpop.f32.mrf.mxu0  ;;  %v3001_v25 = vld [vmem:[#allocation3 + $0x11] ss:$2 sm:$0xff]  ;;  %5275 = vmatpush3.bf16.msra.mxu1 %v6327_v59 }
 0x19c   : > { %v2798_v26 = vmax.f32 %v2702_v16, %v2740_v17  ;;  %2328 = vst.msk [vmem:[#allocation2 + $0x78] sm:$0xff] %vm2312_vm3, %v2117_v18  ;;  %v6032_v1 = vpack.i.bf16 %v3001_v25, %v2999_v19  ;;  %2939 = vst.msk [vmem:[#allocation3 + $0x20] sm:$0xff] %vm2312_vm3, %v2907_v20  ;;  %v2511_v31 = vmax.f32 %v2390_v22, %v2454_v23 }
 0x19d   : > { %v2121_v29 = vpop.f32.mrf.mxu0 }
 0x19e   : > { %v2837_v30 = vmul.f32 %v7259_v27, %v2798_v26  ;;  %v2122_v32 = vadd.f32 %v7213_v6, %v2121_v29  ;;  %6033 = vrot.lane.b32.xlu1 %v6032_v1, %s6460_s30 }
 0x19f   : > { %v2550_v34 = vld [vmem:[#allocation2 + $0x62] ss:$2 sm:$0xff]  ;;  %v2123_v35 = vpop.f32.mrf.mxu0  ;;  %v2646_v39 = vld [vmem:[#allocation2 + $0x63] ss:$2 sm:$0xff] }
 0x1a0   : > { %v2876_v36 = vadd.f32 %v7270_v45, %v2837_v30  ;;  %v2607_v37 = vmax.f32 %v2511_v31, %v2550_v34  ;;  %2329 = vst.msk [vmem:[#allocation2 + $0x80] sm:$0xff] %vm2312_vm3, %v2122_v32  ;;  %v2742_v43 = vld [vmem:[#allocation2 + $0x64] ss:$2 sm:$0xff] }
 0x1a1   : > { %v2124_v40 = vpop.f32.mrf.mxu0 }
 0x1a2   : > { %v2908_v41 = vmax.f32 %v2876_v36, 0.0  ;;  %v2703_v42 = vmax.f32 %v2607_v37, %v2646_v39  ;;  %v2125_v44 = vadd.f32 %v7213_v6, %v2124_v40 }
 0x1a3   : > { %v2392_v48 = vld [vmem:[#allocation2 + $0x70] ss:$2 sm:$0xff]  ;;  %v2456_v49 = vld [vmem:[#allocation2 + $0x71] ss:$2 sm:$0xff]  ;;  %v2126_v50 = vpop.f32.mrf.mxu0 }
 0x1a4   : > { %v3033_v51 = vld [vmem:[#allocation3 + $0x12] ss:$2 sm:$0xff]  ;;  %2940 = vst.msk [vmem:[#allocation3 + $0x28] sm:$0xff] %vm2312_vm3, %v2908_v41  ;;  %v2799_v52 = vmax.f32 %v2703_v42, %v2742_v43  ;;  %2330 = vst.msk [vmem:[#allocation2 + $0x88] sm:$0xff] %vm2312_vm3, %v2125_v44  ;;  %v3065_v55 = vld [vmem:[#allocation3 + $0x13] ss:$2 sm:$0xff]  ;;  %v2512_v61 = vmax.f32 %v2392_v48, %v2456_v49 }
 0x1a5   : > { %v6037_v53 = vpack.i.bf16 %v3033_v51, %v3031_v46  ;;  %v2129_v56 = vpop.f32.mrf.mxu0  ;;  %v6042_v57 = vpack.i.bf16 %v3065_v55, %v3063_v54  ;;  %v3097_v58 = vld [vmem:[#allocation3 + $0x14] ss:$2 sm:$0xff]  ;;  %v3129_v9 = vld [vmem:[#allocation3 + $0x15] ss:$2 sm:$0xff] }
 0x1a6   : > { %v2838_v60 = vmul.f32 %v7259_v27, %v2799_v52  ;;  %v2130_v62 = vadd.f32 %v7213_v6, %v2129_v56  ;;  %v6047_v5 = vpack.i.bf16 %v3097_v58, %v3095_v2  ;;  %v6052_v19 = vpack.i.bf16 %v3129_v9, %v3127_v13 }
 0x1a7   : > { %6038 = vrot.lane.b32.xlu0 %v6037_v53, %s8298_s27  ;;  %v2552_v63 = vld [vmem:[#allocation2 + $0x72] ss:$2 sm:$0xff]  ;;  %6043 = vrot.lane.b32.xlu1 %v6042_v57, %s6461_s16  ;;  %v2131_v0 = vpop.f32.mrf.mxu0  ;;  %v2648_v7 = vld [vmem:[#allocation2 + $0x73] ss:$2 sm:$0xff] }
 0x1a8   : > { %v2877_v3 = vadd.f32 %v7270_v45, %v2838_v60  ;;  %v2608_v4 = vmax.f32 %v2512_v61, %v2552_v63  ;;  %2331 = vst.msk [vmem:[#allocation2 + $0x90] sm:$0xff] %vm2312_vm3, %v2130_v62  ;;  %v2744_v14 = vld [vmem:[#allocation2 + $0x74] ss:$2 sm:$0xff] }
 0x1a9   : > { %v2132_v8 = vpop.f32.mrf.mxu0 }
 0x1aa   : > { %v2909_v10 = vmax.f32 %v2877_v3, 0.0  ;;  %v2704_v11 = vmax.f32 %v2608_v4, %v2648_v7  ;;  %v2133_v12 = vadd.f32 %v7213_v6, %v2132_v8 }
 0x1ab   : > { %6048 = vrot.lane.b32.xlu0 %v6047_v5, %s8300_s17  ;;  %v2394_v15 = vld [vmem:[#allocation2 + $0x80] ss:$2 sm:$0xff]  ;;  %v2458_v16 = vld [vmem:[#allocation2 + $0x81] ss:$2 sm:$0xff]  ;;  %v2134_v17 = vpop.f32.mrf.mxu0 }
 0x1ac   : > { %2941 = vst.msk [vmem:[#allocation3 + $0x30] sm:$0xff] %vm2312_vm3, %v2909_v10  ;;  %v2800_v18 = vmax.f32 %v2704_v11, %v2744_v14  ;;  %2332 = vst.msk [vmem:[#allocation2 + $0x98] sm:$0xff] %vm2312_vm3, %v2133_v12  ;;  %v2513_v22 = vmax.f32 %v2394_v15, %v2458_v16  ;;  %v3003_v53 = vld [vmem:[#allocation3 + $0x21] ss:$2 sm:$0xff] }
 0x1ad   : > { %v2137_v20 = vpop.f32.mrf.mxu0 }
 0x1ae   : > { %v2839_v21 = vmul.f32 %v7259_v27, %v2800_v18  ;;  %v2138_v23 = vadd.f32 %v7213_v6, %v2137_v20 }
 0x1af   : > { %6053 = vrot.lane.b32.xlu0 %v6052_v19, %s6462_s23  ;;  %v2554_v24 = vld [vmem:[#allocation2 + $0x82] ss:$2 sm:$0xff]  ;;  %v2139_v25 = vpop.f32.mrf.mxu0  ;;  %v2650_v28 = vld [vmem:[#allocation2 + $0x83] ss:$2 sm:$0xff] }
 0x1b0   : > { %v2878_v26 = vadd.f32 %v7270_v45, %v2839_v21  ;;  %v2609_v1 = vmax.f32 %v2513_v22, %v2554_v24  ;;  %2333 = vst.msk [vmem:[#allocation2 + $0xa0] sm:$0xff] %vm2312_vm3, %v2138_v23  ;;  %v2746_v33 = vld [vmem:[#allocation2 + $0x84] ss:$2 sm:$0xff] }
 0x1b1   : > { %v2140_v29 = vpop.f32.mrf.mxu0 }
 0x1b2   : > { %v2910_v30 = vmax.f32 %v2878_v26, 0.0  ;;  %v2705_v31 = vmax.f32 %v2609_v1, %v2650_v28  ;;  %v2141_v32 = vadd.f32 %v7213_v6, %v2140_v29 }
 0x1b3   : > { %v2396_v34 = vld [vmem:[#allocation2 + $0x90] ss:$2 sm:$0xff]  ;;  %v2460_v35 = vld [vmem:[#allocation2 + $0x91] ss:$2 sm:$0xff]  ;;  %v2142_v36 = vpop.f32.mrf.mxu0 }
 0x1b4   : > { %2942 = vst.msk [vmem:[#allocation3 + $0x38] sm:$0xff] %vm2312_vm3, %v2910_v30  ;;  %v2801_v37 = vmax.f32 %v2705_v31, %v2746_v33  ;;  %2334 = vst.msk [vmem:[#allocation2 + $0xa8] sm:$0xff] %vm2312_vm3, %v2141_v32  ;;  %v2514_v40 = vmax.f32 %v2396_v34, %v2460_v35  ;;  %v3067_v12 = vld [vmem:[#allocation3 + $0x23] ss:$2 sm:$0xff]  ;;  %v3035_v19 = vld [vmem:[#allocation3 + $0x22] ss:$2 sm:$0xff] }
 0x1b5   : > { %v2145_v38 = vpop.f32.mrf.mxu0  ;;  %v3099_v31 = vld [vmem:[#allocation3 + $0x24] ss:$2 sm:$0xff] }
 0x1b6   : > { %v2840_v39 = vmul.f32 %v7259_v27, %v2801_v37  ;;  %v2146_v41 = vadd.f32 %v7213_v6, %v2145_v38 }
 0x1b7   : > { %v2556_v42 = vld [vmem:[#allocation2 + $0x92] ss:$2 sm:$0xff]  ;;  %v2147_v43 = vpop.f32.mrf.mxu0  ;;  %v2652_v47 = vld [vmem:[#allocation2 + $0x93] ss:$2 sm:$0xff] }
 0x1b8   : > { %v2879_v44 = vadd.f32 %v7270_v45, %v2840_v39  ;;  %v2610_v46 = vmax.f32 %v2514_v40, %v2556_v42  ;;  %2335 = vst.msk [vmem:[#allocation2 + $0xb0] sm:$0xff] %vm2312_vm3, %v2146_v41  ;;  %v2748_v51 = vld [vmem:[#allocation2 + $0x94] ss:$2 sm:$0xff] }
 0x1b9   : > { %v2148_v48 = vpop.f32.mrf.mxu0 }
 0x1ba   : > { %v2911_v49 = vmax.f32 %v2879_v44, 0.0  ;;  %v2706_v50 = vmax.f32 %v2610_v46, %v2652_v47  ;;  %v2149_v52 = vadd.f32 %v7213_v6, %v2148_v48  ;;  %v3131_v44 = vld [vmem:[#allocation3 + $0x25] ss:$2 sm:$0xff] }
 0x1bb   : > { %v2398_v54 = vld [vmem:[#allocation2 + $0xa0] ss:$2 sm:$0xff]  ;;  %v2462_v55 = vld [vmem:[#allocation2 + $0xa1] ss:$2 sm:$0xff]  ;;  %v2150_v56 = vpop.f32.mrf.mxu0  ;;  %v3005_v57 = vld [vmem:[#allocation3 + $0x31] ss:$2 sm:$0xff] }
 0x1bc   : > { %2943 = vst.msk [vmem:[#allocation3 + $0x40] sm:$0xff] %vm2312_vm3, %v2911_v49  ;;  %v2802_v58 = vmax.f32 %v2706_v50, %v2748_v51  ;;  %2336 = vst.msk [vmem:[#allocation2 + $0xb8] sm:$0xff] %vm2312_vm3, %v2149_v52  ;;  %v6057_v59 = vpack.i.bf16 %v3005_v57, %v3003_v53  ;;  %v2515_v62 = vmax.f32 %v2398_v54, %v2462_v55 }
 0x1bd   : > { %v2153_v60 = vpop.f32.mrf.mxu0 }
 0x1be   : > { %v2841_v61 = vmul.f32 %v7259_v27, %v2802_v58  ;;  %v2154_v63 = vadd.f32 %v7213_v6, %v2153_v60  ;;  %6058 = vrot.lane.b32.xlu0 %v6057_v59, %s6460_s30 }
 0x1bf   : > { %v2558_v0 = vld [vmem:[#allocation2 + $0xa2] ss:$2 sm:$0xff]  ;;  %v2155_v2 = vpop.f32.mrf.mxu0  ;;  %v2654_v5 = vld [vmem:[#allocation2 + $0xa3] ss:$2 sm:$0xff] }
 0x1c0   : > { %v2880_v3 = vadd.f32 %v7270_v45, %v2841_v61  ;;  %v2611_v4 = vmax.f32 %v2515_v62, %v2558_v0  ;;  %2337 = vst.msk [vmem:[#allocation2 + $0xc0] sm:$0xff] %vm2312_vm3, %v2154_v63  ;;  %v2750_v10 = vld [vmem:[#allocation2 + $0xa4] ss:$2 sm:$0xff] }
 0x1c1   : > { %v2156_v7 = vpop.f32.mrf.mxu0 }
 0x1c2   : > { %v2912_v8 = vmax.f32 %v2880_v3, 0.0  ;;  %v2707_v9 = vmax.f32 %v2611_v4, %v2654_v5  ;;  %v2157_v11 = vadd.f32 %v7213_v6, %v2156_v7  ;;  %v7454_v5 = vld [vmem:[%s8278_s2] ss:$0 sm:$0xff] }
 0x1c3   : > { %v2400_v13 = vld [vmem:[#allocation2 + $0xb0] ss:$2 sm:$0xff]  ;;  %v2464_v14 = vld [vmem:[#allocation2 + $0xb1] ss:$2 sm:$0xff]  ;;  %v2158_v15 = vpop.f32.mrf.mxu0 }
 0x1c4   : > { %v3069_v16 = vld [vmem:[#allocation3 + $0x33] ss:$2 sm:$0xff]  ;;  %2944 = vst.msk [vmem:[#allocation3 + $0x48] sm:$0xff] %vm2312_vm3, %v2912_v8  ;;  %v2803_v17 = vmax.f32 %v2707_v9, %v2750_v10  ;;  %2338 = vst.msk [vmem:[#allocation2 + $0xc8] sm:$0xff] %vm2312_vm3, %v2157_v11  ;;  %v3037_v20 = vld [vmem:[#allocation3 + $0x32] ss:$2 sm:$0xff]  ;;  %v2516_v24 = vmax.f32 %v2400_v13, %v2464_v14 }
 0x1c5   : > { %v6067_v18 = vpack.i.bf16 %v3069_v16, %v3067_v12  ;;  %v2161_v21 = vpop.f32.mrf.mxu0  ;;  %v6062_v22 = vpack.i.bf16 %v3037_v20, %v3035_v19  ;;  %v3101_v26 = vld [vmem:[#allocation3 + $0x34] ss:$2 sm:$0xff]  ;;  %v3133_v38 = vld [vmem:[#allocation3 + $0x35] ss:$2 sm:$0xff] }
 0x1c6   : > { %v2842_v23 = vmul.f32 %v7259_v27, %v2803_v17  ;;  %v2162_v25 = vadd.f32 %v7213_v6, %v2161_v21  ;;  %v6072_v34 = vpack.i.bf16 %v3101_v26, %v3099_v31  ;;  %v6077_v47 = vpack.i.bf16 %v3133_v38, %v3131_v44 }
 0x1c7   : > { %6068 = vrot.lane.b32.xlu0 %v6067_v18, %s6461_s16  ;;  %v2560_v1 = vld [vmem:[#allocation2 + $0xb2] ss:$2 sm:$0xff]  ;;  %6063 = vrot.lane.b32.xlu1 %v6062_v22, %s8298_s27  ;;  %v2163_v28 = vpop.f32.mrf.mxu0  ;;  %v2656_v32 = vld [vmem:[#allocation2 + $0xb3] ss:$2 sm:$0xff] }
 0x1c8   : > { %v2881_v29 = vadd.f32 %v7270_v45, %v2842_v23  ;;  %v2612_v30 = vmax.f32 %v2516_v24, %v2560_v1  ;;  %2339 = vst.msk [vmem:[#allocation2 + $0xd0] sm:$0xff] %vm2312_vm3, %v2162_v25  ;;  %v2752_v39 = vld [vmem:[#allocation2 + $0xb4] ss:$2 sm:$0xff] }
 0x1c9   : > { %v2164_v33 = vpop.f32.mrf.mxu0 }
 0x1ca   : > { %v2913_v35 = vmax.f32 %v2881_v29, 0.0  ;;  %v2708_v36 = vmax.f32 %v2612_v30, %v2656_v32  ;;  %v2165_v37 = vadd.f32 %v7213_v6, %v2164_v33 }
 0x1cb   : > { %v2402_v40 = vld [vmem:[#allocation2 + $0xc0] ss:$2 sm:$0xff]  ;;  %v2466_v41 = vld [vmem:[#allocation2 + $0xc1] ss:$2 sm:$0xff]  ;;  %6073 = vrot.lane.b32.xlu1 %v6072_v34, %s8300_s17  ;;  %v2166_v42 = vpop.f32.mrf.mxu0 }
 0x1cc   : > { %2945 = vst.msk [vmem:[#allocation3 + $0x50] sm:$0xff] %vm2312_vm3, %v2913_v35  ;;  %v2804_v43 = vmax.f32 %v2708_v36, %v2752_v39  ;;  %2340 = vst.msk [vmem:[#allocation2 + $0xd8] sm:$0xff] %vm2312_vm3, %v2165_v37  ;;  %v2517_v49 = vmax.f32 %v2402_v40, %v2466_v41  ;;  %v3007_v17 = vld [vmem:[#allocation3 + $0x41] ss:$2 sm:$0xff] }
 0x1cd   : > { %v2169_v46 = vpop.f32.mrf.mxu0 }
 0x1ce   : > { %v2843_v48 = vmul.f32 %v7259_v27, %v2804_v43  ;;  %v2170_v50 = vadd.f32 %v7213_v6, %v2169_v46 }
 0x1cf   : > { %v2562_v51 = vld [vmem:[#allocation2 + $0xc2] ss:$2 sm:$0xff]  ;;  %6078 = vrot.lane.b32.xlu1 %v6077_v47, %s6462_s23  ;;  %v2171_v52 = vpop.f32.mrf.mxu0  ;;  %v2658_v55 = vld [vmem:[#allocation2 + $0xc3] ss:$2 sm:$0xff] }
 0x1d0   : > { %v2882_v53 = vadd.f32 %v7270_v45, %v2843_v48  ;;  %v2613_v54 = vmax.f32 %v2517_v49, %v2562_v51  ;;  %2341 = vst.msk [vmem:[#allocation2 + $0xe0] sm:$0xff] %vm2312_vm3, %v2170_v50  ;;  %v2754_v60 = vld [vmem:[#allocation2 + $0xc4] ss:$2 sm:$0xff] }
 0x1d1   : > { %v2172_v56 = vpop.f32.mrf.mxu0 }
 0x1d2   : > { %v2914_v57 = vmax.f32 %v2882_v53, 0.0  ;;  %v2709_v58 = vmax.f32 %v2613_v54, %v2658_v55  ;;  %v2173_v59 = vadd.f32 %v7213_v6, %v2172_v56 }
 0x1d3   : > { %v2404_v61 = vld [vmem:[#allocation2 + $0xd0] ss:$2 sm:$0xff]  ;;  %v2468_v62 = vld [vmem:[#allocation2 + $0xd1] ss:$2 sm:$0xff]  ;;  %v2174_v63 = vpop.f32.mrf.mxu0 }
 0x1d4   : > { %2946 = vst.msk [vmem:[#allocation3 + $0x58] sm:$0xff] %vm2312_vm3, %v2914_v57  ;;  %v2805_v0 = vmax.f32 %v2709_v58, %v2754_v60  ;;  %2342 = vst.msk [vmem:[#allocation2 + $0xe8] sm:$0xff] %vm2312_vm3, %v2173_v59  ;;  %v2518_v4 = vmax.f32 %v2404_v61, %v2468_v62  ;;  %v3039_v38 = vld [vmem:[#allocation3 + $0x42] ss:$2 sm:$0xff]  ;;  %v3071_v46 = vld [vmem:[#allocation3 + $0x43] ss:$2 sm:$0xff] }
 0x1d5   : > { %v2177_v2 = vpop.f32.mrf.mxu0  ;;  %v3103_v56 = vld [vmem:[#allocation3 + $0x44] ss:$2 sm:$0xff] }
 0x1d6   : > { %v2844_v3 = vmul.f32 %v7259_v27, %v2805_v0  ;;  %v2178_v6 = vadd.f32 %v7454_v5, %v2177_v2 }
 0x1d7   : > { %v2564_v7 = vld [vmem:[#allocation2 + $0xd2] ss:$2 sm:$0xff]  ;;  %v2179_v8 = vpop.f32.mrf.mxu0  ;;  %v2660_v11 = vld [vmem:[#allocation2 + $0xd3] ss:$2 sm:$0xff] }
 0x1d8   : > { %v2883_v9 = vadd.f32 %v7270_v45, %v2844_v3  ;;  %v2614_v10 = vmax.f32 %v2518_v4, %v2564_v7  ;;  %2343 = vst.msk [vmem:[#allocation2 + $0xf0] sm:$0xff] %vm2312_vm3, %v2178_v6  ;;  %v2756_v15 = vld [vmem:[#allocation2 + $0xd4] ss:$2 sm:$0xff]  ;;  %v3135_v3 = vld [vmem:[#allocation3 + $0x45] ss:$2 sm:$0xff] }
 0x1d9   : > { %v2180_v12 = vpop.f32.mrf.mxu0 }
 0x1da   : > { %v2915_v13 = vmax.f32 %v2883_v9, 0.0  ;;  %v2710_v14 = vmax.f32 %v2614_v10, %v2660_v11  ;;  %v2181_v16 = vadd.f32 %v7454_v5, %v2180_v12 }
 0x1db   : > { %v2406_v18 = vld [vmem:[#allocation2 + $0xe0] ss:$2 sm:$0xff]  ;;  %v2470_v19 = vld [vmem:[#allocation2 + $0xe1] ss:$2 sm:$0xff]  ;;  %v2182_v20 = vpop.f32.mrf.mxu0  ;;  %v3009_v21 = vld [vmem:[#allocation3 + $0x51] ss:$2 sm:$0xff] }
 0x1dc   : > { %2947 = vst.msk [vmem:[#allocation3 + $0x60] sm:$0xff] %vm2312_vm3, %v2915_v13  ;;  %v2806_v22 = vmax.f32 %v2710_v14, %v2756_v15  ;;  %2344 = vst.msk [vmem:[#allocation2 + $0xf8] sm:$0xff] %vm2312_vm3, %v2181_v16  ;;  %v6082_v23 = vpack.i.bf16 %v3009_v21, %v3007_v17  ;;  %v2519_v26 = vmax.f32 %v2406_v18, %v2470_v19 }
 0x1dd   : > { %v2185_v24 = vpop.f32.mrf.mxu0 }
 0x1de   : > { %v2845_v25 = vmul.f32 %v7259_v27, %v2806_v22  ;;  %v2186_v1 = vadd.f32 %v7454_v5, %v2185_v24  ;;  %6083 = vrot.lane.b32.xlu1 %v6082_v23, %s6460_s30 }
 0x1df   : > { %v2566_v28 = vld [vmem:[#allocation2 + $0xe2] ss:$2 sm:$0xff]  ;;  %v2187_v29 = vpop.f32.mrf.mxu0  ;;  %v2662_v32 = vld [vmem:[#allocation2 + $0xe3] ss:$2 sm:$0xff] }
 0x1e0   : > { %v2884_v30 = vadd.f32 %v7270_v45, %v2845_v25  ;;  %v2615_v31 = vmax.f32 %v2519_v26, %v2566_v28  ;;  %2345 = vst.msk [vmem:[#allocation2 + $0x100] sm:$0xff] %vm2312_vm3, %v2186_v1  ;;  %v2758_v36 = vld [vmem:[#allocation2 + $0xe4] ss:$2 sm:$0xff]  ;;  %v7491_v29 = vld [vmem:[%s8279_s3] ss:$0 sm:$0xff] }
 0x1e1   : > { %v2188_v33 = vpop.f32.mrf.mxu0 }
 0x1e2   : > { %v2916_v34 = vmax.f32 %v2884_v30, 0.0  ;;  %v2711_v35 = vmax.f32 %v2615_v31, %v2662_v32  ;;  %v2189_v37 = vadd.f32 %v7454_v5, %v2188_v33 }
 0x1e3   : > { %v2408_v39 = vld [vmem:[#allocation2 + $0xf0] ss:$2 sm:$0xff]  ;;  %v2472_v40 = vld [vmem:[#allocation2 + $0xf1] ss:$2 sm:$0xff]  ;;  %v2190_v41 = vpop.f32.mrf.mxu0 }
 0x1e4   : > { %v3041_v42 = vld [vmem:[#allocation3 + $0x52] ss:$2 sm:$0xff]  ;;  %2948 = vst.msk [vmem:[#allocation3 + $0x68] sm:$0xff] %vm2312_vm3, %v2916_v34  ;;  %v2807_v43 = vmax.f32 %v2711_v35, %v2758_v36  ;;  %2346 = vst.msk [vmem:[#allocation2 + $0x108] sm:$0xff] %vm2312_vm3, %v2189_v37  ;;  %v3073_v47 = vld [vmem:[#allocation3 + $0x53] ss:$2 sm:$0xff]  ;;  %v2520_v52 = vmax.f32 %v2408_v39, %v2472_v40 }
 0x1e5   : > { %v6087_v44 = vpack.i.bf16 %v3041_v42, %v3039_v38  ;;  %v2193_v48 = vpop.f32.mrf.mxu0  ;;  %v6092_v49 = vpack.i.bf16 %v3073_v47, %v3071_v46  ;;  %v3105_v50 = vld [vmem:[#allocation3 + $0x54] ss:$2 sm:$0xff]  ;;  %v3137_v62 = vld [vmem:[#allocation3 + $0x55] ss:$2 sm:$0xff] }
 0x1e6   : > { %v2846_v51 = vmul.f32 %v7259_v27, %v2807_v43  ;;  %v2194_v53 = vadd.f32 %v7454_v5, %v2193_v48  ;;  %v6097_v59 = vpack.i.bf16 %v3105_v50, %v3103_v56  ;;  %v6102_v10 = vpack.i.bf16 %v3137_v62, %v3135_v3  ;;  %v7506_v56 = vld [vmem:[%s8280_s4] ss:$0 sm:$0xff] }
 0x1e7   : > { %6088 = vrot.lane.b32.xlu0 %v6087_v44, %s8298_s27  ;;  %v2568_v54 = vld [vmem:[#allocation2 + $0xf2] ss:$2 sm:$0xff]  ;;  %6093 = vrot.lane.b32.xlu1 %v6092_v49, %s6461_s16  ;;  %v2195_v55 = vpop.f32.mrf.mxu0  ;;  %v2664_v60 = vld [vmem:[#allocation2 + $0xf3] ss:$2 sm:$0xff] }
 0x1e8   : > { %v2885_v57 = vadd.f32 %v7270_v45, %v2846_v51  ;;  %v2616_v58 = vmax.f32 %v2520_v52, %v2568_v54  ;;  %2347 = vst.msk [vmem:[#allocation2 + $0x110] sm:$0xff] %vm2312_vm3, %v2194_v53  ;;  %v2760_v4 = vld [vmem:[#allocation2 + $0xf4] ss:$2 sm:$0xff] }
 0x1e9   : > { %v2196_v61 = vpop.f32.mrf.mxu0 }
 0x1ea   : > { %v2917_v63 = vmax.f32 %v2885_v57, 0.0  ;;  %v2712_v0 = vmax.f32 %v2616_v58, %v2664_v60  ;;  %v2197_v2 = vadd.f32 %v7454_v5, %v2196_v61 }
 0x1eb   : > { %6098 = vrot.lane.b32.xlu0 %v6097_v59, %s8300_s17  ;;  %v2410_v6 = vld [vmem:[#allocation2 + $0x100] ss:$2 sm:$0xff]  ;;  %v2474_v7 = vld [vmem:[#allocation2 + $0x101] ss:$2 sm:$0xff]  ;;  %v2198_v8 = vpop.f32.mrf.mxu0 }
 0x1ec   : > { %2949 = vst.msk [vmem:[#allocation3 + $0x70] sm:$0xff] %vm2312_vm3, %v2917_v63  ;;  %v2808_v9 = vmax.f32 %v2712_v0, %v2760_v4  ;;  %2348 = vst.msk [vmem:[#allocation2 + $0x118] sm:$0xff] %vm2312_vm3, %v2197_v2  ;;  %v2521_v13 = vmax.f32 %v2410_v6, %v2474_v7  ;;  %v3011_v43 = vld [vmem:[#allocation3 + $0x61] ss:$2 sm:$0xff] }
 0x1ed   : > { %v2201_v11 = vpop.f32.mrf.mxu0 }
 0x1ee   : > { %v2847_v12 = vmul.f32 %v7259_v27, %v2808_v9  ;;  %v2202_v14 = vadd.f32 %v7454_v5, %v2201_v11 }
 0x1ef   : > { %6103 = vrot.lane.b32.xlu0 %v6102_v10, %s6462_s23  ;;  %v2570_v15 = vld [vmem:[#allocation2 + $0x102] ss:$2 sm:$0xff]  ;;  %v2203_v16 = vpop.f32.mrf.mxu0  ;;  %v2666_v19 = vld [vmem:[#allocation2 + $0x103] ss:$2 sm:$0xff] }
 0x1f0   : > { %v2886_v17 = vadd.f32 %v7270_v45, %v2847_v12  ;;  %v2617_v18 = vmax.f32 %v2521_v13, %v2570_v15  ;;  %2349 = vst.msk [vmem:[#allocation2 + $0x120] sm:$0xff] %vm2312_vm3, %v2202_v14  ;;  %v2762_v24 = vld [vmem:[#allocation2 + $0x104] ss:$2 sm:$0xff] }
 0x1f1   : > { %v2204_v20 = vpop.f32.mrf.mxu0 }
 0x1f2   : > { %v2918_v21 = vmax.f32 %v2886_v17, 0.0  ;;  %v2713_v22 = vmax.f32 %v2617_v18, %v2666_v19  ;;  %v2205_v23 = vadd.f32 %v7454_v5, %v2204_v20 }
 0x1f3   : > { %v2412_v27 = vld [vmem:[#allocation2 + $0x110] ss:$2 sm:$0xff]  ;;  %v2476_v25 = vld [vmem:[#allocation2 + $0x111] ss:$2 sm:$0xff]  ;;  %v2206_v26 = vpop.f32.mrf.mxu0 }
 0x1f4   : > { %2950 = vst.msk [vmem:[#allocation3 + $0x78] sm:$0xff] %vm2312_vm3, %v2918_v21  ;;  %v2809_v1 = vmax.f32 %v2713_v22, %v2762_v24  ;;  %2350 = vst.msk [vmem:[#allocation2 + $0x128] sm:$0xff] %vm2312_vm3, %v2205_v23  ;;  %v2522_v31 = vmax.f32 %v2412_v27, %v2476_v25  ;;  %v3075_v2 = vld [vmem:[#allocation3 + $0x63] ss:$2 sm:$0xff]  ;;  %v3043_v10 = vld [vmem:[#allocation3 + $0x62] ss:$2 sm:$0xff] }
 0x1f5   : > { %v2209_v28 = vpop.f32.mrf.mxu0  ;;  %v3107_v22 = vld [vmem:[#allocation3 + $0x64] ss:$2 sm:$0xff] }
 0x1f6   : > { %v2848_v30 = vmul.f32 %v7491_v29, %v2809_v1  ;;  %v2210_v32 = vadd.f32 %v7454_v5, %v2209_v28 }
 0x1f7   : > { %v2572_v33 = vld [vmem:[#allocation2 + $0x112] ss:$2 sm:$0xff]  ;;  %v2211_v34 = vpop.f32.mrf.mxu0  ;;  %v2668_v37 = vld [vmem:[#allocation2 + $0x113] ss:$2 sm:$0xff] }
 0x1f8   : > { %v2887_v35 = vadd.f32 %v7270_v45, %v2848_v30  ;;  %v2618_v36 = vmax.f32 %v2522_v31, %v2572_v33  ;;  %2351 = vst.msk [vmem:[#allocation2 + $0x130] sm:$0xff] %vm2312_vm3, %v2210_v32  ;;  %v2764_v41 = vld [vmem:[#allocation2 + $0x114] ss:$2 sm:$0xff] }
 0x1f9   : > { %v2212_v38 = vpop.f32.mrf.mxu0 }
 0x1fa   : > { %v2919_v39 = vmax.f32 %v2887_v35, 0.0  ;;  %v2714_v40 = vmax.f32 %v2618_v36, %v2668_v37  ;;  %v2213_v42 = vadd.f32 %v7454_v5, %v2212_v38  ;;  %v3139_v35 = vld [vmem:[#allocation3 + $0x65] ss:$2 sm:$0xff] }
 0x1fb   : > { %v2414_v44 = vld [vmem:[#allocation2 + $0x120] ss:$2 sm:$0xff]  ;;  %v2478_v46 = vld [vmem:[#allocation2 + $0x121] ss:$2 sm:$0xff]  ;;  %v2214_v47 = vpop.f32.mrf.mxu0  ;;  %v3013_v48 = vld [vmem:[#allocation3 + $0x71] ss:$2 sm:$0xff] }
 0x1fc   : > { %2951 = vst.msk [vmem:[#allocation3 + $0x80] sm:$0xff] %vm2312_vm3, %v2919_v39  ;;  %v2810_v49 = vmax.f32 %v2714_v40, %v2764_v41  ;;  %2352 = vst.msk [vmem:[#allocation2 + $0x138] sm:$0xff] %vm2312_vm3, %v2213_v42  ;;  %v6107_v45 = vpack.i.bf16 %v3013_v48, %v3011_v43  ;;  %v2523_v52 = vmax.f32 %v2414_v44, %v2478_v46 }
 0x1fd   : > { %v2217_v50 = vpop.f32.mrf.mxu0 }
 0x1fe   : > { %v2849_v51 = vmul.f32 %v7491_v29, %v2810_v49  ;;  %v2218_v53 = vadd.f32 %v7454_v5, %v2217_v50  ;;  %6108 = vrot.lane.b32.xlu0 %v6107_v45, %s6460_s30 }
 0x1ff   : > { %v2574_v54 = vld [vmem:[#allocation2 + $0x122] ss:$2 sm:$0xff]  ;;  %v2219_v55 = vpop.f32.mrf.mxu0  ;;  %v2670_v59 = vld [vmem:[#allocation2 + $0x123] ss:$2 sm:$0xff] }
 0x200   : > { %v2888_v57 = vadd.f32 %v7506_v56, %v2849_v51  ;;  %v2619_v58 = vmax.f32 %v2523_v52, %v2574_v54  ;;  %2353 = vst.msk [vmem:[#allocation2 + $0x140] sm:$0xff] %vm2312_vm3, %v2218_v53  ;;  %v2766_v63 = vld [vmem:[#allocation2 + $0x124] ss:$2 sm:$0xff] }
 0x201   : > { %v2220_v60 = vpop.f32.mrf.mxu0 }
 0x202   : > { %v2920_v61 = vmax.f32 %v2888_v57, 0.0  ;;  %v2715_v62 = vmax.f32 %v2619_v58, %v2670_v59  ;;  %v2221_v0 = vadd.f32 %v7454_v5, %v2220_v60 }
 0x203   : > { %v2416_v3 = vld [vmem:[#allocation2 + $0x130] ss:$2 sm:$0xff]  ;;  %v2480_v4 = vld [vmem:[#allocation2 + $0x131] ss:$2 sm:$0xff]  ;;  %v2222_v6 = vpop.f32.mrf.mxu0 }
 0x204   : > { %v3077_v7 = vld [vmem:[#allocation3 + $0x73] ss:$2 sm:$0xff]  ;;  %2952 = vst.msk [vmem:[#allocation3 + $0x88] sm:$0xff] %vm2312_vm3, %v2920_v61  ;;  %v2811_v8 = vmax.f32 %v2715_v62, %v2766_v63  ;;  %2354 = vst.msk [vmem:[#allocation2 + $0x148] sm:$0xff] %vm2312_vm3, %v2221_v0  ;;  %v3045_v11 = vld [vmem:[#allocation3 + $0x72] ss:$2 sm:$0xff]  ;;  %v2524_v15 = vmax.f32 %v2416_v3, %v2480_v4 }
 0x205   : > { %v6117_v9 = vpack.i.bf16 %v3077_v7, %v3075_v2  ;;  %v2225_v12 = vpop.f32.mrf.mxu0  ;;  %v6112_v13 = vpack.i.bf16 %v3045_v11, %v3043_v10  ;;  %v3109_v17 = vld [vmem:[#allocation3 + $0x74] ss:$2 sm:$0xff]  ;;  %v3141_v28 = vld [vmem:[#allocation3 + $0x75] ss:$2 sm:$0xff] }
 0x206   : > { %v2850_v14 = vmul.f32 %v7491_v29, %v2811_v8  ;;  %v2226_v16 = vadd.f32 %v7454_v5, %v2225_v12  ;;  %v6122_v27 = vpack.i.bf16 %v3109_v17, %v3107_v22  ;;  %v6127_v37 = vpack.i.bf16 %v3141_v28, %v3139_v35 }
 0x207   : > { %6118 = vrot.lane.b32.xlu0 %v6117_v9, %s6461_s16  ;;  %v2576_v18 = vld [vmem:[#allocation2 + $0x132] ss:$2 sm:$0xff]  ;;  %6113 = vrot.lane.b32.xlu1 %v6112_v13, %s8298_s27  ;;  %v2227_v19 = vpop.f32.mrf.mxu0  ;;  %v2672_v23 = vld [vmem:[#allocation2 + $0x133] ss:$2 sm:$0xff] }
 0x208   : > { %v2889_v20 = vadd.f32 %v7506_v56, %v2850_v14  ;;  %v2620_v21 = vmax.f32 %v2524_v15, %v2576_v18  ;;  %2355 = vst.msk [vmem:[#allocation2 + $0x150] sm:$0xff] %vm2312_vm3, %v2226_v16  ;;  %v2768_v30 = vld [vmem:[#allocation2 + $0x134] ss:$2 sm:$0xff] }
 0x209   : > { %v2228_v24 = vpop.f32.mrf.mxu0 }
 0x20a   : > { %v2921_v25 = vmax.f32 %v2889_v20, 0.0  ;;  %v2716_v26 = vmax.f32 %v2620_v21, %v2672_v23  ;;  %v2229_v1 = vadd.f32 %v7454_v5, %v2228_v24  ;;  %v2967_v20 = vld [vmem:[#allocation3] ss:$2 sm:$0xff] }
 0x20b   : > { %v2418_v31 = vld [vmem:[#allocation2 + $0x140] ss:$2 sm:$0xff]  ;;  %v2482_v32 = vld [vmem:[#allocation2 + $0x141] ss:$2 sm:$0xff]  ;;  %6123 = vrot.lane.b32.xlu1 %v6122_v27, %s8300_s17  ;;  %v2230_v33 = vpop.f32.mrf.mxu0 }
 0x20c   : > { %2953 = vst.msk [vmem:[#allocation3 + $0x90] sm:$0xff] %vm2312_vm3, %v2921_v25  ;;  %v2812_v34 = vmax.f32 %v2716_v26, %v2768_v30  ;;  %2356 = vst.msk [vmem:[#allocation2 + $0x158] sm:$0xff] %vm2312_vm3, %v2229_v1  ;;  %v2525_v39 = vmax.f32 %v2418_v31, %v2482_v32  ;;  %v3015_v11 = vld [vmem:[#allocation3 + $0x81] ss:$2 sm:$0xff]  ;;  %v2969_v30 = vld [vmem:[#allocation3 + $0x10] ss:$2 sm:$0xff] }
 0x20d   : > { %v2233_v36 = vpop.f32.mrf.mxu0 }
 0x20e   : > { %v2851_v38 = vmul.f32 %v7491_v29, %v2812_v34  ;;  %v2234_v40 = vadd.f32 %v7454_v5, %v2233_v36 }
 0x20f   : > { %v2578_v41 = vld [vmem:[#allocation2 + $0x142] ss:$2 sm:$0xff]  ;;  %6128 = vrot.lane.b32.xlu1 %v6127_v37, %s6462_s23  ;;  %v2235_v42 = vpop.f32.mrf.mxu0  ;;  %v2674_v46 = vld [vmem:[#allocation2 + $0x143] ss:$2 sm:$0xff] }
 0x210   : > { %v2890_v43 = vadd.f32 %v7506_v56, %v2851_v38  ;;  %v2621_v44 = vmax.f32 %v2525_v39, %v2578_v41  ;;  %2357 = vst.msk [vmem:[#allocation2 + $0x160] sm:$0xff] %vm2312_vm3, %v2234_v40  ;;  %v2770_v50 = vld [vmem:[#allocation2 + $0x144] ss:$2 sm:$0xff]  ;;  %v6034_v55 = vpop.permute.xlu1 %6033 }
 0x211   : > { %v2236_v47 = vpop.f32.mrf.mxu0  ;;  %v6035_v4 = vunpack.i.l.bf16 %v6034_v55  ;;  %v6036_v12 = vunpack.i.h.bf16 %v6034_v55 }
 0x212   : > { %v2922_v48 = vmax.f32 %v2890_v43, 0.0  ;;  %v2717_v49 = vmax.f32 %v2621_v44, %v2674_v46  ;;  %v2237_v45 = vadd.f32 %v7454_v5, %v2236_v47 }
 0x213   : > { %v2420_v51 = vld [vmem:[#allocation2 + $0x150] ss:$2 sm:$0xff]  ;;  %v2484_v52 = vld [vmem:[#allocation2 + $0x151] ss:$2 sm:$0xff]  ;;  %v2238_v53 = vpop.f32.mrf.mxu0  ;;  %v3574_v27 = vsel %vm2312_vm3, %v2967_v20, %v6035_v4  ;;  %v3575_v34 = vsel %vm2312_vm3, %v2969_v30, %v6036_v12 }
 0x214   : > { %2954 = vst.msk [vmem:[#allocation3 + $0x98] sm:$0xff] %vm2312_vm3, %v2922_v48  ;;  %v2813_v54 = vmax.f32 %v2717_v49, %v2770_v50  ;;  %2358 = vst.msk [vmem:[#allocation2 + $0x168] sm:$0xff] %vm2312_vm3, %v2237_v45  ;;  %v2526_v59 = vmax.f32 %v2420_v51, %v2484_v52  ;;  %v3047_v52 = vld [vmem:[#allocation3 + $0x82] ss:$2 sm:$0xff]  ;;  %v3079_v53 = vld [vmem:[#allocation3 + $0x83] ss:$2 sm:$0xff] }
 0x215   : > { %v2241_v57 = vpop.f32.mrf.mxu0 }
 0x216   : > { %v2852_v58 = vmul.f32 %v7491_v29, %v2813_v54  ;;  %v2242_v60 = vadd.f32 %v7454_v5, %v2241_v57 }
 0x217   : > { %v2580_v61 = vld [vmem:[#allocation2 + $0x152] ss:$2 sm:$0xff]  ;;  %v2243_v62 = vpop.f32.mrf.mxu0  ;;  %v2676_v3 = vld [vmem:[#allocation2 + $0x153] ss:$2 sm:$0xff] }
 0x218   : > { %v2891_v63 = vadd.f32 %v7506_v56, %v2852_v58  ;;  %v2622_v0 = vmax.f32 %v2526_v59, %v2580_v61  ;;  %2359 = vst.msk [vmem:[#allocation2 + $0x170] sm:$0xff] %vm2312_vm3, %v2242_v60  ;;  %v2772_v10 = vld [vmem:[#allocation2 + $0x154] ss:$2 sm:$0xff] }
 0x219   : > { %v6039_v2 = vpop.permute.xlu0 %6038  ;;  %v6044_v6 = vpop.permute.xlu1 %6043 }
 0x21a   : > { %v2244_v7 = vpop.f32.mrf.mxu0  ;;  %v2923_v8 = vmax.f32 %v2891_v63, 0.0  ;;  %v2718_v9 = vmax.f32 %v2622_v0, %v2676_v3  ;;  %v6040_v15 = vunpack.i.l.bf16 %v6039_v2  ;;  %v6041_v21 = vunpack.i.h.bf16 %v6039_v2 }
 0x21b   : > { %v2422_v13 = vld [vmem:[#allocation2 + $0x160] ss:$2 sm:$0xff]  ;;  %v2486_v14 = vld [vmem:[#allocation2 + $0x161] ss:$2 sm:$0xff]  ;;  %v2245_v16 = vadd.f32 %v7454_v5, %v2244_v7  ;;  %v3017_v18 = vld [vmem:[#allocation3 + $0x91] ss:$2 sm:$0xff]  ;;  %v6045_v22 = vunpack.i.l.bf16 %v6044_v6  ;;  %v6046_v25 = vunpack.i.h.bf16 %v6044_v6 }
 0x21c   : > { %v2246_v17 = vpop.f32.mrf.mxu0  ;;  %2955 = vst.msk [vmem:[#allocation3 + $0xa0] sm:$0xff] %vm2312_vm3, %v2923_v8  ;;  %v2814_v19 = vmax.f32 %v2718_v9, %v2772_v10  ;;  %v6132_v24 = vpack.i.bf16 %v3017_v18, %v3015_v11  ;;  %v2527_v31 = vmax.f32 %v2422_v13, %v2486_v14  ;;  %v3590_v37 = vsel %vm1711_vm2, %v3574_v27, %v6040_v15  ;;  %v3111_v14 = vld [vmem:[#allocation3 + $0x84] ss:$2 sm:$0xff] }
 0x21d   : > { %v6049_v23 = vpop.permute.xlu0 %6048  ;;  %2360 = vst.msk [vmem:[#allocation2 + $0x178] sm:$0xff] %vm2312_vm3, %v2245_v16  ;;  %v3607_v41 = vsel %vm3606_vm4, %v6040_v15, %v6045_v22  ;;  %v3591_v42 = vsel %vm1711_vm2, %v3575_v34, %v6041_v21  ;;  %v3608_v48 = vsel %vm3606_vm4, %v6041_v21, %v6046_v25 }
 0x21e   : > { %v6050_v26 = vunpack.i.l.bf16 %v6049_v23  ;;  %v2249_v1 = vpop.f32.mrf.mxu0  ;;  %v2853_v28 = vmul.f32 %v7491_v29, %v2814_v19  ;;  %v6051_v32 = vunpack.i.h.bf16 %v6049_v23  ;;  %6133 = vrot.lane.b32.xlu1 %v6132_v24, %s6460_s30  ;;  %v3672_v7 = vpack.c.bf16 %v3591_v42, %v3590_v37  ;;  %v3143_v24 = vld [vmem:[#allocation3 + $0x85] ss:$2 sm:$0xff] }
 0x21f   : > { %v2250_v33 = vadd.f32 %v7454_v5, %v2249_v1  ;;  %v2582_v35 = vld [vmem:[#allocation2 + $0x162] ss:$2 sm:$0xff]  ;;  %v2678_v43 = vld [vmem:[#allocation2 + $0x163] ss:$2 sm:$0xff] }
 0x220   : > { %v2251_v36 = vpop.f32.mrf.mxu0  ;;  %v2892_v38 = vadd.f32 %v7506_v56, %v2853_v28  ;;  %v2623_v39 = vmax.f32 %v2527_v31, %v2582_v35  ;;  %v3623_v49 = vsel %vm1646_vm1, %v3607_v41, %v6050_v26  ;;  %v3624_v54 = vsel %vm1646_vm1, %v3608_v48, %v6051_v32  ;;  %v2774_v55 = vld [vmem:[#allocation2 + $0x164] ss:$2 sm:$0xff] }
 0x221   : > { %2361 = vst.msk [vmem:[#allocation2 + $0x180] sm:$0xff] %vm2312_vm3, %v2250_v33  ;;  %v7546_v40 = vpop.permute.xlu0 %6053 }
 0x222   : > { %v6056_v44 = vunpack.i.h.bf16 %v7546_v40  ;;  %v6055_v46 = vunpack.i.l.bf16 %v7546_v40  ;;  %v2252_v47 = vpop.f32.mrf.mxu0  ;;  %v2924_v45 = vmax.f32 %v2892_v38, 0.0  ;;  %v2719_v50 = vmax.f32 %v2623_v39, %v2678_v43 }
 0x223   : > { %v2253_v51 = vadd.f32 %v7454_v5, %v2252_v47  ;;  %v3049_v58 = vld [vmem:[#allocation3 + $0x92] ss:$2 sm:$0xff]  ;;  %v3081_v59 = vld [vmem:[#allocation3 + $0x93] ss:$2 sm:$0xff] }
 0x224   : > { %v2254_v57 = vpop.f32.mrf.mxu0  ;;  %v3640_v60 = vsel %vm3639_vm5, %v3623_v49, %v6055_v46  ;;  %v3641_v61 = vsel %vm3639_vm5, %v3624_v54, %v6056_v44  ;;  %2956 = vst.msk [vmem:[#allocation3 + $0xa8] sm:$0xff] %vm2312_vm3, %v2924_v45  ;;  %v2815_v62 = vmax.f32 %v2719_v50, %v2774_v55  ;;  %v2424_v63 = vld [vmem:[#allocation2 + $0x170] ss:$2 sm:$0xff]  ;;  %v2488_v0 = vld [vmem:[#allocation2 + $0x171] ss:$2 sm:$0xff]  ;;  %v6137_v2 = vpack.i.bf16 %v3049_v58, %v3047_v52 }
 0x225   : > { %2362 = vst.msk [vmem:[#allocation2 + $0x188] sm:$0xff] %vm2312_vm3, %v2253_v51  ;;  %v6142_v3 = vpack.i.bf16 %v3081_v59, %v3079_v53  ;;  %v3673_v4 = vpack.c.bf16 %v3641_v61, %v3640_v60  ;;  %v3113_v8 = vld [vmem:[#allocation3 + $0x94] ss:$2 sm:$0xff]  ;;  %v2528_v10 = vmax.f32 %v2424_v63, %v2488_v0  ;;  %v3145_v20 = vld [vmem:[#allocation3 + $0x95] ss:$2 sm:$0xff] }
 0x226   : > { %v2257_v6 = vpop.f32.mrf.mxu0  ;;  %v2854_v9 = vmul.f32 %v7491_v29, %v2815_v62  ;;  %6138 = vrot.lane.b32.xlu0 %v6137_v2, %s8298_s27  ;;  %v6147_v17 = vpack.i.bf16 %v3113_v8, %v3111_v14  ;;  %v6152_v30 = vpack.i.bf16 %v3145_v20, %v3143_v24 }
 0x227   : > { %v2258_v11 = vadd.f32 %v7454_v5, %v2257_v6  ;;  %6143 = vrot.lane.b32.xlu1 %v6142_v3, %s6461_s16  ;;  %3928 = vmatprep.mubr.bf16.mxu1 %v3673_v4 }
 0x228   : > { %v2584_v12 = vld [vmem:[#allocation2 + $0x172] ss:$2 sm:$0xff]  ;;  %v2259_v13 = vpop.f32.mrf.mxu0  ;;  %v2893_v15 = vadd.f32 %v7506_v56, %v2854_v9  ;;  %3929 = vmatmul.mubr.bf16.vlgmr.msra.gmra.mxu1 %v3672_v7  ;;  %v2680_v18 = vld [vmem:[#allocation2 + $0x173] ss:$2 sm:$0xff] }
 0x229   : > { %v2624_v16 = vmax.f32 %v2528_v10, %v2584_v12  ;;  %2363 = vst.msk [vmem:[#allocation2 + $0x190] sm:$0xff] %vm2312_vm3, %v2258_v11  ;;  %v2776_v27 = vld [vmem:[#allocation2 + $0x174] ss:$2 sm:$0xff] }
 0x22a   : > { %v2260_v19 = vpop.f32.mrf.mxu0  ;;  %v2925_v21 = vmax.f32 %v2893_v15, 0.0  ;;  %6148 = vrot.lane.b32.xlu0 %v6147_v17, %s8300_s17 }
 0x22b   : > { %v2720_v22 = vmax.f32 %v2624_v16, %v2680_v18  ;;  %v2261_v23 = vadd.f32 %v7454_v5, %v2260_v19  ;;  %v3019_v16 = vld [vmem:[#allocation3 + $0xa1] ss:$2 sm:$0xff] }
 0x22c   : > { %v2426_v25 = vld [vmem:[#allocation2 + $0x180] ss:$2 sm:$0xff]  ;;  %v2490_v26 = vld [vmem:[#allocation2 + $0x181] ss:$2 sm:$0xff]  ;;  %v2262_v1 = vpop.f32.mrf.mxu0  ;;  %2957 = vst.msk [vmem:[#allocation3 + $0xb0] sm:$0xff] %vm2312_vm3, %v2925_v21 }
 0x22d   : > { %v2816_v28 = vmax.f32 %v2720_v22, %v2776_v27  ;;  %2364 = vst.msk [vmem:[#allocation2 + $0x198] sm:$0xff] %vm2312_vm3, %v2261_v23  ;;  %v2529_v33 = vmax.f32 %v2426_v25, %v2490_v26  ;;  %v2971_v25 = vld [vmem:[#allocation3 + $0x20] ss:$2 sm:$0xff] }
 0x22e   : > { %v2265_v31 = vpop.f32.mrf.mxu0  ;;  %6153 = vrot.lane.b32.xlu0 %v6152_v30, %s6462_s23 }
 0x22f   : > { %v2855_v32 = vmul.f32 %v7491_v29, %v2816_v28  ;;  %v2266_v34 = vadd.f32 %v7454_v5, %v2265_v31 }
 0x230   : > { %v2586_v35 = vld [vmem:[#allocation2 + $0x182] ss:$2 sm:$0xff]  ;;  %v2267_v36 = vpop.f32.mrf.mxu0  ;;  %v2682_v39 = vld [vmem:[#allocation2 + $0x183] ss:$2 sm:$0xff]  ;;  %v6059_v52 = vpop.permute.xlu0 %6058 }
 0x231   : > { %v2894_v37 = vadd.f32 %v7506_v56, %v2855_v32  ;;  %v2625_v38 = vmax.f32 %v2529_v33, %v2586_v35  ;;  %2365 = vst.msk [vmem:[#allocation2 + $0x1a0] sm:$0xff] %vm2312_vm3, %v2266_v34  ;;  %v2778_v48 = vld [vmem:[#allocation2 + $0x184] ss:$2 sm:$0xff]  ;;  %v6061_v13 = vunpack.i.h.bf16 %v6059_v52  ;;  %v6060_v14 = vunpack.i.l.bf16 %v6059_v52 }
 0x232   : > { %v2268_v41 = vpop.f32.mrf.mxu0  ;;  %v2973_v32 = vld [vmem:[#allocation3 + $0x30] ss:$2 sm:$0xff]  ;;  %v6328_v35 = vld [vmem:[%s8281_s5 + $0xa0] sm:$0xff]  }
 0x233   : > { %v2926_v42 = vmax.f32 %v2894_v37, 0.0  ;;  %v2721_v43 = vmax.f32 %v2625_v38, %v2682_v39  ;;  %v2269_v47 = vadd.f32 %v7454_v5, %v2268_v41  ;;  %v3576_v33 = vsel %vm2312_vm3, %v2971_v25, %v6060_v14  ;;  %5427 = vmatprep.subr.bf16.mxu1 %v6328_v35 }
 0x234   : > { %v2428_v49 = vld [vmem:[#allocation2 + $0x190] ss:$2 sm:$0xff]  ;;  %v2492_v45 = vld [vmem:[#allocation2 + $0x191] ss:$2 sm:$0xff]  ;;  %v2270_v50 = vpop.f32.mrf.mxu0  ;;  %v3577_v36 = vsel %vm2312_vm3, %v2973_v32, %v6061_v13  ;;  %5428 = vmatpush3.bf16.msra.mxu1 %v6328_v35 }
 0x235   : > { %2958 = vst.msk [vmem:[#allocation3 + $0xb8] sm:$0xff] %vm2312_vm3, %v2926_v42  ;;  %v2817_v51 = vmax.f32 %v2721_v43, %v2778_v48  ;;  %2366 = vst.msk [vmem:[#allocation2 + $0x1a8] sm:$0xff] %vm2312_vm3, %v2269_v47  ;;  %v2530_v55 = vmax.f32 %v2428_v49, %v2492_v45  ;;  %v3083_v50 = vld [vmem:[#allocation3 + $0xa3] ss:$2 sm:$0xff] }
 0x236   : > { %v2273_v53 = vpop.f32.mrf.mxu0 }
 0x237   : > { %v2856_v54 = vmul.f32 %v7491_v29, %v2817_v51  ;;  %v2274_v57 = vadd.f32 %v7454_v5, %v2273_v53  ;;  %v3051_v51 = vld [vmem:[#allocation3 + $0xa2] ss:$2 sm:$0xff] }
 0x238   : > { %v2588_v58 = vld [vmem:[#allocation2 + $0x192] ss:$2 sm:$0xff]  ;;  %v2275_v59 = vpop.f32.mrf.mxu0  ;;  %v2684_v63 = vld [vmem:[#allocation2 + $0x193] ss:$2 sm:$0xff] }
 0x239   : > { %v2895_v60 = vadd.f32 %v7506_v56, %v2856_v54  ;;  %v2626_v61 = vmax.f32 %v2530_v55, %v2588_v58  ;;  %2367 = vst.msk [vmem:[#allocation2 + $0x1b0] sm:$0xff] %vm2312_vm3, %v2274_v57  ;;  %v6069_v62 = vpop.permute.xlu0 %6068  ;;  %v6064_v0 = vpop.permute.xlu1 %6063  ;;  %v2780_v6 = vld [vmem:[#allocation2 + $0x194] ss:$2 sm:$0xff] }
 0x23a   : > { %v2276_v2 = vpop.f32.mrf.mxu0  ;;  %v6071_v15 = vunpack.i.h.bf16 %v6069_v62  ;;  %v6070_v17 = vunpack.i.l.bf16 %v6069_v62  ;;  %v6066_v18 = vunpack.i.h.bf16 %v6064_v0  ;;  %v6065_v19 = vunpack.i.l.bf16 %v6064_v0 }
 0x23b   : > { %v2927_v3 = vmax.f32 %v2895_v60, 0.0  ;;  %v2722_v4 = vmax.f32 %v2626_v61, %v2684_v63  ;;  %v2277_v9 = vadd.f32 %v7454_v5, %v2276_v2 }
 0x23c   : > { %v2430_v7 = vld [vmem:[#allocation2 + $0x1a0] ss:$2 sm:$0xff]  ;;  %v2494_v8 = vld [vmem:[#allocation2 + $0x1a1] ss:$2 sm:$0xff]  ;;  %v2278_v10 = vpop.f32.mrf.mxu0  ;;  %v3021_v11 = vld [vmem:[#allocation3 + $0xb1] ss:$2 sm:$0xff]  ;;  %v3610_v38 = vsel %vm3606_vm4, %v6066_v18, %v6071_v15  ;;  %v3609_v39 = vsel %vm3606_vm4, %v6065_v19, %v6070_v17  ;;  %v3592_v43 = vsel %vm1711_vm2, %v3576_v33, %v6065_v19  ;;  %v3593_v60 = vsel %vm1711_vm2, %v3577_v36, %v6066_v18 }
 0x23d   : > { %2959 = vst.msk [vmem:[#allocation3 + $0xc0] sm:$0xff] %vm2312_vm3, %v2927_v3  ;;  %v2818_v12 = vmax.f32 %v2722_v4, %v2780_v6  ;;  %2368 = vst.msk [vmem:[#allocation2 + $0x1b8] sm:$0xff] %vm2312_vm3, %v2277_v9  ;;  %v6074_v20 = vpop.permute.xlu1 %6073  ;;  %v6157_v22 = vpack.i.bf16 %v3021_v11, %v3019_v16  ;;  %v2531_v24 = vmax.f32 %v2430_v7, %v2494_v8  ;;  %v3115_v15 = vld [vmem:[#allocation3 + $0xa4] ss:$2 sm:$0xff]  ;;  %v6329_v19 = vld [vmem:[%s8281_s5 + $0x98] sm:$0xff]  }
 0x23e   : > { %v2281_v21 = vpop.f32.mrf.mxu0  ;;  %v6076_v1 = vunpack.i.h.bf16 %v6074_v20  ;;  %v6075_v28 = vunpack.i.l.bf16 %v6074_v20  ;;  %v3675_v14 = vpack.c.bf16 %v3593_v60, %v3592_v43  ;;  %5429 = vmatprep.subr.bf16.mxu1 %v6329_v19 }
 0x23f   : > { %v2857_v23 = vmul.f32 %v7491_v29, %v2818_v12  ;;  %v2282_v27 = vadd.f32 %v7454_v5, %v2281_v21  ;;  %6158 = vrot.lane.b32.xlu0 %v6157_v22, %s6460_s30  ;;  %5430 = vmatpush3.bf16.msra.mxu1 %v6329_v19 }
 0x240   : > { %v2590_v26 = vld [vmem:[#allocation2 + $0x1a2] ss:$2 sm:$0xff]  ;;  %v2283_v30 = vpop.f32.mrf.mxu0  ;;  %v2686_v37 = vld [vmem:[#allocation2 + $0x1a3] ss:$2 sm:$0xff]  ;;  %v3625_v53 = vsel %vm1646_vm1, %v3609_v39, %v6075_v28  ;;  %v3626_v54 = vsel %vm1646_vm1, %v3610_v38, %v6076_v1 }
 0x241   : > { %v2896_v31 = vadd.f32 %v7506_v56, %v2857_v23  ;;  %v2627_v34 = vmax.f32 %v2531_v24, %v2590_v26  ;;  %2369 = vst.msk [vmem:[#allocation2 + $0x1c0] sm:$0xff] %vm2312_vm3, %v2282_v27  ;;  %v7601_v41 = vpop.permute.xlu1 %6078  ;;  %v2782_v52 = vld [vmem:[#allocation2 + $0x1a4] ss:$2 sm:$0xff]  ;;  %v3147_v1 = vld [vmem:[#allocation3 + $0xa5] ss:$2 sm:$0xff] }
 0x242   : > { %v2284_v42 = vpop.f32.mrf.mxu0  ;;  %v6081_v49 = vunpack.i.h.bf16 %v7601_v41  ;;  %v6080_v45 = vunpack.i.l.bf16 %v7601_v41 }
 0x243   : > { %v2928_v47 = vmax.f32 %v2896_v31, 0.0  ;;  %v2723_v48 = vmax.f32 %v2627_v34, %v2686_v37  ;;  %v2285_v55 = vadd.f32 %v7454_v5, %v2284_v42 }
 0x244   : > { %v2286_v57 = vpop.f32.mrf.mxu0  ;;  %v3085_v58 = vld [vmem:[#allocation3 + $0xb3] ss:$2 sm:$0xff]  ;;  %v3053_v59 = vld [vmem:[#allocation3 + $0xb2] ss:$2 sm:$0xff]  ;;  %v3642_v3 = vsel %vm3639_vm5, %v3625_v53, %v6080_v45  ;;  %v3643_v7 = vsel %vm3639_vm5, %v3626_v54, %v6081_v49 }
 0x245   : > { %2960 = vst.msk [vmem:[#allocation3 + $0xc8] sm:$0xff] %vm2312_vm3, %v2928_v47  ;;  %v2819_v61 = vmax.f32 %v2723_v48, %v2782_v52  ;;  %v2432_v62 = vld [vmem:[#allocation2 + $0x1b0] ss:$2 sm:$0xff]  ;;  %v2496_v63 = vld [vmem:[#allocation2 + $0x1b1] ss:$2 sm:$0xff]  ;;  %v6167_v0 = vpack.i.bf16 %v3085_v58, %v3083_v50  ;;  %v6162_v2 = vpack.i.bf16 %v3053_v59, %v3051_v51  ;;  %2370 = vst.msk [vmem:[#allocation2 + $0x1c8] sm:$0xff] %vm2312_vm3, %v2285_v55 }
 0x246   : > { %v2532_v4 = vmax.f32 %v2432_v62, %v2496_v63  ;;  %v2289_v6 = vpop.f32.mrf.mxu0  ;;  %v3117_v8 = vld [vmem:[#allocation3 + $0xb4] ss:$2 sm:$0xff]  ;;  %v3676_v11 = vpack.c.bf16 %v3643_v7, %v3642_v3  ;;  %v3149_v22 = vld [vmem:[#allocation3 + $0xb5] ss:$2 sm:$0xff] }
 0x247   : > { %v2858_v9 = vmul.f32 %v7491_v29, %v2819_v61  ;;  %v2290_v10 = vadd.f32 %v7454_v5, %v2289_v6  ;;  %6168 = vrot.lane.b32.xlu0 %v6167_v0, %s6461_s16  ;;  %6163 = vrot.lane.b32.xlu1 %v6162_v2, %s8298_s27  ;;  %v6172_v18 = vpack.i.bf16 %v3117_v8, %v3115_v15 }
 0x248   : > { %v2592_v12 = vld [vmem:[#allocation2 + $0x1b2] ss:$2 sm:$0xff]  ;;  %v2291_v13 = vpop.f32.mrf.mxu0  ;;  %3936 = vmatprep.mubr.bf16.mxu1 %v3676_v11  ;;  %v2688_v20 = vld [vmem:[#allocation2 + $0x1b3] ss:$2 sm:$0xff]  ;;  %v6177_v32 = vpack.i.bf16 %v3149_v22, %v3147_v1 }
 0x249   : > { %v2897_v16 = vadd.f32 %v7506_v56, %v2858_v9  ;;  %v2628_v17 = vmax.f32 %v2532_v4, %v2592_v12  ;;  %2371 = vst.msk [vmem:[#allocation2 + $0x1d0] sm:$0xff] %vm2312_vm3, %v2290_v10  ;;  %3937 = vmatmul.mubr.bf16.gmra.mxu1 %v3675_v14  ;;  %v2784_v25 = vld [vmem:[#allocation2 + $0x1b4] ss:$2 sm:$0xff] }
 0x24a   : > { %v2292_v21 = vpop.f32.mrf.mxu0  ;;  %v2975_v1 = vld [vmem:[#allocation3 + $0x40] ss:$2 sm:$0xff] }
 0x24b   : > { %v2929_v23 = vmax.f32 %v2897_v16, 0.0  ;;  %v2724_v24 = vmax.f32 %v2628_v17, %v2688_v20  ;;  %v2293_v27 = vadd.f32 %v7454_v5, %v2292_v21  ;;  %6173 = vrot.lane.b32.xlu1 %v6172_v18, %s8300_s17 }
 0x24c   : > { %v2294_v26 = vpop.f32.mrf.mxu0  ;;  %v2434_v30 = vld [vmem:[#allocation2 + $0x1c0] ss:$2 sm:$0xff]  ;;  %v2498_v31 = vld [vmem:[#allocation2 + $0x1c1] ss:$2 sm:$0xff] }
 0x24d   : > { %2961 = vst.msk [vmem:[#allocation3 + $0xd0] sm:$0xff] %vm2312_vm3, %v2929_v23  ;;  %v2820_v28 = vmax.f32 %v2724_v24, %v2784_v25  ;;  %2372 = vst.msk [vmem:[#allocation2 + $0x1d8] sm:$0xff] %vm2312_vm3, %v2293_v27  ;;  %v2533_v35 = vmax.f32 %v2434_v30, %v2498_v31  ;;  %v3023_v22 = vld [vmem:[#allocation3 + $0xc1] ss:$2 sm:$0xff]  ;;  %v6330_v23 = vld [vmem:[%s8281_s5 + $0x90] sm:$0xff]  }
 0x24e   : > { %v2297_v33 = vpop.f32.mrf.mxu0  ;;  %5431 = vmatprep.subr.bf16.mxu1 %v6330_v23 }
 0x24f   : > { %v2859_v34 = vmul.f32 %v7491_v29, %v2820_v28  ;;  %v2298_v36 = vadd.f32 %v7454_v5, %v2297_v33  ;;  %6178 = vrot.lane.b32.xlu1 %v6177_v32, %s6462_s23  ;;  %v2977_v32 = vld [vmem:[#allocation3 + $0x50] ss:$2 sm:$0xff]  ;;  %5432 = vmatpush3.bf16.msra.mxu1 %v6330_v23 }
 0x250   : > { %v2594_v37 = vld [vmem:[#allocation2 + $0x1c2] ss:$2 sm:$0xff]  ;;  %v2299_v38 = vpop.f32.mrf.mxu0  ;;  %v2690_v43 = vld [vmem:[#allocation2 + $0x1c3] ss:$2 sm:$0xff]  ;;  %v6084_v61 = vpop.permute.xlu1 %6083 }
 0x251   : > { %v2898_v39 = vadd.f32 %v7506_v56, %v2859_v34  ;;  %v2629_v42 = vmax.f32 %v2533_v35, %v2594_v37  ;;  %2373 = vst.msk [vmem:[#allocation2 + $0x1e0] sm:$0xff] %vm2312_vm3, %v2298_v36  ;;  %v2786_v52 = vld [vmem:[#allocation2 + $0x1c4] ss:$2 sm:$0xff]  ;;  %v6085_v12 = vunpack.i.l.bf16 %v6084_v61  ;;  %v6086_v19 = vunpack.i.h.bf16 %v6084_v61 }
 0x252   : > { %v2300_v47 = vpop.f32.mrf.mxu0 }
 0x253   : > { %v2930_v48 = vmax.f32 %v2898_v39, 0.0  ;;  %v2725_v50 = vmax.f32 %v2629_v42, %v2690_v43  ;;  %v2301_v51 = vadd.f32 %v7454_v5, %v2300_v47  ;;  %v3578_v33 = vsel %vm2312_vm3, %v2975_v1, %v6085_v12 }
 0x254   : > { %v2436_v53 = vld [vmem:[#allocation2 + $0x1d0] ss:$2 sm:$0xff]  ;;  %v2500_v54 = vld [vmem:[#allocation2 + $0x1d1] ss:$2 sm:$0xff]  ;;  %v2302_v55 = vpop.f32.mrf.mxu0  ;;  %v3579_v36 = vsel %vm2312_vm3, %v2977_v32, %v6086_v19 }
 0x255   : > { %2962 = vst.msk [vmem:[#allocation3 + $0xd8] sm:$0xff] %vm2312_vm3, %v2930_v48  ;;  %v2821_v57 = vmax.f32 %v2725_v50, %v2786_v52  ;;  %2374 = vst.msk [vmem:[#allocation2 + $0x1e8] sm:$0xff] %vm2312_vm3, %v2301_v51  ;;  %v2534_v60 = vmax.f32 %v2436_v53, %v2500_v54  ;;  %v6331_v53 = vld [vmem:[%s8281_s5 + $0x88] sm:$0xff]  }
 0x256   : > { %v2305_v58 = vpop.f32.mrf.mxu0  ;;  %5433 = vmatprep.subr.bf16.mxu1 %v6331_v53 }
 0x257   : > { %v2860_v59 = vmul.f32 %v7491_v29, %v2821_v57  ;;  %v2306_v62 = vadd.f32 %v7454_v5, %v2305_v58  ;;  %5434 = vmatpush3.bf16.msra.mxu1 %v6331_v53  ;;  %v3159_v53 = vld [vmem:[#allocation3 + $0x6] ss:$2 sm:$0xff] }
 0x258   : > { %v2596_v63 = vld [vmem:[#allocation2 + $0x1d2] ss:$2 sm:$0xff]  ;;  %v2307_v0 = vpop.f32.mrf.mxu0  ;;  %v2692_v6 = vld [vmem:[#allocation2 + $0x1d3] ss:$2 sm:$0xff] }
 0x259   : > { %v2899_v2 = vadd.f32 %v7506_v56, %v2860_v59  ;;  %v2630_v3 = vmax.f32 %v2534_v60, %v2596_v63  ;;  %2375 = vst.msk [vmem:[#allocation2 + $0x1f0] sm:$0xff] %vm2312_vm3, %v2306_v62  ;;  %v7643_v4 = vpop.permute.xlu0 %6088  ;;  %v2788_v10 = vld [vmem:[#allocation2 + $0x1d4] ss:$2 sm:$0xff]  ;;  %v6094_v11 = vpop.permute.xlu1 %6093  ;;  %v3087_v60 = vld [vmem:[#allocation3 + $0xc3] ss:$2 sm:$0xff] }
 0x25a   : > { %v2308_v7 = vpop.f32.mrf.mxu0  ;;  %v6090_v20 = vunpack.i.l.bf16 %v7643_v4  ;;  %v6091_v24 = vunpack.i.h.bf16 %v7643_v4  ;;  %v6096_v27 = vunpack.i.h.bf16 %v6094_v11  ;;  %v6095_v25 = vunpack.i.l.bf16 %v6094_v11  ;;  %v3055_v59 = vld [vmem:[#allocation3 + $0xc2] ss:$2 sm:$0xff] }
 0x25b   : > { %v2931_v8 = vmax.f32 %v2899_v2, 0.0  ;;  %v2726_v9 = vmax.f32 %v2630_v3, %v2692_v6  ;;  %v2309_v15 = vadd.f32 %v7454_v5, %v2308_v7 }
 0x25c   : > { %v2438_v13 = vld [vmem:[#allocation2 + $0x1e0] ss:$2 sm:$0xff]  ;;  %v2502_v14 = vld [vmem:[#allocation2 + $0x1e1] ss:$2 sm:$0xff]  ;;  %v2310_v16 = vpop.f32.mrf.mxu0  ;;  %v3025_v17 = vld [vmem:[#allocation3 + $0xd1] ss:$2 sm:$0xff]  ;;  %v3594_v43 = vsel %vm1711_vm2, %v3578_v33, %v6090_v20  ;;  %v3612_v48 = vsel %vm3606_vm4, %v6091_v24, %v6096_v27  ;;  %v3611_v50 = vsel %vm3606_vm4, %v6090_v20, %v6095_v25  ;;  %v3595_v4 = vsel %vm1711_vm2, %v3579_v36, %v6091_v24 }
 0x25d   : > { %2963 = vst.msk [vmem:[#allocation3 + $0xe0] sm:$0xff] %vm2312_vm3, %v2931_v8  ;;  %v2822_v18 = vmax.f32 %v2726_v9, %v2788_v10  ;;  %v6099_v21 = vpop.permute.xlu0 %6098  ;;  %v6182_v5 = vpack.i.bf16 %v3025_v17, %v3023_v22  ;;  %v2535_v28 = vmax.f32 %v2438_v13, %v2502_v14  ;;  %v3119_v17 = vld [vmem:[#allocation3 + $0xc4] ss:$2 sm:$0xff]  ;;  %v3151_v27 = vld [vmem:[#allocation3 + $0xc5] ss:$2 sm:$0xff] }
 0x25e   : > { %2377 = vst.msk [vmem:[#allocation2 + $0x1f8] sm:$0xf] %vm2376_vm6, %v2309_v15  ;;  %v6101_v30 = vunpack.i.h.bf16 %v6099_v21  ;;  %v6100_v31 = vunpack.i.l.bf16 %v6099_v21  ;;  %v3678_v15 = vpack.c.bf16 %v3595_v4, %v3594_v43 }
 0x25f   : > { %v2861_v26 = vmul.f32 %v7491_v29, %v2822_v18  ;;  %6183 = vrot.lane.b32.xlu1 %v6182_v5, %s6460_s30 }
 0x260   : > { %v2598_v34 = vld [vmem:[#allocation2 + $0x1e2] ss:$2 sm:$0xff]  ;;  %v2504_v39 = vld [vmem:[#allocation2 + $0x1f1] ss:$2 sm:$0xf]  ;;  %v3627_v57 = vsel %vm1646_vm1, %v3611_v50, %v6100_v31  ;;  %v3628_v58 = vsel %vm1646_vm1, %v3612_v48, %v6101_v30 }
 0x261   : > { %v2900_v35 = vadd.f32 %v7506_v56, %v2861_v26  ;;  %v2631_v37 = vmax.f32 %v2535_v28, %v2598_v34  ;;  %v2440_v38 = vld [vmem:[#allocation2 + $0x1f0] ss:$2 sm:$0xf]  ;;  %v7658_v42 = vpop.permute.xlu0 %6103  ;;  %v2694_v47 = vld [vmem:[#allocation2 + $0x1e3] ss:$2 sm:$0xff] }
 0x262   : > { %v6106_v51 = vunpack.i.h.bf16 %v7658_v42  ;;  %v6105_v52 = vunpack.i.l.bf16 %v7658_v42  ;;  %v2790_v61 = vld [vmem:[#allocation2 + $0x1e4] ss:$2 sm:$0xff]  ;;  %v2536_v62 = vmax.f32 %v2440_v38, %v2504_v39 }
 0x263   : > { %v2932_v54 = vmax.f32 %v2900_v35, 0.0  ;;  %v2727_v55 = vmax.f32 %v2631_v37, %v2694_v47  ;;  %v3161_v47 = vld [vmem:[#allocation3 + $0x16] ss:$2 sm:$0xff] }
 0x264   : > { %v3057_v63 = vld [vmem:[#allocation3 + $0xd2] ss:$2 sm:$0xff]  ;;  %v3089_v0 = vld [vmem:[#allocation3 + $0xd3] ss:$2 sm:$0xff]  ;;  %v3644_v2 = vsel %vm3639_vm5, %v3627_v57, %v6105_v52  ;;  %v3645_v3 = vsel %vm3639_vm5, %v3628_v58, %v6106_v51 }
 0x265   : > { %2964 = vst.msk [vmem:[#allocation3 + $0xe8] sm:$0xff] %vm2312_vm3, %v2932_v54  ;;  %v2823_v6 = vmax.f32 %v2727_v55, %v2790_v61  ;;  %v2600_v7 = vld [vmem:[#allocation2 + $0x1f2] ss:$2 sm:$0xf]  ;;  %v6187_v8 = vpack.i.bf16 %v3057_v63, %v3055_v59  ;;  %v6192_v9 = vpack.i.bf16 %v3089_v0, %v3087_v60  ;;  %v3679_v10 = vpack.c.bf16 %v3645_v3, %v3644_v2  ;;  %v3153_v22 = vld [vmem:[#allocation3 + $0xd5] ss:$2 sm:$0xff] }
 0x266   : > { %v2632_v11 = vmax.f32 %v2536_v62, %v2600_v7  ;;  %v3121_v12 = vld [vmem:[#allocation3 + $0xd4] ss:$2 sm:$0xff]  ;;  %v2696_v14 = vld [vmem:[#allocation2 + $0x1f3] ss:$2 sm:$0xf]  ;;  %v6202_v25 = vpack.i.bf16 %v3153_v22, %v3151_v27  ;;  %v6232_v54 = vpack.i.bf16 %v3161_v47, %v3159_v53 }
 0x267   : > { %v2862_v13 = vmul.f32 %v7491_v29, %v2823_v6  ;;  %6188 = vrot.lane.b32.xlu0 %v6187_v8, %s8298_s27  ;;  %6193 = vrot.lane.b32.xlu1 %v6192_v9, %s6461_s16  ;;  %v2792_v19 = vld [vmem:[#allocation2 + $0x1f4] ss:$2 sm:$0xf]  ;;  %v6197_v20 = vpack.i.bf16 %v3121_v12, %v3119_v17  ;;  %v2979_v8 = vld [vmem:[#allocation3 + $0x60] ss:$2 sm:$0xff] }
 0x268   : > { %v2728_v16 = vmax.f32 %v2632_v11, %v2696_v14  ;;  %3944 = vmatprep.mubr.bf16.mxu1 %v3679_v10  ;;  %v3169_v61 = vld [vmem:[#allocation3 + $0x56] ss:$2 sm:$0xff]  ;;  %v3167_v7 = vld [vmem:[#allocation3 + $0x46] ss:$2 sm:$0xff] }
 0x269   : > { %v2901_v18 = vadd.f32 %v7506_v56, %v2862_v13  ;;  %3945 = vmatmul.mubr.bf16.gmra.mxu1 %v3678_v15  ;;  %v3165_v3 = vld [vmem:[#allocation3 + $0x36] ss:$2 sm:$0xff]  ;;  %v6242_v10 = vpack.i.bf16 %v3169_v61, %v3167_v7  ;;  %v3163_v11 = vld [vmem:[#allocation3 + $0x26] ss:$2 sm:$0xff] }
 0x26a   : > { %v2824_v21 = vmax.f32 %v2728_v16, %v2792_v19  ;;  %v2981_v9 = vld [vmem:[#allocation3 + $0x70] ss:$2 sm:$0xff]  ;;  %v6237_v15 = vpack.i.bf16 %v3165_v3, %v3163_v11 }
 0x26b   : > { %v2933_v23 = vmax.f32 %v2901_v18, 0.0  ;;  %6198 = vrot.lane.b32.xlu0 %v6197_v20, %s8300_s17  ;;  %v3177_v16 = vld [vmem:[#allocation3 + $0x96] ss:$2 sm:$0xff] }
 0x26c   : > { %v2863_v24 = vmul.f32 %v7491_v29, %v2824_v21  ;;  %v6332_v29 = vld [vmem:[%s8281_s5 + $0x80] sm:$0xff]  }
 0x26d   : > { %2965 = vst.msk [vmem:[#allocation3 + $0xf0] sm:$0xff] %vm2312_vm3, %v2933_v23  ;;  %5435 = vmatprep.subr.bf16.mxu1 %v6332_v29  ;;  %v3027_v35 = vld [vmem:[#allocation3 + $0xe1] ss:$2 sm:$0xff]  ;;  %v3173_v21 = vld [vmem:[#allocation3 + $0x76] ss:$2 sm:$0xff] }
 0x26e   : > { %v2902_v5 = vadd.f32 %v7506_v56, %v2863_v24  ;;  %5436 = vmatpush3.bf16.msra.mxu1 %v6332_v29  ;;  %v3175_v24 = vld [vmem:[#allocation3 + $0x86] ss:$2 sm:$0xff] }
 0x26f   : > { %6203 = vrot.lane.b32.xlu0 %v6202_v25, %s6462_s23 }
 0x270   : > { %v2934_v26 = vmax.f32 %v2902_v5, 0.0  ;;  %v6109_v56 = vpop.permute.xlu0 %6108  ;;  %v6252_v5 = vpack.i.bf16 %v3177_v16, %v3175_v24 }
 0x271   : > { %v6111_v57 = vunpack.i.h.bf16 %v6109_v56  ;;  %v6110_v58 = vunpack.i.l.bf16 %v6109_v56 }
 0x272   : > { %2966 = vst.msk [vmem:[#allocation3 + $0xf8] sm:$0xf] %vm2376_vm6, %v2934_v26  ;;  %v3171_v26 = vld [vmem:[#allocation3 + $0x66] ss:$2 sm:$0xff] }
 0x273   : > { %v3581_v12 = vsel %vm2312_vm3, %v2981_v9, %v6111_v57  ;;  %v3580_v13 = vsel %vm2312_vm3, %v2979_v8, %v6110_v58 }
 0x274   : > { %v3091_v1 = vld [vmem:[#allocation3 + $0xe3] ss:$2 sm:$0xff]  ;;  %v3093_v28 = vld [vmem:[#allocation3 + $0xf3] ss:$2 sm:$0x7] }
 0x275   : > { %v6212_v30 = vpack.i.bf16 %v3093_v28, %v3091_v1  ;;  %v3059_v31 = vld [vmem:[#allocation3 + $0xe2] ss:$2 sm:$0xff]  ;;  %v3061_v32 = vld [vmem:[#allocation3 + $0xf2] ss:$2 sm:$0x7] }
 0x276   : > { %v6207_v33 = vpack.i.bf16 %v3061_v32, %v3059_v31  ;;  %v3029_v34 = vld [vmem:[#allocation3 + $0xf1] ss:$2 sm:$0x7]  ;;  %v3123_v37 = vld [vmem:[#allocation3 + $0xe4] ss:$2 sm:$0xff] }
 0x277   : > { %6213 = vrot.lane.b32.xlu0 %v6212_v30, %s6461_s16  ;;  %v6217_v36 = vpack.i.bf16 %v3029_v34, %v3027_v35  ;;  %v3155_v55 = vld [vmem:[#allocation3 + $0xe5] ss:$2 sm:$0xff]  ;;  %v6247_v30 = vpack.i.bf16 %v3173_v21, %v3171_v26  ;;  %v3185_v32 = vld [vmem:[#allocation3 + $0xd6] ss:$2 sm:$0xff]  ;;  %v3183_v34 = vld [vmem:[#allocation3 + $0xc6] ss:$2 sm:$0xff] }
 0x278   : > { %6208 = vrot.lane.b32.xlu1 %v6207_v33, %s8298_s27  ;;  %v3181_v33 = vld [vmem:[#allocation3 + $0xb6] ss:$2 sm:$0xff]  ;;  %v6262_v56 = vpack.i.bf16 %v3185_v32, %v3183_v34  ;;  %v3179_v35 = vld [vmem:[#allocation3 + $0xa6] ss:$2 sm:$0xff]  ;;  %s8313_s16 = smov 96   ;;  %s6465_s27 = smov [#allocation7]  }
 0x279   : > { %v3125_v38 = vld [vmem:[#allocation3 + $0xf4] ss:$2 sm:$0x7]  ;;  %v6114_v39 = vpop.permute.xlu1 %6113  ;;  %v3157_v48 = vld [vmem:[#allocation3 + $0xf5] ss:$2 sm:$0x7]  ;;  %v6119_v50 = vpop.permute.xlu0 %6118 }
 0x27a   : > { %v6222_v43 = vpack.i.bf16 %v3125_v38, %v3123_v37  ;;  %v6227_v60 = vpack.i.bf16 %v3157_v48, %v3155_v55  ;;  %v6121_v62 = vunpack.i.h.bf16 %v6119_v50  ;;  %v6120_v63 = vunpack.i.l.bf16 %v6119_v50  ;;  %v3189_v37 = vld [vmem:[#allocation3 + $0xf6] ss:$2 sm:$0x7]  ;;  %v3187_v38 = vld [vmem:[#allocation3 + $0xe6] ss:$2 sm:$0xff]  ;;  %s6398_s0 = sshll.u32 %s6465_s27, 4  ;;  %s6399_s0 = int_to_ptr.vmem [resolvable:$false] %s6398_s0 }
 0x27b   : > { %6218 = vrot.lane.b32.xlu0 %v6217_v36, %s6460_s30  ;;  %v6116_v0 = vunpack.i.h.bf16 %v6114_v39  ;;  %v6115_v2 = vunpack.i.l.bf16 %v6114_v39  ;;  %v6257_v36 = vpack.i.bf16 %v3181_v33, %v3179_v35  ;;  %v6267_v39 = vpack.i.bf16 %v3189_v37, %v3187_v38  ;;  %v2989_v32 = vld [vmem:[#allocation3 + $0xb0] ss:$2 sm:$0xff]  ;;  %s8312_s30 = smov 64   ;;  %s6400_s22 = scalar_lea.vmem %s6399_s0, 32 }
 0x27c   : > { %6223 = vrot.lane.b32.xlu1 %v6222_v43, %s8300_s17  ;;  %s485_s17 = sand.u32 1, %s6446_s19  }
 0x27d   : > { %v6124_v59 = vpop.permute.xlu1 %6123  ;;  %v3614_v17 = vsel %vm3606_vm4, %v6116_v0, %v6121_v62  ;;  %v3613_v18 = vsel %vm3606_vm4, %v6115_v2, %v6120_v63  ;;  %v3596_v27 = vsel %vm1711_vm2, %v3580_v13, %v6115_v2  ;;  %v3597_v25 = vsel %vm1711_vm2, %v3581_v12, %v6116_v0  ;;  %v2983_v62 = vld [vmem:[#allocation3 + $0x80] ss:$2 sm:$0xff]  ;;  %v2985_v63 = vld [vmem:[#allocation3 + $0x90] ss:$2 sm:$0xff]  ;;  %s486_s29 = scalar_lea.vmem [#allocation7], %s485_s17 }
 0x27e   : > { %v6126_v4 = vunpack.i.h.bf16 %v6124_v59  ;;  %v6125_v6 = vunpack.i.l.bf16 %v6124_v59  ;;  %v3681_v29 = vpack.c.bf16 %v3597_v25, %v3596_v27 }
 0x27f   : > { %6233 = vrot.lane.b32.xlu0 %v6232_v54, %s8296_s20 }
 0x280   : > { %6228 = vrot.lane.b32.xlu1 %v6227_v60, %s6462_s23  ;;  %v3629_v22 = vsel %vm1646_vm1, %v3613_v18, %v6125_v6  ;;  %v3630_v23 = vsel %vm1646_vm1, %v3614_v17, %v6126_v4  ;;  %s8314_s23 = smov 32  }
 0x281   : > { %v7699_v14 = vpop.permute.xlu1 %6128 }
 0x282   : > { %v6131_v19 = vunpack.i.h.bf16 %v7699_v14  ;;  %v6130_v20 = vunpack.i.l.bf16 %v7699_v14 }
 0x283   : > { %6243 = vrot.lane.b32.xlu0 %v6242_v10, %s8296_s20 }
 0x284   : > { %6238 = vrot.lane.b32.xlu1 %v6237_v15, %s8296_s20  ;;  %v3646_v1 = vsel %vm3639_vm5, %v3629_v22, %v6130_v20  ;;  %v3647_v28 = vsel %vm3639_vm5, %v3630_v23, %v6131_v19 }
 0x285   : > { %v3682_v31 = vpack.c.bf16 %v3647_v28, %v3646_v1 }
 0x287   : > { %6253 = vrot.lane.b32.xlu0 %v6252_v5, %s8296_s20  ;;  %3952 = vmatprep.mubr.bf16.mxu1 %v3682_v31  ;;  %v2987_v31 = vld [vmem:[#allocation3 + $0xa0] ss:$2 sm:$0xff] }
 0x288   : > { %6248 = vrot.lane.b32.xlu1 %v6247_v30, %s8296_s20  ;;  %3953 = vmatmul.mubr.bf16.gmra.mxu1 %v3681_v29 }
 0x28b   : > { %6263 = vrot.lane.b32.xlu0 %v6262_v56, %s8296_s20 }
 0x28c   : > { %6258 = vrot.lane.b32.xlu1 %v6257_v36, %s8296_s20 }
 0x290   : > { %6268 = vrot.lane.b32.xlu1 %v6267_v39, %s8296_s20  ;;  %v6134_v43 = vpop.permute.xlu1 %6133  ;;  %s5050_s20 = scalar_lea.sflag [#allocation8], %s485_s17 }
 0x291   : > { %v6136_v50 = vunpack.i.h.bf16 %v6134_v43  ;;  %v6135_v53 = vunpack.i.l.bf16 %v6134_v43 }
 0x293   : > { %v3583_v0 = vsel %vm2312_vm3, %v2985_v63, %v6136_v50  ;;  %v3582_v2 = vsel %vm2312_vm3, %v2983_v62, %v6135_v53 }
 0x298   : > { %v6139_v47 = vpop.permute.xlu0 %6138 }
 0x299   : > { %v6144_v48 = vpop.permute.xlu1 %6143  ;;  %v6141_v55 = vunpack.i.h.bf16 %v6139_v47  ;;  %v6140_v57 = vunpack.i.l.bf16 %v6139_v47 }
 0x29a   : > { %v6146_v58 = vunpack.i.h.bf16 %v6144_v48  ;;  %v6145_v59 = vunpack.i.l.bf16 %v6144_v48 }
 0x29b   : > { %v3598_v11 = vsel %vm1711_vm2, %v3582_v2, %v6140_v57  ;;  %v3599_v12 = vsel %vm1711_vm2, %v3583_v0, %v6141_v55 }
 0x29c   : > { %v6149_v54 = vpop.permute.xlu0 %6148  ;;  %v3616_v4 = vsel %vm3606_vm4, %v6141_v55, %v6146_v58  ;;  %v3615_v6 = vsel %vm3606_vm4, %v6140_v57, %v6145_v59  ;;  %v3684_v17 = vpack.c.bf16 %v3599_v12, %v3598_v11 }
 0x29d   : > { %v6151_v60 = vunpack.i.h.bf16 %v6149_v54  ;;  %v6150_v61 = vunpack.i.l.bf16 %v6149_v54 }
 0x29f   : > { %v3631_v9 = vsel %vm1646_vm1, %v3615_v6, %v6150_v61  ;;  %v3632_v10 = vsel %vm1646_vm1, %v3616_v4, %v6151_v60 }
 0x2a0   : > { %v7724_v3 = vpop.permute.xlu0 %6153 }
 0x2a1   : > { %v6156_v7 = vunpack.i.h.bf16 %v7724_v3  ;;  %v6155_v8 = vunpack.i.l.bf16 %v7724_v3 }
 0x2a3   : > { %v3648_v13 = vsel %vm3639_vm5, %v3631_v9, %v6155_v8  ;;  %v3649_v15 = vsel %vm3639_vm5, %v3632_v10, %v6156_v7  ;;  %v2991_v9 = vld [vmem:[#allocation3 + $0xc0] ss:$2 sm:$0xff]  ;;  %v2993_v10 = vld [vmem:[#allocation3 + $0xd0] ss:$2 sm:$0xff] }
 0x2a4   : > { %v3685_v16 = vpack.c.bf16 %v3649_v15, %v3648_v13 }
 0x2a6   : > { %3960 = vmatprep.mubr.bf16.mxu1 %v3685_v16 }
 0x2a7   : > { %3961 = vmatmul.mubr.bf16.gmra.mxu1 %v3684_v17 }
 0x2b1   : > { %v6159_v18 = vpop.permute.xlu0 %6158 }
 0x2b2   : > { %v6161_v23 = vunpack.i.h.bf16 %v6159_v18  ;;  %v6160_v24 = vunpack.i.l.bf16 %v6159_v18 }
 0x2b4   : > { %v3585_v29 = vsel %vm2312_vm3, %v2989_v32, %v6161_v23  ;;  %v3584_v33 = vsel %vm2312_vm3, %v2987_v31, %v6160_v24 }
 0x2b9   : > { %v6164_v21 = vpop.permute.xlu1 %6163  ;;  %v6169_v22 = vpop.permute.xlu0 %6168 }
 0x2ba   : > { %v6171_v25 = vunpack.i.h.bf16 %v6169_v22  ;;  %v6170_v5 = vunpack.i.l.bf16 %v6169_v22  ;;  %v6166_v26 = vunpack.i.h.bf16 %v6164_v21  ;;  %v6165_v1 = vunpack.i.l.bf16 %v6164_v21 }
 0x2bc   : > { %v3618_v56 = vsel %vm3606_vm4, %v6166_v26, %v6171_v25  ;;  %v3617_v35 = vsel %vm3606_vm4, %v6165_v1, %v6170_v5  ;;  %v3600_v43 = vsel %vm1711_vm2, %v3584_v33, %v6165_v1  ;;  %v3601_v47 = vsel %vm1711_vm2, %v3585_v29, %v6166_v26 }
 0x2bd   : > { %v6174_v27 = vpop.permute.xlu1 %6173  ;;  %v3687_v54 = vpack.c.bf16 %v3601_v47, %v3600_v43  ;;  %v2997_v43 = vld [vmem:[#allocation3 + $0xf0] ss:$2 sm:$0x7] }
 0x2be   : > { %v6176_v28 = vunpack.i.h.bf16 %v6174_v27  ;;  %v6175_v30 = vunpack.i.l.bf16 %v6174_v27 }
 0x2c0   : > { %v3633_v38 = vsel %vm1646_vm1, %v3617_v35, %v6175_v30  ;;  %v3634_v39 = vsel %vm1646_vm1, %v3618_v56, %v6176_v28 }
 0x2c1   : > { %v7742_v34 = vpop.permute.xlu1 %6178 }
 0x2c2   : > { %v6181_v36 = vunpack.i.h.bf16 %v7742_v34  ;;  %v6180_v37 = vunpack.i.l.bf16 %v7742_v34 }
 0x2c4   : > { %v3650_v48 = vsel %vm3639_vm5, %v3633_v38, %v6180_v37  ;;  %v3651_v50 = vsel %vm3639_vm5, %v3634_v39, %v6181_v36  ;;  %v2995_v39 = vld [vmem:[#allocation3 + $0xe0] ss:$2 sm:$0xff] }
 0x2c5   : > { %v3688_v53 = vpack.c.bf16 %v3651_v50, %v3650_v48 }
 0x2c7   : > { %3968 = vmatprep.mubr.bf16.mxu1 %v3688_v53 }
 0x2c8   : > { %3969 = vmatmul.mubr.bf16.gmra.mxu1 %v3687_v54 }
 0x2d1   : > { %v6184_v55 = vpop.permute.xlu1 %6183 }
 0x2d2   : > { %v6186_v59 = vunpack.i.h.bf16 %v6184_v55  ;;  %v6185_v60 = vunpack.i.l.bf16 %v6184_v55 }
 0x2d4   : > { %v3587_v11 = vsel %vm2312_vm3, %v2993_v10, %v6186_v59  ;;  %v3586_v12 = vsel %vm2312_vm3, %v2991_v9, %v6185_v60 }
 0x2d9   : > { %v6189_v57 = vpop.permute.xlu0 %6188  ;;  %v6194_v58 = vpop.permute.xlu1 %6193 }
 0x2da   : > { %v6191_v62 = vunpack.i.h.bf16 %v6189_v57  ;;  %v6190_v63 = vunpack.i.l.bf16 %v6189_v57  ;;  %v6196_v0 = vunpack.i.h.bf16 %v6194_v58  ;;  %v6195_v2 = vunpack.i.l.bf16 %v6194_v58 }
 0x2dc   : > { %v3620_v15 = vsel %vm3606_vm4, %v6191_v62, %v6196_v0  ;;  %v3619_v16 = vsel %vm3606_vm4, %v6190_v63, %v6195_v2  ;;  %v3602_v23 = vsel %vm1711_vm2, %v3586_v12, %v6190_v63  ;;  %v3603_v24 = vsel %vm1711_vm2, %v3587_v11, %v6191_v62 }
 0x2dd   : > { %v6199_v61 = vpop.permute.xlu0 %6198  ;;  %v3690_v26 = vpack.c.bf16 %v3603_v24, %v3602_v23 }
 0x2de   : > { %v6201_v4 = vunpack.i.h.bf16 %v6199_v61  ;;  %v6200_v6 = vunpack.i.l.bf16 %v6199_v61 }
 0x2e0   : > { %v3635_v21 = vsel %vm1646_vm1, %v3619_v16, %v6200_v6  ;;  %v3636_v22 = vsel %vm1646_vm1, %v3620_v15, %v6201_v4 }
 0x2e1   : > { %v7760_v13 = vpop.permute.xlu0 %6203 }
 0x2e2   : > { %v6206_v17 = vunpack.i.h.bf16 %v7760_v13  ;;  %v6205_v18 = vunpack.i.l.bf16 %v7760_v13 }
 0x2e4   : > { %v3652_v27 = vsel %vm3639_vm5, %v3635_v21, %v6205_v18  ;;  %v3653_v25 = vsel %vm3639_vm5, %v3636_v22, %v6206_v17 }
 0x2e5   : > { %v3691_v5 = vpack.c.bf16 %v3653_v25, %v3652_v27 }
 0x2e7   : > { %3976 = vmatprep.mubr.bf16.mxu1 %v3691_v5 }
 0x2e8   : > { %3977 = vmatmul.mubr.bf16.gmra.mxu1 %v3690_v26  ;;  %v5276_v13 = vpop.f32.mrf.mxu1 }
 0x2e9   : > { %v6214_v1 = vpop.permute.xlu0 %6213 }
 0x2ea   : > { %v6209_v28 = vpop.permute.xlu1 %6208  ;;  %v6216_v33 = vunpack.i.h.bf16 %v6214_v1  ;;  %v6215_v56 = vunpack.i.l.bf16 %v6214_v1 }
 0x2eb   : > { %v6211_v35 = vunpack.i.h.bf16 %v6209_v28  ;;  %v6210_v38 = vunpack.i.l.bf16 %v6209_v28 }
 0x2ed   : > { %v6219_v30 = vpop.permute.xlu0 %6218  ;;  %v3622_v59 = vsel %vm3606_vm4, %v6211_v35, %v6216_v33  ;;  %v3621_v60 = vsel %vm3606_vm4, %v6210_v38, %v6215_v56 }
 0x2ee   : > { %v6221_v31 = vunpack.i.h.bf16 %v6219_v30  ;;  %v6220_v32 = vunpack.i.l.bf16 %v6219_v30  ;;  %v6224_v29 = vpop.permute.xlu1 %6223 }
 0x2ef   : > { %v6226_v47 = vunpack.i.h.bf16 %v6224_v29  ;;  %v6225_v48 = vunpack.i.l.bf16 %v6224_v29 }
 0x2f0   : > { %v3589_v50 = vsel %vm2312_vm3, %v2997_v43, %v6221_v31  ;;  %v3588_v53 = vsel %vm2312_vm3, %v2995_v39, %v6220_v32 }
 0x2f1   : > { %v6234_v54 = vpop.permute.xlu0 %6233  ;;  %v3637_v63 = vsel %vm1646_vm1, %v3621_v60, %v6225_v48  ;;  %v3638_v0 = vsel %vm1646_vm1, %v3622_v59, %v6226_v47  ;;  %v3604_v2 = vsel %vm1711_vm2, %v3588_v53, %v6210_v38  ;;  %v3605_v4 = vsel %vm1711_vm2, %v3589_v50, %v6211_v35 }
 0x2f2   : > { %v6236_v55 = vunpack.i.h.bf16 %v6234_v54  ;;  %v6235_v57 = vunpack.i.l.bf16 %v6234_v54  ;;  %v7778_v58 = vpop.permute.xlu1 %6228  ;;  %v3693_v21 = vpack.c.bf16 %v3605_v4, %v3604_v2 }
 0x2f3   : > { %v6231_v61 = vunpack.i.h.bf16 %v7778_v58  ;;  %v6230_v62 = vunpack.i.l.bf16 %v7778_v58 }
 0x2f4   : > { %v3656_v6 = vsel %vm1581_vm0, %v6055_v46, %v6235_v57  ;;  %v3657_v9 = vsel %vm1581_vm0, %v6056_v44, %v6236_v55 }
 0x2f5   : > { %v3654_v10 = vsel %vm3639_vm5, %v3637_v63, %v6230_v62  ;;  %v3655_v11 = vsel %vm3639_vm5, %v3638_v0, %v6231_v61  ;;  %v6244_v12 = vpop.permute.xlu0 %6243  ;;  %v3674_v22 = vpack.c.bf16 %v3657_v9, %v3656_v6  ;;  %v6333_v6 = vld [vmem:[%s8285_s9 + $0x78] sm:$0xff]  }
 0x2f6   : > { %v6239_v15 = vpop.permute.xlu1 %6238  ;;  %v3694_v16 = vpack.c.bf16 %v3655_v11, %v3654_v10  ;;  %v6246_v46 = vunpack.i.h.bf16 %v6244_v12  ;;  %v6245_v27 = vunpack.i.l.bf16 %v6244_v12  ;;  %v6334_v9 = vld [vmem:[%s8285_s9 + $0x38] sm:$0xff]   ;;  %v6335_v10 = vld [vmem:[%s8285_s9 + $0x70] sm:$0xff]   ;;  %5337 = vmatprep.subr.bf16.mxu1 %v6333_v6 }
 0x2f7   : > { %v6241_v23 = vunpack.i.h.bf16 %v6239_v15  ;;  %v6240_v24 = vunpack.i.l.bf16 %v6239_v15  ;;  %v6336_v12 = vld [vmem:[%s8285_s9 + $0x30] sm:$0xff]   ;;  %v6337_v15 = vld [vmem:[%s8285_s9 + $0x68] sm:$0xff]  }
 0x2f8   : > { %3984 = vmatprep.mubr.bf16.mxu1 %v3694_v16  ;;  %v3660_v5 = vsel %vm1581_vm0, %v6105_v52, %v6245_v27  ;;  %v3661_v26 = vsel %vm1581_vm0, %v6106_v51, %v6246_v46  ;;  %v6341_v46 = vld [vmem:[%s8285_s9 + $0x58] sm:$0xff]  }
 0x2f9   : > { %3985 = vmatmul.mubr.bf16.gmra.mxu1 %v3693_v21  ;;  %v3658_v44 = vsel %vm1581_vm0, %v6080_v45, %v6240_v24  ;;  %v3659_v25 = vsel %vm1581_vm0, %v6081_v49, %v6241_v23  ;;  %v6254_v1 = vpop.permute.xlu0 %6253  ;;  %v3680_v29 = vpack.c.bf16 %v3661_v26, %v3660_v5  ;;  %v6338_v21 = vld [vmem:[%s8285_s9 + $0x28] sm:$0xff]   ;;  %v6340_v24 = vld [vmem:[%s8285_s9 + $0x20] sm:$0xff]   ;;  %v6344_v26 = vld [vmem:[%s8285_s9 + $0x10] sm:$0xff]  }
 0x2fa   : > { %v6249_v40 = vpop.permute.xlu1 %6248  ;;  %5437 = vmatprep.mubr.msk.bf16.mxu1 %vm3871_vm7, %v3674_v22  ;;  %v3677_v30 = vpack.c.bf16 %v3659_v25, %v3658_v44  ;;  %v6256_v56 = vunpack.i.h.bf16 %v6254_v1  ;;  %v6255_v41 = vunpack.i.l.bf16 %v6254_v1  ;;  %v6339_v22 = vld [vmem:[%s8285_s9 + $0x60] sm:$0xff]   ;;  %v6343_v44 = vld [vmem:[%s8285_s9 + $0x50] sm:$0xff]   ;;  %v6345_v1 = vld [vmem:[%s8285_s9 + $0x48] sm:$0xff]  }
 0x2fb   : > { %v6251_v33 = vunpack.i.h.bf16 %v6249_v40  ;;  %v6250_v45 = vunpack.i.l.bf16 %v6249_v40  ;;  %v6342_v40 = vld [vmem:[%s8285_s9 + $0x18] sm:$0xff]  }
 0x2fc   : > { %v3665_v34 = vsel %vm1581_vm0, %v6156_v7, %v6256_v56 }
 0x2fd   : > { %v3662_v52 = vsel %vm1581_vm0, %v6130_v20, %v6250_v45  ;;  %v3663_v35 = vsel %vm1581_vm0, %v6131_v19, %v6251_v33 }
 0x2fe   : > { %v6259_v28 = vpop.permute.xlu1 %6258  ;;  %v3683_v38 = vpack.c.bf16 %v3663_v35, %v3662_v52 }
 0x2ff   : > { %v6261_v31 = vunpack.i.h.bf16 %v6259_v28  ;;  %v6260_v32 = vunpack.i.l.bf16 %v6259_v28 }
 0x301   : > { %v3666_v49 = vsel %vm1581_vm0, %v6180_v37, %v6260_v32  ;;  %v3667_v42 = vsel %vm1581_vm0, %v6181_v36, %v6261_v31  ;;  %5438 = vmatmul.mubr.msk.bf16.vlgmr.msra.gmra.mxu1 %vm3871_vm7, %v3677_v30  ;;  %v3664_v37 = vsel %vm1581_vm0, %v6155_v8, %v6255_v41  ;;  %v6264_v36 = vpop.permute.xlu0 %6263  ;;  %v6346_v30 = vld [vmem:[%s8285_s9 + $0x8] sm:$0xff]  }
 0x302   : > { %v3689_v51 = vpack.c.bf16 %v3667_v42, %v3666_v49  ;;  %5441 = vmatprep.mubr.msk.bf16.mxu1 %vm3871_vm7, %v3680_v29  ;;  %v3686_v39 = vpack.c.bf16 %v3665_v34, %v3664_v37  ;;  %v6266_v43 = vunpack.i.h.bf16 %v6264_v36  ;;  %v6265_v47 = vunpack.i.l.bf16 %v6264_v36  ;;  %v6269_v20 = vpop.permute.xlu1 %6268  ;;  %5338 = vmatpush3.bf16.msra.mxu1 %v6334_v9  ;;  %v7925_v37 = vld [vmem:[%s8282_s6] ss:$0 sm:$0xff] }
 0x303   : > { %v6271_v7 = vunpack.i.h.bf16 %v6269_v20  ;;  %v6270_v8 = vunpack.i.l.bf16 %v6269_v20  ;;  %5339 = vmatprep.subr.bf16.mxu1 %v6335_v10 }
 0x304   : > { %v3668_v14 = vsel %vm1581_vm0, %v6205_v18, %v6265_v47  ;;  %v3669_v19 = vsel %vm1581_vm0, %v6206_v17, %v6266_v43  ;;  %v5277_v18 = vpop.f32.mrf.mxu1 }
 0x305   : > { %v3692_v3 = vpack.c.bf16 %v3669_v19, %v3668_v14  ;;  %v3670_v48 = vsel %vm1581_vm0, %v6230_v62, %v6270_v8  ;;  %v3671_v50 = vsel %vm1581_vm0, %v6231_v61, %v6271_v7  ;;  %v5278_v52 = vadd.f32 %v5277_v18, %v5276_v13 }
 0x306   : > { %v3695_v53 = vpack.c.bf16 %v3671_v50, %v3670_v48  ;;  %v7846_v17 = vpop.f32.mrf.mxu1  ;;  %5340 = vmatpush3.bf16.msra.mxu1 %v6336_v12 }
 0x307   : > { %5341 = vmatprep.subr.bf16.mxu1 %v6337_v15  ;;  %v3931_v47 = vadd.f32 %v5278_v52, %v7925_v37 }
 0x308   : > { %v7848_v54 = vpop.f32.mrf.mxu1 }
 0x309   : > { %5442 = vmatmul.mubr.msk.bf16.gmra.mxu1 %vm3871_vm7, %v3683_v38 }
 0x30a   : > { %5445 = vmatprep.mubr.msk.bf16.mxu1 %vm3871_vm7, %v3686_v39  ;;  %v5282_v55 = vpop.f32.mrf.mxu1  ;;  %5342 = vmatpush3.bf16.msra.mxu1 %v6338_v21  ;;  %v5281_v39 = vadd.f32 %v7848_v54, %v7846_v17 }
 0x30b   : > { %5343 = vmatprep.subr.bf16.mxu1 %v6339_v22 }
 0x30c   : > { %v5283_v57 = vpop.f32.mrf.mxu1  ;;  %v3934_v50 = vadd.f32 %v5281_v39, %v7925_v37 }
 0x30d   : > { %v5284_v42 = vadd.f32 %v5283_v57, %v5282_v55 }
 0x30e   : > { %v5285_v59 = vpop.f32.mrf.mxu1  ;;  %5344 = vmatpush3.bf16.msra.mxu1 %v6340_v24 }
 0x30f   : > { %5345 = vmatprep.subr.bf16.mxu1 %v6341_v46  ;;  %v3939_v36 = vadd.f32 %v5284_v42, %v7925_v37 }
 0x310   : > { %v5286_v60 = vpop.f32.mrf.mxu1 }
 0x311   : > { %5446 = vmatmul.mubr.msk.bf16.gmra.mxu1 %vm3871_vm7, %v3689_v51  ;;  %v5287_v34 = vadd.f32 %v5286_v60, %v5285_v59 }
 0x312   : > { %5449 = vmatprep.mubr.msk.bf16.mxu1 %vm3871_vm7, %v3692_v3  ;;  %5346 = vmatpush3.bf16.msra.mxu1 %v6342_v40 }
 0x313   : > { %5347 = vmatprep.subr.bf16.mxu1 %v6343_v44  ;;  %v3942_v3 = vadd.f32 %v5287_v34, %v7925_v37 }
 0x316   : > { %5348 = vmatpush3.bf16.msra.mxu1 %v6344_v26 }
 0x317   : > { %5349 = vmatprep.subr.bf16.mxu1 %v6345_v1 }
 0x319   : > { %5450 = vmatmul.mubr.msk.bf16.gmra.mxu1 %vm3871_vm7, %v3695_v53 }
 0x31a   : > { %5350 = vmatpush3.bf16.msra.mxu1 %v6346_v30 }
 0x329   : > { %v7850_v63 = vpop.f32.mrf.mxu1 }
 0x32b   : > { %v7852_v62 = vpop.f32.mrf.mxu1 }
 0x32c   : > { %v5290_v8 = vadd.f32 %v7852_v62, %v7850_v63 }
 0x32d   : > { %v7854_v58 = vpop.f32.mrf.mxu1 }
 0x32e   : > { %v3947_v59 = vadd.f32 %v5290_v8, %v7925_v37 }
 0x32f   : > { %v7856_v61 = vpop.f32.mrf.mxu1 }
 0x330   : > { %v5293_v55 = vadd.f32 %v7856_v61, %v7854_v58 }
 0x332   : > { %v3950_v58 = vadd.f32 %v5293_v55, %v7925_v37 }
 0x348   : > { %v5294_v0 = vpop.f32.mrf.mxu1 }
 0x34a   : > { %v5295_v2 = vpop.f32.mrf.mxu1 }
 0x34b   : > { %v5296_v19 = vadd.f32 %v5295_v2, %v5294_v0 }
 0x34c   : > { %v7858_v4 = vpop.f32.mrf.mxu1 }
 0x34d   : > { %v3955_v17 = vadd.f32 %v5296_v19, %v7925_v37 }
 0x34e   : > { %v5298_v11 = vpop.f32.mrf.mxu1 }
 0x34f   : > { %v5299_v13 = vadd.f32 %v5298_v11, %v7858_v4 }
 0x351   : > { %v3958_v0 = vadd.f32 %v5299_v13, %v7925_v37 }
 0x367   : > { %v7875_v16 = vpop.f32.mrf.mxu1 }
 0x369   : > { %v7883_v23 = vpop.f32.mrf.mxu1 }
 0x36a   : > { %v5302_v4 = vadd.f32 %v7883_v23, %v7875_v16 }
 0x36b   : > { %v7891_v27 = vpop.f32.mrf.mxu1 }
 0x36c   : > { %v3963_v23 = vadd.f32 %v5302_v4, %v7925_v37 }
 0x36d   : > { %v7899_v25 = vpop.f32.mrf.mxu1 }
 0x36e   : > { %v5305_v22 = vadd.f32 %v7899_v25, %v7891_v27 }
 0x388   : > { %v5306_v5 = vpop.f32.mrf.mxu1 }
 0x38a   : > { %v5307_v28 = vpop.f32.mrf.mxu1 }
 0x38b   : > { %v5308_v63 = vadd.f32 %v5307_v28, %v5306_v5 }
 0x38c   : > { %v5309_v31 = vpop.f32.mrf.mxu1 }
 0x38d   : > { %v3971_v11 = vadd.f32 %v5308_v63, %v7925_v37 }
 0x38e   : > { %v5310_v32 = vpop.f32.mrf.mxu1 }
 0x38f   : > { %v5311_v9 = vadd.f32 %v5310_v32, %v5309_v31  ;;  %v3966_v32 = vadd.f32 %v5305_v22, %v7925_v37 }
 0x391   : > { %v3974_v1 = vadd.f32 %v5311_v9, %v7925_v37 }
 0x3a8   : > { %v7910_v29 = vpop.f32.mrf.mxu1 }
 0x3aa   : > { %v7912_v33 = vpop.f32.mrf.mxu1 }
 0x3ab   : > { %v5314_v28 = vadd.f32 %v7912_v33, %v7910_v29 }
 0x3ac   : > { %v7914_v45 = vpop.f32.mrf.mxu1 }
 0x3ae   : > { %v7916_v56 = vpop.f32.mrf.mxu1 }
 0x3b9   : > { %v5318_v41 = vpop.f32.mrf.mxu1 }
 0x3bb   : > { %v5319_v49 = vpop.f32.mrf.mxu1 }
 0x3bc   : > { %v5320_v44 = vadd.f32 %v5319_v49, %v5318_v41 }
 0x3bd   : > { %v7918_v51 = vpop.f32.mrf.mxu1 }
 0x3bf   : > { %v7920_v35 = vpop.f32.mrf.mxu1 }
 0x3c0   : > { %v5323_v41 = vadd.f32 %v7920_v35, %v7918_v51 }
 0x3c1   : > { %v5439_v38 = vpop.f32.mrf.mxu1 }
 0x3c2   : > { %v4036_v43 = vadd.f32 %v5439_v38, %v3939_v36  ;;  %v3987_v36 = vadd.f32 %v5320_v44, %v7925_v37 }
 0x3c3   : > { %v4027_v14 = vpop.f32.mrf.mxu1 }
 0x3c4   : > { %4092 = vst.msk [vmem:[#allocation4 + $0x10] sm:$0xff] %vm1711_vm2, %v4036_v43  ;;  %v4028_v20 = vadd.f32 %v4027_v14, %v3931_v47  ;;  %v3979_v43 = vadd.f32 %v5314_v28, %v7925_v37  ;;  %v5317_v47 = vadd.f32 %v7916_v56, %v7914_v45  ;;  %v3990_v45 = vadd.f32 %v5323_v41, %v7925_v37  ;;  %v5199_v56 = vld [vmem:[%s8284_s8] ss:$0 sm:$0xff] }
 0x3c5   : > { %v5440_v7 = vpop.f32.mrf.mxu1 }
 0x3c6   : > { %4090 = vst.msk [vmem:[#allocation4] sm:$0xff] %vm1711_vm2, %v4028_v20  ;;  %v4039_v48 = vadd.f32 %v5440_v7, %v3942_v3  ;;  %v7973_v20 = vld [vmem:[%s8283_s7] ss:$0 sm:$0xff]  ;;  %v3982_v55 = vadd.f32 %v5317_v47, %v7925_v37 }
 0x3c7   : > { %v4030_v53 = vpop.f32.mrf.mxu1 }
 0x3c8   : > { %4093 = vst.msk [vmem:[#allocation4 + $0x18] sm:$0xff] %vm1711_vm2, %v4039_v48  ;;  %v4031_v18 = vadd.f32 %v4030_v53, %v3934_v50 }
 0x3c9   : > { %v5443_v54 = vpop.f32.mrf.mxu1 }
 0x3ca   : > { %4091 = vst.msk [vmem:[#allocation4 + $0x8] sm:$0xff] %vm1711_vm2, %v4031_v18  ;;  %v4052_v57 = vadd.f32 %v5443_v54, %v3955_v17 }
 0x3cb   : > { %v4043_v60 = vpop.f32.mrf.mxu1 }
 0x3cc   : > { %4096 = vst.msk [vmem:[#allocation4 + $0x30] sm:$0xff] %vm1711_vm2, %v4052_v57  ;;  %v4044_v62 = vadd.f32 %v4043_v60, %v3947_v59 }
 0x3cd   : > { %v5444_v2 = vpop.f32.mrf.mxu1 }
 0x3ce   : > { %4094 = vst.msk [vmem:[#allocation4 + $0x20] sm:$0xff] %vm1711_vm2, %v4044_v62  ;;  %v4055_v6 = vadd.f32 %v5444_v2, %v3958_v0 }
 0x3cf   : > { %v4046_v61 = vpop.f32.mrf.mxu1 }
 0x3d0   : > { %4097 = vst.msk [vmem:[#allocation4 + $0x38] sm:$0xff] %vm1711_vm2, %v4055_v6  ;;  %v4047_v10 = vadd.f32 %v4046_v61, %v3950_v58 }
 0x3d1   : > { %v4107_v12 = vld [vmem:[#allocation4] ss:$4 sm:$0xff]  ;;  %v4115_v15 = vld [vmem:[#allocation4 + $0x1] ss:$4 sm:$0xff]  ;;  %v5447_v21 = vpop.f32.mrf.mxu1  ;;  %v4127_v46 = vld [vmem:[#allocation4 + $0x2] ss:$4 sm:$0xff] }
 0x3d2   : > { %v4122_v24 = vmax.f32 %v4107_v12, %v4115_v15  ;;  %4095 = vst.msk [vmem:[#allocation4 + $0x28] sm:$0xff] %vm1711_vm2, %v4047_v10  ;;  %v4068_v16 = vadd.f32 %v5447_v21, %v3971_v11  ;;  %v4139_v30 = vld [vmem:[#allocation4 + $0x3] ss:$4 sm:$0xff] }
 0x3d3   : > { %v4059_v40 = vpop.f32.mrf.mxu1 }
 0x3d4   : > { %v4134_v5 = vmax.f32 %v4122_v24, %v4127_v46  ;;  %4100 = vst.msk [vmem:[#allocation4 + $0x50] sm:$0xff] %vm1711_vm2, %v4068_v16  ;;  %v4060_v26 = vadd.f32 %v4059_v40, %v3963_v23 }
 0x3d5   : > { %v5448_v27 = vpop.f32.mrf.mxu1  ;;  %v4151_v42 = vld [vmem:[#allocation4 + $0x4] ss:$4 sm:$0xff]  ;;  %v4163_v29 = vld [vmem:[#allocation4 + $0x5] ss:$4 sm:$0xff]  ;;  %v4175_v35 = vld [vmem:[#allocation4 + $0x6] ss:$4 sm:$0xff] }
 0x3d6   : > { %v4146_v25 = vmax.f32 %v4134_v5, %v4139_v30  ;;  %4098 = vst.msk [vmem:[#allocation4 + $0x40] sm:$0xff] %vm1711_vm2, %v4060_v26  ;;  %v4071_v31 = vadd.f32 %v5448_v27, %v3974_v1 }
 0x3d7   : > { %v4062_v52 = vpop.f32.mrf.mxu1 }
 0x3d8   : > { %v4158_v49 = vmax.f32 %v4146_v25, %v4151_v42  ;;  %4101 = vst.msk [vmem:[#allocation4 + $0x58] sm:$0xff] %vm1711_vm2, %v4071_v31  ;;  %v4063_v34 = vadd.f32 %v4062_v52, %v3966_v32 }
 0x3d9   : > { %v4109_v33 = vld [vmem:[#allocation4 + $0x20] ss:$4 sm:$0xff]  ;;  %v4117_v38 = vld [vmem:[#allocation4 + $0x21] ss:$4 sm:$0xff]  ;;  %v5451_v39 = vpop.f32.mrf.mxu1  ;;  %v4129_v3 = vld [vmem:[#allocation4 + $0x22] ss:$4 sm:$0xff] }
 0x3da   : > { %v4170_v14 = vmax.f32 %v4158_v49, %v4163_v29  ;;  %v4123_v19 = vmax.f32 %v4109_v33, %v4117_v38  ;;  %4099 = vst.msk [vmem:[#allocation4 + $0x48] sm:$0xff] %vm1711_vm2, %v4063_v34  ;;  %v4084_v51 = vadd.f32 %v5451_v39, %v3987_v36  ;;  %v4141_v53 = vld [vmem:[#allocation4 + $0x23] ss:$4 sm:$0xff] }
 0x3db   : > { %v4075_v7 = vpop.f32.mrf.mxu1  ;;  %v6347_v38 = vld [vmem:[%s8285_s9 + $0x40] sm:$0xff]  }
 0x3dc   : > { %v4182_v8 = vmax.f32 %v4170_v14, %v4175_v35  ;;  %v4135_v48 = vmax.f32 %v4123_v19, %v4129_v3  ;;  %4104 = vst.msk [vmem:[#allocation4 + $0x70] sm:$0xff] %vm1711_vm2, %v4084_v51  ;;  %v4076_v50 = vadd.f32 %v4075_v7, %v3979_v43  ;;  %v6348_v39 = vld [vmem:[%s8285_s9] sm:$0xff]   ;;  %5351 = vmatprep.subr.bf16.mxu1 %v6347_v38  ;;  %v6349_v14 = vld [vmem:[%s8285_s9 + $0xf8] sm:$0xff]  }
 0x3dd   : > { %v5452_v13 = vpop.f32.mrf.mxu1  ;;  %v4153_v57 = vld [vmem:[#allocation4 + $0x24] ss:$4 sm:$0xff]  ;;  %v4165_v0 = vld [vmem:[#allocation4 + $0x25] ss:$4 sm:$0xff]  ;;  %v4177_v9 = vld [vmem:[#allocation4 + $0x26] ss:$4 sm:$0xff]  ;;  %5352 = vmatpush3.bf16.msra.mxu1 %v6348_v39 }
 0x3de   : > { %v4193_v18 = vmul.f32 %v7973_v20, %v4182_v8  ;;  %v4147_v17 = vmax.f32 %v4135_v48, %v4141_v53  ;;  %4102 = vst.msk [vmem:[#allocation4 + $0x60] sm:$0xff] %vm1711_vm2, %v4076_v50  ;;  %v4087_v54 = vadd.f32 %v5452_v13, %v3990_v45  ;;  %5359 = vmatprep.subr.bf16.mxu1 %v6349_v14 }
 0x3df   : > { %v4078_v59 = vpop.f32.mrf.mxu1 }
 0x3e0   : > { %v4204_v60 = vadd.f32 %v5199_v56, %v4193_v18  ;;  %v4159_v63 = vmax.f32 %v4147_v17, %v4153_v57  ;;  %4106 = vst.msk [vmem:[#allocation4 + $0x78] sm:$0x7] %vm4105_vm8, %v4087_v54  ;;  %v4079_v62 = vadd.f32 %v4078_v59, %v3982_v55 }
 0x3e1   : > { %v4111_v2 = vld [vmem:[#allocation4 + $0x40] ss:$4 sm:$0xff]  ;;  %v4119_v4 = vld [vmem:[#allocation4 + $0x41] ss:$4 sm:$0xff]  ;;  %v4131_v10 = vld [vmem:[#allocation4 + $0x42] ss:$4 sm:$0xff] }
 0x3e2   : > { %v4208_v6 = vmax.f32 %v4204_v60, 0.0  ;;  %v4171_v58 = vmax.f32 %v4159_v63, %v4165_v0  ;;  %v4124_v61 = vmax.f32 %v4111_v2, %v4119_v4  ;;  %4103 = vst.msk [vmem:[#allocation4 + $0x68] sm:$0xff] %vm1711_vm2, %v4079_v62  ;;  %v4143_v12 = vld [vmem:[#allocation4 + $0x43] ss:$4 sm:$0xff] }
 0x3e4   : > { %4212 = vst.msk [vmem:[#allocation5] sm:$0xff] %vm1711_vm2, %v4208_v6  ;;  %v4183_v11 = vmax.f32 %v4171_v58, %v4177_v9  ;;  %v4136_v37 = vmax.f32 %v4124_v61, %v4131_v10 }
 0x3e5   : > { %v4155_v22 = vld [vmem:[#allocation4 + $0x44] ss:$4 sm:$0xff]  ;;  %v4167_v23 = vld [vmem:[#allocation4 + $0x45] ss:$4 sm:$0xff]  ;;  %v4179_v1 = vld [vmem:[#allocation4 + $0x46] ss:$4 sm:$0xff] }
 0x3e6   : > { %v4194_v15 = vmul.f32 %v7973_v20, %v4183_v11  ;;  %v4148_v21 = vmax.f32 %v4136_v37, %v4143_v12 }
 0x3e8   : > { %v4205_v24 = vadd.f32 %v5199_v56, %v4194_v15  ;;  %v4160_v16 = vmax.f32 %v4148_v21, %v4155_v22  ;;  %v6350_v15 = vld [vmem:[%s8285_s9 + $0xb8] sm:$0xff]   ;;  %v6351_v21 = vld [vmem:[%s8285_s9 + $0xf0] sm:$0xff]  }
 0x3e9   : > { %v4113_v46 = vld [vmem:[#allocation4 + $0x60] ss:$4 sm:$0x3f]  ;;  %v4121_v40 = vld [vmem:[#allocation4 + $0x61] ss:$4 sm:$0x3f] }
 0x3ea   : > { %v4209_v44 = vmax.f32 %v4205_v24, 0.0  ;;  %v4172_v5 = vmax.f32 %v4160_v16, %v4167_v23  ;;  %v4125_v26 = vmax.f32 %v4113_v46, %v4121_v40  ;;  %v4133_v28 = vld [vmem:[#allocation4 + $0x62] ss:$4 sm:$0x3f] }
 0x3eb   : > { %v4145_v25 = vld [vmem:[#allocation4 + $0x63] ss:$4 sm:$0x3f]  ;;  %v4157_v42 = vld [vmem:[#allocation4 + $0x64] ss:$4 sm:$0x3f] }
 0x3ec   : > { %4213 = vst.msk [vmem:[#allocation5 + $0x8] sm:$0xff] %vm1711_vm2, %v4209_v44  ;;  %v4184_v30 = vmax.f32 %v4172_v5, %v4179_v1  ;;  %v4137_v27 = vmax.f32 %v4125_v26, %v4133_v28  ;;  %v4169_v49 = vld [vmem:[#allocation4 + $0x65] ss:$4 sm:$0x3f] }
 0x3ed   : > { %v4181_v29 = vld [vmem:[#allocation4 + $0x66] ss:$4 sm:$0x3f] }
 0x3ee   : > { %v4195_v31 = vmul.f32 %v7973_v20, %v4184_v30  ;;  %v4149_v32 = vmax.f32 %v4137_v27, %v4145_v25  ;;  %v6352_v23 = vld [vmem:[%s8285_s9 + $0xb0] sm:$0xff]   ;;  %v6353_v46 = vld [vmem:[%s8285_s9 + $0xe8] sm:$0xff]   ;;  %v6355_v30 = vld [vmem:[%s8285_s9 + $0xe0] sm:$0xff]  }
 0x3ef   : > { %v6354_v28 = vld [vmem:[%s8285_s9 + $0xa8] sm:$0xff]   ;;  %v6356_v27 = vld [vmem:[%s8285_s9 + $0xa0] sm:$0xff]   ;;  %v6357_v25 = vld [vmem:[%s8285_s9 + $0xd8] sm:$0xff]  }
 0x3f0   : > { %v4206_v52 = vadd.f32 %v5199_v56, %v4195_v31  ;;  %v4161_v41 = vmax.f32 %v4149_v32, %v4157_v42  ;;  %v6358_v31 = vld [vmem:[%s8285_s9 + $0x98] sm:$0xff]   ;;  %v6359_v32 = vld [vmem:[%s8285_s9 + $0xd0] sm:$0xff]  }
 0x3f2   : > { %v4210_v34 = vmax.f32 %v4206_v52, 0.0  ;;  %v4173_v36 = vmax.f32 %v4161_v41, %v4169_v49  ;;  %v6360_v52 = vld [vmem:[%s8285_s9 + $0x90] sm:$0xff]   ;;  %v6361_v41 = vld [vmem:[%s8285_s9 + $0xc8] sm:$0xff]  }
 0x3f3   : > { %v4221_v7 = vld [vmem:[#allocation5 + $0x1] ss:$2 sm:$0xff]  ;;  %v4217_v58 = vld [vmem:[#allocation5] ss:$2 sm:$0xff] }
 0x3f4   : > { %4214 = vst.msk [vmem:[#allocation5 + $0x10] sm:$0xff] %vm1711_vm2, %v4210_v34  ;;  %v4185_v33 = vmax.f32 %v4173_v36, %v4181_v29  ;;  %v6362_v34 = vld [vmem:[%s8285_s9 + $0x88] sm:$0xff]   ;;  %v6363_v36 = vld [vmem:[%s8285_s9 + $0xc0] sm:$0xff]  }
 0x3f6   : > { %v4196_v43 = vmul.f32 %v7973_v20, %v4185_v33 }
 0x3f8   : > { %v4207_v47 = vadd.f32 %v5199_v56, %v4196_v43 }
 0x3fa   : > { %v4211_v19 = vmax.f32 %v4207_v47, 0.0  ;;  %v6364_v47 = vld [vmem:[%s8285_s9 + $0x80] sm:$0xff]  }
 0x3fb   : > { %v4225_v51 = vld [vmem:[#allocation5 + $0x2] ss:$2 sm:$0xff]  ;;  %v4227_v35 = vld [vmem:[#allocation5 + $0x12] ss:$2 sm:$0x7] }
 0x3fc   : > { %v6277_v3 = vpack.i.bf16 %v4227_v35, %v4225_v51  ;;  %v4223_v8 = vld [vmem:[#allocation5 + $0x11] ss:$2 sm:$0x7]  ;;  %4216 = vst.msk [vmem:[#allocation5 + $0x18] sm:$0x3f] %vm4215_vm9, %v4211_v19  ;;  %v6365_v51 = vld [vmem:[%s8285_s9 + $0x178] sm:$0xff]  }
 0x3fd   : > { %v6272_v48 = vpack.i.bf16 %v4223_v8, %v4221_v7  ;;  %v4229_v50 = vld [vmem:[#allocation5 + $0x3] ss:$2 sm:$0xff]  ;;  %v4231_v45 = vld [vmem:[#allocation5 + $0x13] ss:$2 sm:$0x7] }
 0x3fe   : > { %6278 = vrot.lane.b32.xlu1 %v6277_v3, %s8312_s30  ;;  %v6287_v20 = vpack.i.bf16 %v4231_v45, %v4229_v50  ;;  %v4245_v56 = vld [vmem:[#allocation5 + $0x7] ss:$2 sm:$0xff]  ;;  %v4241_v57 = vld [vmem:[#allocation5 + $0x6] ss:$2 sm:$0xff] }
 0x3ff   : > { %6273 = vrot.lane.b32.xlu0 %v6272_v48, %s8313_s16  ;;  %v4237_v53 = vld [vmem:[#allocation5 + $0x5] ss:$2 sm:$0xff]  ;;  %v4219_v6 = vld [vmem:[#allocation5 + $0x10] ss:$2 sm:$0x7]  ;;  %v6366_v48 = vld [vmem:[%s8285_s9 + $0x138] sm:$0xff]  }
 0x400   : > { %v4233_v40 = vld [vmem:[#allocation5 + $0x4] ss:$2 sm:$0xff] }
 0x401   : > { %v6367_v45 = vld [vmem:[%s8285_s9 + $0x170] sm:$0xff]  }
 0x402   : > { %6288 = vrot.lane.b32.xlu1 %v6287_v20, %s8314_s23 }
 0x403   : > { %v4247_v13 = vld [vmem:[#allocation5 + $0x17] ss:$2 sm:$0x7]  ;;  %v4243_v55 = vld [vmem:[#allocation5 + $0x16] ss:$2 sm:$0x7] }
 0x404   : > { %v4239_v18 = vld [vmem:[#allocation5 + $0x15] ss:$2 sm:$0x7]  ;;  %v6297_v17 = vpack.i.bf16 %v4247_v13, %v4245_v56  ;;  %v6292_v59 = vpack.i.bf16 %v4243_v55, %v4241_v57  ;;  %v4235_v44 = vld [vmem:[#allocation5 + $0x14] ss:$2 sm:$0x7] }
 0x405   : > { %v6282_v54 = vpack.i.bf16 %v4239_v18, %v4237_v53  ;;  %v6368_v56 = vld [vmem:[%s8285_s9 + $0x130] sm:$0xff]   ;;  %v6369_v53 = vld [vmem:[%s8285_s9 + $0x168] sm:$0xff]   ;;  %v6371_v18 = vld [vmem:[%s8285_s9 + $0x160] sm:$0xff]  }
 0x406   : > { %6298 = vrot.lane.b32.xlu1 %v6297_v17, %s8314_s23  ;;  %v6370_v13 = vld [vmem:[%s8285_s9 + $0x128] sm:$0xff]   ;;  %v6372_v17 = vld [vmem:[%s8285_s9 + $0x120] sm:$0xff]   ;;  %v6374_v55 = vld [vmem:[%s8285_s9 + $0x118] sm:$0xff]  }
 0x407   : > { %6283 = vrot.lane.b32.xlu0 %v6282_v54, %s8313_s16  ;;  %v6373_v54 = vld [vmem:[%s8285_s9 + $0x158] sm:$0xff]   ;;  %v6375_v57 = vld [vmem:[%s8285_s9 + $0x150] sm:$0xff]  }
 0x40b   : > { %6293 = vrot.lane.b32.xlu0 %v6292_v59, %s8312_s30  ;;  %v6376_v59 = vld [vmem:[%s8285_s9 + $0x110] sm:$0xff]   ;;  %s5062_s30 = sshll.u32 %s486_s29, 4  ;;  %s5063_s30 = int_to_ptr.vmem [resolvable:$true] %s5062_s30 }
 0x40c   : > { %s6394_s26 = scalar_lea.vmem %s5063_s30, 16  ;;  %p6401_p0 = scmp.lt.s32.totalorder %s5063_s30, %s6399_s0 }
 0x40d   : > { %p6395_p11 = scmp.ne.s32.totalorder %s5063_s30, %s6394_s26  ;;  %p6402_p1 = scmp.lt.s32.totalorder %s6400_s22, %s6394_s26 }
 0x40f   : > { %p6396_p12 = pnand %p6395_p11, %p6584_p5  ;;  %p6403_p2 = por %p6402_p1, %p6401_p0 }
 0x411   : > { %p6397_p13 = pneg %p6396_p12 }
 0x413   : > { %p6404_p3 = pnand %p6403_p2, %p6397_p13 }
 0x470   : > { %v8005_v60 = vpop.permute.xlu1 %6278 }
 0x471   : > { %v6281_v63 = vunpack.i.h.bf16 %v8005_v60  ;;  %v6280_v62 = vunpack.i.l.bf16 %v8005_v60  ;;  %v6274_v0 = vpop.permute.xlu0 %6273  ;;  %v6377_v60 = vld [vmem:[%s8285_s9 + $0x148] sm:$0xff]  }
 0x472   : > { %v6276_v2 = vunpack.i.h.bf16 %v6274_v0  ;;  %v6275_v4 = vunpack.i.l.bf16 %v6274_v0  ;;  %v6380_v0 = vld [vmem:[%s8285_s9 + $0x100] sm:$0xff]  }
 0x474   : > { %v4301_v61 = vsel %vm1711_vm2, %v4219_v6, %v6276_v2  ;;  %v4300_v9 = vsel %vm1711_vm2, %v4217_v58, %v6275_v4  ;;  %v4302_v10 = vsel %vm1646_vm1, %v6275_v4, %v6280_v62  ;;  %v4303_v11 = vsel %vm1646_vm1, %v6276_v2, %v6281_v63  ;;  %v6289_v42 = vpop.permute.xlu1 %6288  ;;  %v6381_v6 = vld [vmem:[%s8285_s9 + $0x1a8] sm:$0xff]  }
 0x475   : > { %v4312_v37 = vpack.c.bf16 %v4301_v61, %v4300_v9  ;;  %v4313_v12 = vpack.c.bf16 %v4303_v11, %v4302_v10  ;;  %v6291_v29 = vunpack.i.h.bf16 %v6289_v42  ;;  %v6290_v33 = vunpack.i.l.bf16 %v6289_v42  ;;  %v6382_v9 = vld [vmem:[%s8285_s9 + $0x1a0] sm:$0xff]   ;;  %v6383_v10 = vld [vmem:[%s8285_s9 + $0x198] sm:$0xff]   ;;  %v6384_v11 = vld [vmem:[%s8285_s9 + $0x190] sm:$0xff]  }
 0x476   : > { %v6463_v61 = vmov 0.0   ;;  %v4949_v42 = vld [vmem:[%s8289_s13] sm:$0xff] }
 0x477   : > { %4793 = vmatprep.mubr.bf16.mxu1 %v4313_v12  ;;  %v4304_v35 = vsel %vm1581_vm0, %v6280_v62, %v6290_v33  ;;  %v4305_v3 = vsel %vm1581_vm0, %v6281_v63, %v6291_v29  ;;  %v6378_v63 = vld [vmem:[%s8285_s9 + $0x108] sm:$0xff]   ;;  %v6379_v62 = vld [vmem:[%s8285_s9 + $0x140] sm:$0xff]  }
 0x478   : > { %4794 = vmatmul.mubr.bf16.vlgmr.msra.gmra.mxu1 %v4312_v37  ;;  %v6299_v38 = vpop.permute.xlu1 %6298  ;;  %v4314_v50 = vpack.c.bf16 %v4305_v3, %v4304_v35  ;;  %v6385_v37 = vld [vmem:[%s8285_s9 + $0x188] sm:$0xff]   ;;  %v6386_v12 = vld [vmem:[%s8285_s9 + $0x180] sm:$0xff]  }
 0x479   : > { %v8023_v22 = vpop.permute.xlu0 %6283  ;;  %5360 = vmatpush3.bf16.msra.mxu1 %v6350_v15  ;;  %v6301_v14 = vunpack.i.h.bf16 %v6299_v38  ;;  %v6300_v19 = vunpack.i.l.bf16 %v6299_v38  ;;  %v4251_v15 = vld [vmem:[#allocation5 + $0x18] ss:$2 sm:$0x7] }
 0x47a   : > { %v6286_v24 = vunpack.i.h.bf16 %v8023_v22  ;;  %v6285_v16 = vunpack.i.l.bf16 %v8023_v22  ;;  %5361 = vmatprep.subr.bf16.mxu1 %v6351_v21  ;;  %v4249_v21 = vld [vmem:[#allocation5 + $0x8] ss:$2 sm:$0xff] }
 0x47b   : > { %v4318_v22 = vpack.c.bf16 %v4251_v15, %v4249_v21 }
 0x47c   : > { %v4306_v5 = vsel %vm1711_vm2, %v4233_v40, %v6285_v16  ;;  %v4307_v26 = vsel %vm1711_vm2, %v4235_v44, %v6286_v24  ;;  %v4960_v40 = vld [vmem:[%s8289_s13 + $0x58] sm:$0xff]  ;;  %v4959_v44 = vld [vmem:[%s8289_s13 + $0x50] sm:$0xff] }
 0x47d   : > { %v4315_v1 = vpack.c.bf16 %v4307_v26, %v4306_v5  ;;  %5362 = vmatpush3.bf16.msra.mxu1 %v6352_v23  ;;  %v6294_v49 = vpop.permute.xlu0 %6293  ;;  %v4962_v23 = vld [vmem:[%s8289_s13 + $0x68] sm:$0xff]  ;;  %v4957_v26 = vld [vmem:[%s8289_s13 + $0x40] sm:$0xff] }
 0x47e   : > { %5363 = vmatprep.subr.bf16.mxu1 %v6353_v46  ;;  %v6296_v39 = vunpack.i.h.bf16 %v6294_v49  ;;  %v6295_v43 = vunpack.i.l.bf16 %v6294_v49  ;;  %v4961_v46 = vld [vmem:[%s8289_s13 + $0x60] sm:$0xff]  ;;  %v4958_v5 = vld [vmem:[%s8289_s13 + $0x48] sm:$0xff] }
 0x47f   : > { %4834 = vmatprep.mubr.bf16.mxu1 %v4315_v1  ;;  %v4956_v1 = vld [vmem:[%s8289_s13 + $0x38] sm:$0xff] }
 0x480   : > { %v4310_v7 = vsel %vm1581_vm0, %v6295_v43, %v6300_v19  ;;  %v4311_v8 = vsel %vm1581_vm0, %v6296_v39, %v6301_v14  ;;  %v4308_v2 = vsel %vm1646_vm1, %v6285_v16, %v6295_v43  ;;  %v4309_v4 = vsel %vm1646_vm1, %v6286_v24, %v6296_v39  ;;  %v4964_v24 = vld [vmem:[%s8289_s13 + $0x78] sm:$0xff]  ;;  %v4963_v16 = vld [vmem:[%s8289_s13 + $0x70] sm:$0xff]  ;;  %v5200_v14 = vld [vmem:[%s8286_s10] ss:$0 sm:$0xff] }
 0x481   : > { %5364 = vmatpush3.bf16.msra.mxu1 %v6354_v28  ;;  %v4317_v20 = vpack.c.bf16 %v4311_v8, %v4310_v7  ;;  %v4316_v58 = vpack.c.bf16 %v4309_v4, %v4308_v2  ;;  %v4955_v28 = vld [vmem:[%s8289_s13 + $0x30] sm:$0xff] }
 0x482   : > { %5365 = vmatprep.subr.bf16.mxu1 %v6355_v30  ;;  %v4954_v30 = vld [vmem:[%s8289_s13 + $0x28] sm:$0xff] }
 0x485   : > { %5366 = vmatpush3.bf16.msra.mxu1 %v6356_v27  ;;  %v4953_v27 = vld [vmem:[%s8289_s13 + $0x20] sm:$0xff] }
 0x486   : > { %5367 = vmatprep.subr.bf16.mxu1 %v6357_v25  ;;  %v4952_v25 = vld [vmem:[%s8289_s13 + $0x18] sm:$0xff] }
 0x489   : > { %5368 = vmatpush3.bf16.msra.mxu1 %v6358_v31  ;;  %v4951_v31 = vld [vmem:[%s8289_s13 + $0x10] sm:$0xff] }
 0x48a   : > { %5369 = vmatprep.subr.bf16.mxu1 %v6359_v32  ;;  %v4950_v32 = vld [vmem:[%s8289_s13 + $0x8] sm:$0xff] }
 0x48d   : > { %5370 = vmatpush3.bf16.msra.mxu1 %v6360_v52 }
 0x48e   : > { %5371 = vmatprep.subr.bf16.mxu1 %v6361_v41 }
 0x491   : > { %5372 = vmatpush3.bf16.msra.mxu1 %v6362_v34 }
 0x492   : > { %5373 = vmatprep.subr.bf16.mxu1 %v6363_v36 }
 0x495   : > { %5374 = vmatpush3.bf16.msra.mxu1 %v6364_v47 }
 0x496   : > { %5381 = vmatprep.subr.bf16.mxu1 %v6365_v51 }
 0x498   : > { %4835 = vmatmul.mubr.bf16.vlgmr.msra.gmra.mxu1 %v4314_v50 }
 0x499   : > { %5382 = vmatpush3.bf16.msra.mxu1 %v6366_v48  ;;  %4875 = vmatprep.mubr.bf16.mxu1 %v4317_v20 }
 0x49a   : > { %5383 = vmatprep.subr.bf16.mxu1 %v6367_v45 }
 0x49d   : > { %5384 = vmatpush3.bf16.msra.mxu1 %v6368_v56 }
 0x49e   : > { %5385 = vmatprep.subr.bf16.mxu1 %v6369_v53 }
 0x4a1   : > { %5386 = vmatpush3.bf16.msra.mxu1 %v6370_v13 }
 0x4a2   : > { %5387 = vmatprep.subr.bf16.mxu1 %v6371_v18 }
 0x4a5   : > { %5388 = vmatpush3.bf16.msra.mxu1 %v6372_v17 }
 0x4a6   : > { %5389 = vmatprep.subr.bf16.mxu1 %v6373_v54 }
 0x4a9   : > { %5390 = vmatpush3.bf16.msra.mxu1 %v6374_v55 }
 0x4aa   : > { %5391 = vmatprep.subr.bf16.mxu1 %v6375_v57 }
 0x4ad   : > { %5392 = vmatpush3.bf16.msra.mxu1 %v6376_v59 }
 0x4ae   : > { %5393 = vmatprep.subr.bf16.mxu1 %v6377_v60 }
 0x4b1   : > { %5394 = vmatpush3.bf16.msra.mxu1 %v6378_v63 }
 0x4b2   : > { %5395 = vmatprep.subr.bf16.mxu1 %v6379_v62 }
 0x4b5   : > { %5396 = vmatpush3.bf16.msra.mxu1 %v6380_v0 }
 0x4b6   : > { %5453 = vmatprep.subr.bf16.mxu1 %v6463_v61 }
 0x4b8   : > { %4876 = vmatmul.mubr.bf16.vlgmr.msra.gmra.mxu1 %v4316_v58 }
 0x4b9   : > { %5454 = vmatpush3.bf16.msra.mxu1 %v6381_v6  ;;  %5465 = vmatprep.mubr.msk.bf16.mxu1 %vm6464_vm10, %v6463_v61 }
 0x4ba   : > { %5455 = vmatprep.subr.bf16.mxu1 %v6463_v61 }
 0x4bd   : > { %5456 = vmatpush3.bf16.msra.mxu1 %v6382_v9 }
 0x4be   : > { %5457 = vmatprep.subr.bf16.mxu1 %v6463_v61 }
 0x4c1   : > { %5458 = vmatpush3.bf16.msra.mxu1 %v6383_v10 }
 0x4c2   : > { %5459 = vmatprep.subr.bf16.mxu1 %v6463_v61 }
 0x4c5   : > { %5460 = vmatpush3.bf16.msra.mxu1 %v6384_v11 }
 0x4c6   : > { %5461 = vmatprep.subr.bf16.mxu1 %v6463_v61 }
 0x4c9   : > { %5462 = vmatpush3.bf16.msra.mxu1 %v6385_v37 }
 0x4ca   : > { %5463 = vmatprep.subr.bf16.mxu1 %v6463_v61 }
 0x4cd   : > { %5464 = vmatpush3.bf16.msra.mxu1 %v6386_v12 }
 0x4ce   : > { %5469 = vmatprep.subr.mxu1 %v6463_v61 }
 0x4d0   : > { %5466 = vmatmul.mubr.msk.bf16.vlgmr.msra.gmra.mxu1 %vm1711_vm2, %v4318_v22  ;;  %v4944_v22 = vld [vmem:[%s8287_s11] sm:$0x1] }
 0x4d1   : > { %5501 = vmatprep.mubr.msk.f32.mxu1 %vm6464_vm10, %v6463_v61  ;;  %5470 = vmatpush3.msra.mxu1 %v4964_v24 }
 0x4d2   : > { %5471 = vmatprep.subr.mxu1 %v6463_v61 }
 0x4d3   : > { %5472 = vmatpush3.msra.mxu1 %v4963_v16  ;;  %v4946_v16 = vld [vmem:[%s8288_s12] sm:$0x1] }
 0x4d4   : > { %5473 = vmatprep.subr.mxu1 %v6463_v61 }
 0x4d5   : > { %5474 = vmatpush3.msra.mxu1 %v4962_v23 }
 0x4d6   : > { %5475 = vmatprep.subr.mxu1 %v6463_v61 }
 0x4d7   : > { %5476 = vmatpush3.msra.mxu1 %v4961_v46 }
 0x4d8   : > { %5477 = vmatprep.subr.mxu1 %v6463_v61 }
 0x4d9   : > { %5478 = vmatpush3.msra.mxu1 %v4960_v40 }
 0x4da   : > { %5479 = vmatprep.subr.mxu1 %v6463_v61 }
 0x4db   : > { %5480 = vmatpush3.msra.mxu1 %v4959_v44  ;;  %v4965_v44 = vld [vmem:[%s8290_s14] sm:$0x1] }
 0x4dc   : > { %5481 = vmatprep.subr.mxu1 %v6463_v61 }
 0x4dd   : > { %5482 = vmatpush3.msra.mxu1 %v4958_v5 }
 0x4de   : > { %5483 = vmatprep.subr.mxu1 %v6463_v61 }
 0x4df   : > { %5484 = vmatpush3.msra.mxu1 %v4957_v26 }
 0x4e0   : > { %5485 = vmatprep.subr.mxu1 %v6463_v61 }
 0x4e1   : > { %5486 = vmatpush3.msra.mxu1 %v4956_v1 }
 0x4e2   : > { %5487 = vmatprep.subr.mxu1 %v6463_v61 }
 0x4e3   : > { %5488 = vmatpush3.msra.mxu1 %v4955_v28 }
 0x4e4   : > { %5489 = vmatprep.subr.mxu1 %v6463_v61 }
 0x4e5   : > { %5490 = vmatpush3.msra.mxu1 %v4954_v30 }
 0x4e6   : > { %5491 = vmatprep.subr.mxu1 %v6463_v61 }
 0x4e7   : > { %5492 = vmatpush3.msra.mxu1 %v4953_v27 }
 0x4e8   : > { %5493 = vmatprep.subr.mxu1 %v6463_v61 }
 0x4e9   : > { %5494 = vmatpush3.msra.mxu1 %v4952_v25 }
 0x4ea   : > { %5495 = vmatprep.subr.mxu1 %v6463_v61 }
 0x4eb   : > { %5496 = vmatpush3.msra.mxu1 %v4951_v31 }
 0x4ec   : > { %5497 = vmatprep.subr.mxu1 %v6463_v61 }
 0x4ed   : > { %5498 = vmatpush3.msra.mxu1 %v4950_v32 }
 0x4ee   : > { %5499 = vmatprep.subr.mxu1 %v6463_v61 }
 0x4ef   : > { %5500 = vmatpush3.msra.mxu1 %v4949_v42 }
 0x538   : > { %v5353_v52 = vpop.f32.mrf.mxu1 }
 0x53a   : > { %v5354_v41 = vpop.f32.mrf.mxu1 }
 0x53b   : > { %v5355_v47 = vadd.f32 %v5354_v41, %v5353_v52 }
 0x53c   : > { %v5356_v49 = vpop.f32.mrf.mxu1 }
 0x53d   : > { %v4796_v35 = vadd.f32 %v5355_v47, %v5200_v14 }
 0x53e   : > { %v5357_v34 = vpop.f32.mrf.mxu1 }
 0x53f   : > { %v5358_v3 = vadd.f32 %v5357_v34, %v5356_v49 }
 0x541   : > { %v4799_v45 = vadd.f32 %v5358_v3, %v5200_v14 }
 0x558   : > { %v5375_v36 = vpop.f32.mrf.mxu1 }
 0x55a   : > { %v5376_v29 = vpop.f32.mrf.mxu1 }
 0x55b   : > { %v5377_v51 = vadd.f32 %v5376_v29, %v5375_v36 }
 0x55c   : > { %v5378_v33 = vpop.f32.mrf.mxu1 }
 0x55d   : > { %v4837_v48 = vadd.f32 %v5377_v51, %v4796_v35 }
 0x55e   : > { %v5379_v38 = vpop.f32.mrf.mxu1 }
 0x55f   : > { %v5380_v50 = vadd.f32 %v5379_v38, %v5378_v33 }
 0x561   : > { %v4840_v13 = vadd.f32 %v5380_v50, %v4799_v45 }
 0x578   : > { %v5397_v39 = vpop.f32.mrf.mxu1 }
 0x57a   : > { %v5398_v43 = vpop.f32.mrf.mxu1 }
 0x57b   : > { %v5399_v7 = vadd.f32 %v5398_v43, %v5397_v39 }
 0x57c   : > { %v5400_v19 = vpop.f32.mrf.mxu1 }
 0x57d   : > { %v4878_v56 = vadd.f32 %v5399_v7, %v4837_v48 }
 0x57e   : > { %v5401_v8 = vpop.f32.mrf.mxu1 }
 0x57f   : > { %v5402_v20 = vadd.f32 %v5401_v8, %v5400_v19 }
 0x581   : > { %v4881_v54 = vadd.f32 %v5402_v20, %v4840_v13 }
 0x590   : > { %v4918_v53 = vpop.f32.mrf.mxu1 }
 0x591   : > { %v4919_v18 = vadd.f32 %v4918_v53, %v4878_v56 }
 0x592   : > { %v5467_v17 = vpop.f32.mrf.mxu1 }
 0x593   : > { %4925 = vst [vmem:[#allocation6] sm:$0xff] %v4919_v18 }
 0x594   : > { %v4921_v55 = vpop.f32.mrf.mxu1 }
 0x595   : > { %v4922_v57 = vadd.f32 %v4921_v55, %v4881_v54 }
 0x596   : > { %v5468_v59 = vpop.f32.mrf.mxu1 }
 0x597   : > { %4926 = vst [vmem:[#allocation6 + $0x8] sm:$0x7] %v4922_v57 }
 0x59a   : > { %v4927_v60 = vld [vmem:[#allocation6] sm:$0x1]  ;;  %v4928_v63 = vld [vmem:[#allocation6 + $0x1] sm:$0x1]  ;;  %v4930_v0 = vld [vmem:[#allocation6 + $0x2] sm:$0x1] }
 0x59b   : > { %v4929_v62 = vmax.f32 %v4927_v60, %v4928_v63  ;;  %v4932_v4 = vld [vmem:[#allocation6 + $0x3] sm:$0x1]  ;;  %v4934_v58 = vld [vmem:[#allocation6 + $0x4] sm:$0x1]  ;;  %v4936_v9 = vld [vmem:[#allocation6 + $0x5] sm:$0x1] }
 0x59c   : > { %v4938_v11 = vld [vmem:[#allocation6 + $0x6] sm:$0x1]  ;;  %v4940_v12 = vld [vmem:[#allocation6 + $0x7] sm:$0x1] }
 0x59d   : > { %v4931_v2 = vmax.f32 %v4929_v62, %v4930_v0 }
 0x59e   : > { %v4942_v21 = vld [vmem:[#allocation6 + $0x8] sm:$0x1] }
 0x59f   : > { %v4933_v6 = vmax.f32 %v4931_v2, %v4932_v4 }
 0x5a1   : > { %v4935_v61 = vmax.f32 %v4933_v6, %v4934_v58 }
 0x5a3   : > { %v4937_v10 = vmax.f32 %v4935_v61, %v4936_v9 }
 0x5a5   : > { %v4939_v37 = vmax.f32 %v4937_v10, %v4938_v11 }
 0x5a7   : > { %v4941_v15 = vmax.f32 %v4939_v37, %v4940_v12 }
 0x5a9   : > { %v4943_v24 = vmax.f32 %v4941_v15, %v4942_v21 }
 0x5ab   : > { %v4945_v23 = vmul.f32 %v4944_v22, %v4943_v24 }
 0x5ad   : > { %v4947_v46 = vadd.f32 %v4946_v16, %v4945_v23 }
 0x5af   : > { %v4948_v40 = vmax.f32 %v4947_v46, 0.0 }
 0x5b1   : > { %5502 = vmatmul.mubr.f32.vlgmr.msra.gmra.mxu1 %v4948_v40 }
 0x671   : > { %v5032_v5 = vpop.f32.mrf.mxu1 }
 0x672   : > { %v5033_v26 = vadd.f32 %v5032_v5, %v4965_v44 }
 0x673   : > { %v5503_v1 = vpop.f32.mrf.mxu1 }
 0x674   : > { %v5037_v28 = vsel %vm5036_vm11, %v5033_v26, -inf }
 0x675   : > { %5038 = vmax.xlane.f32.xlu0 %v5037_v28 }
 0x6fe   : > { %v5039_v30 = vpop.xlane.xlu0 %5038 }
 0x6ff   : > { %v5040_v27 = vsub.f32 %v5033_v26, %v5039_v30 }
 0x701   : > { %v5041_v25 = vmul.f32 1.442695, %v5040_v27 }
 0x703   : > { %6387 = vpow2.f32 %v5041_v25 }
 0x710   : > { %v6388_v31 = vpop.eup %6387 }
 0x711   : > { %v5043_v32 = vsel %vm5036_vm11, %v6388_v31, 0.0 }
 0x712   : > { %5044 = vadd.xlane.f32.xlu1 %v5043_v32 }
 0x79b   : > { %v5045_v42 = vpop.xlane.xlu1 %5044 }
 0x79c   : > { %6389 = vrcp.f32 %v5045_v42 }
 0x7a9   : > { %v6390_v52 = vpop.eup %6389 }
 0x7aa   : > { %v5047_v41 = vmul.f32 %v6390_v52, %v6388_v31 }
 0x7ac   : > { %5048 = vst.msk [vmem:[%s486_s29] sm:$0x1] %vm5036_vm11, %v5047_v41 }
 0x7ad   : > { %6407 = shalt.err (!%p6404_p3)
}
 0x7ae   : > { %s6408_s16 = scalar_lea.hbm %s5060_s25, 16  ;;  %s6412_s29 = scalar_lea.hbm %s8291_s15, 32 }
 0x7af   : > { %p6409_p4 = scmp.ne.s32.totalorder %s5060_s25, %s6408_s16  ;;  %p6413_p9 = scmp.lt.s32.totalorder %s5060_s25, %s8291_s15 }
 0x7b0   : > { %p6414_p10 = scmp.lt.s32.totalorder %s6412_s29, %s6408_s16 }
 0x7b1   : > { %p6410_p7 = pnand %p6409_p4, %p6584_p5 }
 0x7b2   : > { %p6415_p11 = por %p6414_p10, %p6413_p9 }
 0x7b3   : > { %p6411_p8 = pneg %p6410_p7 }
 0x7b5   : > { %p6416_p12 = pnand %p6415_p11, %p6411_p8 }
 0x7b7   : > { %6419 = shalt.err (!%p6416_p12)
}
 0x7b8   : > { %5504 = dma.vmem_to_hbm [thread:$0]  (%p6584_p5), %s5063_s30, 16, %s5060_s25, %s5050_s20  }
 0x7b9 PF: > { %p5510_p13 = scmp.ge.s32.totalorder %s6454_s21, 2  ;;  %s5074_s26 = sand.u32 1, %s6442_s18  }
 0x7ba   : > { %s5075_s27 = scalar_lea.sflag [#allocation8], %s5074_s26 }
 0x7bb   : > { %p5507_p0 = pnand %p5510_p13, %p6588_p6 }
 0x7bd   : > { %p5508_p1 = pneg %p5507_p0 }
 0x7bf   : > { %6437 = dma.done.wait (%p5508_p1), %s5075_s27, 16  }
 0x7c0   : > { %6439 = vsyncadd (%p5508_p1), %s5075_s27, 4294967280  ;;  %s8316_s21 = sld [smem:[#allocation11_spill]]  ;;  %s8319_s18 = smov %s6446_s19 }
 0x7c1   : > { %s8317_s1 = sld [smem:[#allocation10_spill]] }
 0x7c2   : > { %s8318_s20 = sld [smem:[#allocation12_spill]] }
 0x7c6   : > { %p25_p2 = scmp.ge.s32.totalorder %s8316_s21, 4  }
 0x7c7   : > { %s8320_s19 = smov %s8317_s1 }
 0x7c8   :  { %27 = sbr.rel (!%p25_p2) target bundleno = 6 (0x6), region = 429 }
 0x7cd   :  { %5079 = vsyncpa [#allocation8], 1 }
 0x7ce   :  { %5081 = vsyncpa [#allocation8 + $0x1], 1 }

</bundles_post_ra>
